<compile_context>
chip_gen: v6e
topology: v6e:2x2x1
jax: 0.10.0
libtpu: 0.0.40
codegen_flags: <defaults>
</compile_context>

<pallas_src>
import functools

import jax
import jax.numpy as jnp
from jax.experimental import pallas as pl
from jax.experimental.pallas import tpu as pltpu

BN_EPS = 1e-5


# ----------------------------- Pallas kernel ------------------------------ #
def _triplet_attention_kernel(x_ref, w_ref, bn_ref, o_ref, *, k, p):
    """Fused TripletAttention forward.

    x_ref : (N, C, H, W) VMEM   input, NCHW (same layout as torch)
    w_ref : (3*2*k*k,)   SMEM   conv taps [branch, in_ch(max,mean), u, v];
                                branch order = (hw, cw, hc).  The hc taps have
                                their two spatial dims pre-transposed on the
                                host so that, inside the kernel, tap index u
                                always shifts the map's axis -2 and v its
                                axis -1.
    bn_ref: (6,)         SMEM   [g_hw, b_hw, g_cw, b_cw, g_hc, b_hc]
    o_ref : (N, C, H, W) VMEM   output
    """
    x = x_ref[...].astype(jnp.float32)
    N, C, H, W = x.shape

    def circ_pad2(m):
        # circular ("wrap") pad of the last two axes by p
        if p > 0:
            m = jnp.concatenate([m[:, -p:, :], m, m[:, :p, :]], axis=1)
            m = jnp.concatenate([m[:, :, -p:], m, m[:, :, :p]], axis=2)
        return m

    def circ_conv(m_max, m_mean, br):
        # 2-in / 1-out  k x k conv with circular padding, evaluated as
        # shift-and-accumulate (no im2col concat/reshape relayouts).
        A, B = m_max.shape[1], m_max.shape[2]
        pm = circ_pad2(m_max)
        pe = circ_pad2(m_mean)
        base = br * 2 * k * k
        acc = jnp.zeros((N, A, B), dtype=jnp.float32)
        for u in range(k):
            for v in range(k):
                w_max = w_ref[base + u * k + v]            # tap on the max map
                w_mean = w_ref[base + k * k + u * k + v]   # tap on the mean map
                acc = (acc
                       + w_max * pm[:, u:u + A, v:v + B]
                       + w_mean * pe[:, u:u + A, v:v + B])
        return acc

    def bn_sigmoid(y, br):
        # BatchNorm2d(1) training-mode forward (biased batch stats) + sigmoid.
        gamma = bn_ref[2 * br]
        beta = bn_ref[2 * br + 1]
        mean = jnp.mean(y, keepdims=True)
        var = jnp.mean((y - mean) ** 2, keepdims=True)
        z = (y - mean) * jax.lax.rsqrt(var + BN_EPS) * gamma + beta
        return 1.0 / (1.0 + jnp.exp(-z))

    # hw branch (no permute): pool over C, attention map over (H, W).
    s_hw = bn_sigmoid(circ_conv(jnp.max(x, axis=1), jnp.mean(x, axis=1), 0), 0)
    # cw branch (torch permute(0,2,1,3)): pool over H, attention over (C, W).
    s_cw = bn_sigmoid(circ_conv(jnp.max(x, axis=2), jnp.mean(x, axis=2), 1), 1)
    # hc branch (torch permute(0,3,2,1)): pool over W, attention over (C, H)
    # (its taps were pre-transposed on the host).
    s_hc = bn_sigmoid(circ_conv(jnp.max(x, axis=3), jnp.mean(x, axis=3), 2), 2)

    scale = s_hw[:, None, :, :] + s_cw[:, :, None, :] + s_hc[:, :, :, None]
    o_ref[...] = (x * scale * (1.0 / 3.0)).astype(o_ref.dtype)


# ------------------------------ host wrapper ------------------------------- #
@functools.partial(jax.jit, static_argnames=("kernel_size",))
def triplet_attention_pallas(x, params, kernel_size):
    k = kernel_size
    p = (k - 1) // 2

    # Stack the three (1, 2, k, k) conv weights in branch order (hw, cw, hc);
    # transpose the hc branch's spatial tap dims so the kernel can use one
    # uniform convention (tap u shifts axis -2, tap v shifts axis -1).
    w_hw = params["w_hw"][0]
    w_cw = params["w_cw"][0]
    w_hc = jnp.transpose(params["w_hc"][0], (0, 2, 1))
    w_flat = jnp.stack([w_hw, w_cw, w_hc], axis=0).reshape(-1).astype(jnp.float32)

    bn_flat = jnp.concatenate([
        params["g_hw"].reshape(-1), params["b_hw"].reshape(-1),
        params["g_cw"].reshape(-1), params["b_cw"].reshape(-1),
        params["g_hc"].reshape(-1), params["b_hc"].reshape(-1),
    ]).astype(jnp.float32)

    # Whole tensor fits comfortably in VMEM at these shapes; BN couples the
    # batch dimension, so a single kernel invocation (no grid) is both the
    # simplest and the lowest-overhead choice for this launch-bound workload.
    kernel = functools.partial(_triplet_attention_kernel, k=k, p=p)
    return pl.pallas_call(
        kernel,
        out_shape=jax.ShapeDtypeStruct(x.shape, x.dtype),
        in_specs=[
            pl.BlockSpec(memory_space=pltpu.MemorySpace.VMEM),
            pl.BlockSpec(memory_space=pltpu.MemorySpace.SMEM),
            pl.BlockSpec(memory_space=pltpu.MemorySpace.SMEM),
        ],
        out_specs=pl.BlockSpec(memory_space=pltpu.MemorySpace.VMEM),
    )(x, w_flat, bn_flat)


# -------------------------- pure-JAX reference ----------------------------- #
def _attention_gate_ref(x, w, gamma, beta, k):
    p = (k - 1) // 2
    mx = jnp.max(x, axis=1, keepdims=True)
    mn = jnp.mean(x, axis=1, keepdims=True)
    comp = jnp.concatenate([mx, mn], axis=1)                  # (N, 2, A, B)
    if p > 0:
        comp = jnp.pad(comp, ((0, 0), (0, 0), (p, p), (p, p)), mode="wrap")
    y = jax.lax.conv_general_dilated(
        comp, w, window_strides=(1, 1), padding="VALID",
        dimension_numbers=("NCHW", "OIHW", "NCHW"))
    mean = jnp.mean(y)
    var = jnp.mean((y - mean) ** 2)
    y = (y - mean) * jax.lax.rsqrt(var + BN_EPS)
    y = y * gamma.reshape(1, -1, 1, 1) + beta.reshape(1, -1, 1, 1)
    return x * jax.nn.sigmoid(y)


@functools.partial(jax.jit, static_argnames=("kernel_size",))
def triplet_attention_ref(x, params, kernel_size):
    k = kernel_size
    x1 = jnp.transpose(x, (0, 2, 1, 3))
    o1 = _attention_gate_ref(x1, params["w_cw"], params["g_cw"], params["b_cw"], k)
    o11 = jnp.transpose(o1, (0, 2, 1, 3))
    x2 = jnp.transpose(x, (0, 3, 2, 1))
    o2 = _attention_gate_ref(x2, params["w_hc"], params["g_hc"], params["b_hc"], k)
    o21 = jnp.transpose(o2, (0, 3, 2, 1))
    o3 = _attention_gate_ref(x, params["w_hw"], params["g_hw"], params["b_hw"], k)
    return (o3 + o11 + o21) / 3.0


# ---------------------------------- main ----------------------------------- #
if __name__ == "__main__":
    key = jax.random.PRNGKey(0)
    ks = jax.random.split(key, 10)

    # Small deterministic input; (H, W) = (8, 128) maps exactly onto one
    # (sublane, lane) vreg tile so kernel I/O is lane-dense.
    N, C, H, W = 2, 16, 8, 128
    kernel_size = 3

    x = jax.random.normal(ks[0], (N, C, H, W), jnp.float32)
    params = {
        "w_hw": jax.random.normal(ks[1], (1, 2, kernel_size, kernel_size), jnp.float32) * 0.3,
        "w_cw": jax.random.normal(ks[2], (1, 2, kernel_size, kernel_size), jnp.float32) * 0.3,
        "w_hc": jax.random.normal(ks[3], (1, 2, kernel_size, kernel_size), jnp.float32) * 0.3,
        "g_hw": 1.0 + 0.1 * jax.random.normal(ks[4], (1,), jnp.float32),
        "g_cw": 1.0 + 0.1 * jax.random.normal(ks[5], (1,), jnp.float32),
        "g_hc": 1.0 + 0.1 * jax.random.normal(ks[6], (1,), jnp.float32),
        "b_hw": 0.1 * jax.random.normal(ks[7], (1,), jnp.float32),
        "b_cw": 0.1 * jax.random.normal(ks[8], (1,), jnp.float32),
        "b_hc": 0.1 * jax.random.normal(ks[9], (1,), jnp.float32),
    }

    out = jax.block_until_ready(triplet_attention_pallas(x, params, kernel_size))
    ref = jax.block_until_ready(triplet_attention_ref(x, params, kernel_size))

    assert out.shape == (N, C, H, W), out.shape
    err = float(jnp.max(jnp.abs(out - ref)))
    assert jnp.allclose(out, ref, atol=1e-4, rtol=1e-4), err

    print("KERNEL_OK")
</pallas_src>

<mosaic_0001>
module attributes {stable_mosaic.version = 11 : i64} {
  func.func @_triplet_attention_kernel(%arg0: memref<2x16x8x128xf32, #tpu.memory_space<vmem>>, %arg1: memref<54xf32, #tpu.memory_space<smem>>, %arg2: memref<6xf32, #tpu.memory_space<smem>>, %arg3: memref<2x16x8x128xf32, #tpu.memory_space<vmem>>) attributes {dimension_semantics = [], scalar_prefetch = 0 : i64, scratch_operands = 0 : i64, tpu.core_type = #tpu.core_type<tc>} {
    %c0 = arith.constant 0 : index
    %c0_0 = arith.constant 0 : index
    %c0_1 = arith.constant 0 : index
    %c0_2 = arith.constant 0 : index
    %0 = vector.load %arg0[%c0, %c0_0, %c0_1, %c0_2] : memref<2x16x8x128xf32, #tpu.memory_space<vmem>>, vector<2x16x8x128xf32>
    %cst = arith.constant dense<0xFF800000> : vector<2x8x128xf32>
    %1 = vector.multi_reduction <maximumf>, %0, %cst [1] : vector<2x16x8x128xf32> to vector<2x8x128xf32>
    %cst_3 = arith.constant dense<0.000000e+00> : vector<2x8x128xf32>
    %2 = vector.multi_reduction <add>, %0, %cst_3 [1] : vector<2x16x8x128xf32> to vector<2x8x128xf32>
    %cst_4 = arith.constant 1.600000e+01 : f32
    %3 = vector.broadcast %cst_4 : f32 to vector<2x8x128xf32>
    %4 = arith.divf %2, %3 : vector<2x8x128xf32>
    %5 = vector.extract_strided_slice %1 {offsets = [0, 7, 0], sizes = [2, 1, 128], strides = [1, 1, 1]} : vector<2x8x128xf32> to vector<2x1x128xf32>
    %6 = vector.extract_strided_slice %1 {offsets = [0, 0, 0], sizes = [2, 1, 128], strides = [1, 1, 1]} : vector<2x8x128xf32> to vector<2x1x128xf32>
    %7 = tpu.concatenate %5, %1, %6 in 1 : vector<2x1x128xf32>, vector<2x8x128xf32>, vector<2x1x128xf32> -> vector<2x10x128xf32>
    %8 = vector.extract_strided_slice %7 {offsets = [0, 0, 127], sizes = [2, 10, 1], strides = [1, 1, 1]} : vector<2x10x128xf32> to vector<2x10x1xf32>
    %9 = vector.extract_strided_slice %7 {offsets = [0, 0, 0], sizes = [2, 10, 1], strides = [1, 1, 1]} : vector<2x10x128xf32> to vector<2x10x1xf32>
    %10 = tpu.concatenate %8, %7, %9 in 2 : vector<2x10x1xf32>, vector<2x10x128xf32>, vector<2x10x1xf32> -> vector<2x10x130xf32>
    %11 = vector.extract_strided_slice %4 {offsets = [0, 7, 0], sizes = [2, 1, 128], strides = [1, 1, 1]} : vector<2x8x128xf32> to vector<2x1x128xf32>
    %12 = vector.extract_strided_slice %4 {offsets = [0, 0, 0], sizes = [2, 1, 128], strides = [1, 1, 1]} : vector<2x8x128xf32> to vector<2x1x128xf32>
    %13 = tpu.concatenate %11, %4, %12 in 1 : vector<2x1x128xf32>, vector<2x8x128xf32>, vector<2x1x128xf32> -> vector<2x10x128xf32>
    %14 = vector.extract_strided_slice %13 {offsets = [0, 0, 127], sizes = [2, 10, 1], strides = [1, 1, 1]} : vector<2x10x128xf32> to vector<2x10x1xf32>
    %15 = vector.extract_strided_slice %13 {offsets = [0, 0, 0], sizes = [2, 10, 1], strides = [1, 1, 1]} : vector<2x10x128xf32> to vector<2x10x1xf32>
    %16 = tpu.concatenate %14, %13, %15 in 2 : vector<2x10x1xf32>, vector<2x10x128xf32>, vector<2x10x1xf32> -> vector<2x10x130xf32>
    %cst_5 = arith.constant 0.000000e+00 : f32
    %17 = vector.broadcast %cst_5 : f32 to vector<2x8x128xf32>
    %c0_6 = arith.constant 0 : index
    %18 = memref.load %arg1[%c0_6] : memref<54xf32, #tpu.memory_space<smem>>
    %c9 = arith.constant 9 : index
    %19 = memref.load %arg1[%c9] : memref<54xf32, #tpu.memory_space<smem>>
    %20 = vector.extract_strided_slice %10 {offsets = [0, 0, 0], sizes = [2, 8, 128], strides = [1, 1, 1]} : vector<2x10x130xf32> to vector<2x8x128xf32>
    %21 = vector.broadcast %18 : f32 to vector<2x8x128xf32>
    %22 = arith.mulf %21, %20 : vector<2x8x128xf32>
    %23 = arith.addf %17, %22 : vector<2x8x128xf32>
    %24 = vector.extract_strided_slice %16 {offsets = [0, 0, 0], sizes = [2, 8, 128], strides = [1, 1, 1]} : vector<2x10x130xf32> to vector<2x8x128xf32>
    %25 = vector.broadcast %19 : f32 to vector<2x8x128xf32>
    %26 = arith.mulf %25, %24 : vector<2x8x128xf32>
    %27 = arith.addf %23, %26 : vector<2x8x128xf32>
    %c1 = arith.constant 1 : index
    %28 = memref.load %arg1[%c1] : memref<54xf32, #tpu.memory_space<smem>>
    %c10 = arith.constant 10 : index
    %29 = memref.load %arg1[%c10] : memref<54xf32, #tpu.memory_space<smem>>
    %30 = vector.extract_strided_slice %10 {offsets = [0, 0, 1], sizes = [2, 8, 128], strides = [1, 1, 1]} : vector<2x10x130xf32> to vector<2x8x128xf32>
    %31 = vector.broadcast %28 : f32 to vector<2x8x128xf32>
    %32 = arith.mulf %31, %30 : vector<2x8x128xf32>
    %33 = arith.addf %27, %32 : vector<2x8x128xf32>
    %34 = vector.extract_strided_slice %16 {offsets = [0, 0, 1], sizes = [2, 8, 128], strides = [1, 1, 1]} : vector<2x10x130xf32> to vector<2x8x128xf32>
    %35 = vector.broadcast %29 : f32 to vector<2x8x128xf32>
    %36 = arith.mulf %35, %34 : vector<2x8x128xf32>
    %37 = arith.addf %33, %36 : vector<2x8x128xf32>
    %c2 = arith.constant 2 : index
    %38 = memref.load %arg1[%c2] : memref<54xf32, #tpu.memory_space<smem>>
    %c11 = arith.constant 11 : index
    %39 = memref.load %arg1[%c11] : memref<54xf32, #tpu.memory_space<smem>>
    %40 = vector.extract_strided_slice %10 {offsets = [0, 0, 2], sizes = [2, 8, 128], strides = [1, 1, 1]} : vector<2x10x130xf32> to vector<2x8x128xf32>
    %41 = vector.broadcast %38 : f32 to vector<2x8x128xf32>
    %42 = arith.mulf %41, %40 : vector<2x8x128xf32>
    %43 = arith.addf %37, %42 : vector<2x8x128xf32>
    %44 = vector.extract_strided_slice %16 {offsets = [0, 0, 2], sizes = [2, 8, 128], strides = [1, 1, 1]} : vector<2x10x130xf32> to vector<2x8x128xf32>
    %45 = vector.broadcast %39 : f32 to vector<2x8x128xf32>
    %46 = arith.mulf %45, %44 : vector<2x8x128xf32>
    %47 = arith.addf %43, %46 : vector<2x8x128xf32>
    %c3 = arith.constant 3 : index
    %48 = memref.load %arg1[%c3] : memref<54xf32, #tpu.memory_space<smem>>
    %c12 = arith.constant 12 : index
    %49 = memref.load %arg1[%c12] : memref<54xf32, #tpu.memory_space<smem>>
    %50 = vector.extract_strided_slice %10 {offsets = [0, 1, 0], sizes = [2, 8, 128], strides = [1, 1, 1]} : vector<2x10x130xf32> to vector<2x8x128xf32>
    %51 = vector.broadcast %48 : f32 to vector<2x8x128xf32>
    %52 = arith.mulf %51, %50 : vector<2x8x128xf32>
    %53 = arith.addf %47, %52 : vector<2x8x128xf32>
    %54 = vector.extract_strided_slice %16 {offsets = [0, 1, 0], sizes = [2, 8, 128], strides = [1, 1, 1]} : vector<2x10x130xf32> to vector<2x8x128xf32>
    %55 = vector.broadcast %49 : f32 to vector<2x8x128xf32>
    %56 = arith.mulf %55, %54 : vector<2x8x128xf32>
    %57 = arith.addf %53, %56 : vector<2x8x128xf32>
    %c4 = arith.constant 4 : index
    %58 = memref.load %arg1[%c4] : memref<54xf32, #tpu.memory_space<smem>>
    %c13 = arith.constant 13 : index
    %59 = memref.load %arg1[%c13] : memref<54xf32, #tpu.memory_space<smem>>
    %60 = vector.extract_strided_slice %10 {offsets = [0, 1, 1], sizes = [2, 8, 128], strides = [1, 1, 1]} : vector<2x10x130xf32> to vector<2x8x128xf32>
    %61 = vector.broadcast %58 : f32 to vector<2x8x128xf32>
    %62 = arith.mulf %61, %60 : vector<2x8x128xf32>
    %63 = arith.addf %57, %62 : vector<2x8x128xf32>
    %64 = vector.extract_strided_slice %16 {offsets = [0, 1, 1], sizes = [2, 8, 128], strides = [1, 1, 1]} : vector<2x10x130xf32> to vector<2x8x128xf32>
    %65 = vector.broadcast %59 : f32 to vector<2x8x128xf32>
    %66 = arith.mulf %65, %64 : vector<2x8x128xf32>
    %67 = arith.addf %63, %66 : vector<2x8x128xf32>
    %c5 = arith.constant 5 : index
    %68 = memref.load %arg1[%c5] : memref<54xf32, #tpu.memory_space<smem>>
    %c14 = arith.constant 14 : index
    %69 = memref.load %arg1[%c14] : memref<54xf32, #tpu.memory_space<smem>>
    %70 = vector.extract_strided_slice %10 {offsets = [0, 1, 2], sizes = [2, 8, 128], strides = [1, 1, 1]} : vector<2x10x130xf32> to vector<2x8x128xf32>
    %71 = vector.broadcast %68 : f32 to vector<2x8x128xf32>
    %72 = arith.mulf %71, %70 : vector<2x8x128xf32>
    %73 = arith.addf %67, %72 : vector<2x8x128xf32>
    %74 = vector.extract_strided_slice %16 {offsets = [0, 1, 2], sizes = [2, 8, 128], strides = [1, 1, 1]} : vector<2x10x130xf32> to vector<2x8x128xf32>
    %75 = vector.broadcast %69 : f32 to vector<2x8x128xf32>
    %76 = arith.mulf %75, %74 : vector<2x8x128xf32>
    %77 = arith.addf %73, %76 : vector<2x8x128xf32>
    %c6 = arith.constant 6 : index
    %78 = memref.load %arg1[%c6] : memref<54xf32, #tpu.memory_space<smem>>
    %c15 = arith.constant 15 : index
    %79 = memref.load %arg1[%c15] : memref<54xf32, #tpu.memory_space<smem>>
    %80 = vector.extract_strided_slice %10 {offsets = [0, 2, 0], sizes = [2, 8, 128], strides = [1, 1, 1]} : vector<2x10x130xf32> to vector<2x8x128xf32>
    %81 = vector.broadcast %78 : f32 to vector<2x8x128xf32>
    %82 = arith.mulf %81, %80 : vector<2x8x128xf32>
    %83 = arith.addf %77, %82 : vector<2x8x128xf32>
    %84 = vector.extract_strided_slice %16 {offsets = [0, 2, 0], sizes = [2, 8, 128], strides = [1, 1, 1]} : vector<2x10x130xf32> to vector<2x8x128xf32>
    %85 = vector.broadcast %79 : f32 to vector<2x8x128xf32>
    %86 = arith.mulf %85, %84 : vector<2x8x128xf32>
    %87 = arith.addf %83, %86 : vector<2x8x128xf32>
    %c7 = arith.constant 7 : index
    %88 = memref.load %arg1[%c7] : memref<54xf32, #tpu.memory_space<smem>>
    %c16 = arith.constant 16 : index
    %89 = memref.load %arg1[%c16] : memref<54xf32, #tpu.memory_space<smem>>
    %90 = vector.extract_strided_slice %10 {offsets = [0, 2, 1], sizes = [2, 8, 128], strides = [1, 1, 1]} : vector<2x10x130xf32> to vector<2x8x128xf32>
    %91 = vector.broadcast %88 : f32 to vector<2x8x128xf32>
    %92 = arith.mulf %91, %90 : vector<2x8x128xf32>
    %93 = arith.addf %87, %92 : vector<2x8x128xf32>
    %94 = vector.extract_strided_slice %16 {offsets = [0, 2, 1], sizes = [2, 8, 128], strides = [1, 1, 1]} : vector<2x10x130xf32> to vector<2x8x128xf32>
    %95 = vector.broadcast %89 : f32 to vector<2x8x128xf32>
    %96 = arith.mulf %95, %94 : vector<2x8x128xf32>
    %97 = arith.addf %93, %96 : vector<2x8x128xf32>
    %c8 = arith.constant 8 : index
    %98 = memref.load %arg1[%c8] : memref<54xf32, #tpu.memory_space<smem>>
    %c17 = arith.constant 17 : index
    %99 = memref.load %arg1[%c17] : memref<54xf32, #tpu.memory_space<smem>>
    %100 = vector.extract_strided_slice %10 {offsets = [0, 2, 2], sizes = [2, 8, 128], strides = [1, 1, 1]} : vector<2x10x130xf32> to vector<2x8x128xf32>
    %101 = vector.broadcast %98 : f32 to vector<2x8x128xf32>
    %102 = arith.mulf %101, %100 : vector<2x8x128xf32>
    %103 = arith.addf %97, %102 : vector<2x8x128xf32>
    %104 = vector.extract_strided_slice %16 {offsets = [0, 2, 2], sizes = [2, 8, 128], strides = [1, 1, 1]} : vector<2x10x130xf32> to vector<2x8x128xf32>
    %105 = vector.broadcast %99 : f32 to vector<2x8x128xf32>
    %106 = arith.mulf %105, %104 : vector<2x8x128xf32>
    %107 = arith.addf %103, %106 : vector<2x8x128xf32>
    %c0_7 = arith.constant 0 : index
    %108 = memref.load %arg2[%c0_7] : memref<6xf32, #tpu.memory_space<smem>>
    %c1_8 = arith.constant 1 : index
    %109 = memref.load %arg2[%c1_8] : memref<6xf32, #tpu.memory_space<smem>>
    %110 = vector.shape_cast %107 : vector<2x8x128xf32> to vector<1x2x8x128xf32>
    %cst_9 = arith.constant dense<0.000000e+00> : vector<1xf32>
    %111 = vector.multi_reduction <add>, %110, %cst_9 [1, 2, 3] : vector<1x2x8x128xf32> to vector<1xf32>
    %112 = vector.shape_cast %111 : vector<1xf32> to vector<1x1x1x1xf32>
    %113 = vector.extract %112[0, 0, 0, 0] : f32 from vector<1x1x1x1xf32>
    %114 = vector.broadcast %113 : f32 to vector<1x1x1xf32>
    %cst_10 = arith.constant 2.048000e+03 : f32
    %115 = vector.broadcast %cst_10 : f32 to vector<1x1x1xf32>
    %116 = arith.divf %114, %115 : vector<1x1x1xf32>
    %117 = vector.broadcast %116 : vector<1x1x1xf32> to vector<2x8x128xf32>
    %118 = arith.subf %107, %117 : vector<2x8x128xf32>
    %119 = arith.mulf %118, %118 : vector<2x8x128xf32>
    %120 = vector.shape_cast %119 : vector<2x8x128xf32> to vector<1x2x8x128xf32>
    %cst_11 = arith.constant dense<0.000000e+00> : vector<1xf32>
    %121 = vector.multi_reduction <add>, %120, %cst_11 [1, 2, 3] : vector<1x2x8x128xf32> to vector<1xf32>
    %122 = vector.shape_cast %121 : vector<1xf32> to vector<1x1x1x1xf32>
    %123 = vector.extract %122[0, 0, 0, 0] : f32 from vector<1x1x1x1xf32>
    %124 = vector.broadcast %123 : f32 to vector<1x1x1xf32>
    %cst_12 = arith.constant 2.048000e+03 : f32
    %125 = vector.broadcast %cst_12 : f32 to vector<1x1x1xf32>
    %126 = arith.divf %124, %125 : vector<1x1x1xf32>
    %127 = vector.broadcast %116 : vector<1x1x1xf32> to vector<2x8x128xf32>
    %128 = arith.subf %107, %127 : vector<2x8x128xf32>
    %cst_13 = arith.constant 9.99999974E-6 : f32
    %129 = vector.broadcast %cst_13 : f32 to vector<1x1x1xf32>
    %130 = arith.addf %126, %129 : vector<1x1x1xf32>
    %131 = math.rsqrt %130 : vector<1x1x1xf32>
    %132 = vector.broadcast %131 : vector<1x1x1xf32> to vector<2x8x128xf32>
    %133 = arith.mulf %128, %132 : vector<2x8x128xf32>
    %134 = vector.broadcast %108 : f32 to vector<2x8x128xf32>
    %135 = arith.mulf %133, %134 : vector<2x8x128xf32>
    %136 = vector.broadcast %109 : f32 to vector<2x8x128xf32>
    %137 = arith.addf %135, %136 : vector<2x8x128xf32>
    %cst_14 = arith.constant 0.000000e+00 : f32
    %138 = vector.broadcast %cst_14 : f32 to vector<2x8x128xf32>
    %139 = arith.subf %138, %137 : vector<2x8x128xf32>
    %140 = math.exp %139 : vector<2x8x128xf32>
    %cst_15 = arith.constant 1.000000e+00 : f32
    %141 = vector.broadcast %cst_15 : f32 to vector<2x8x128xf32>
    %142 = arith.addf %141, %140 : vector<2x8x128xf32>
    %cst_16 = arith.constant 1.000000e+00 : f32
    %143 = vector.broadcast %cst_16 : f32 to vector<2x8x128xf32>
    %144 = arith.divf %143, %142 : vector<2x8x128xf32>
    %cst_17 = arith.constant dense<0xFF800000> : vector<2x16x128xf32>
    %145 = vector.multi_reduction <maximumf>, %0, %cst_17 [2] : vector<2x16x8x128xf32> to vector<2x16x128xf32>
    %cst_18 = arith.constant dense<0.000000e+00> : vector<2x16x128xf32>
    %146 = vector.multi_reduction <add>, %0, %cst_18 [2] : vector<2x16x8x128xf32> to vector<2x16x128xf32>
    %cst_19 = arith.constant 8.000000e+00 : f32
    %147 = vector.broadcast %cst_19 : f32 to vector<2x16x128xf32>
    %148 = arith.divf %146, %147 : vector<2x16x128xf32>
    %149 = vector.extract_strided_slice %145 {offsets = [0, 15, 0], sizes = [2, 1, 128], strides = [1, 1, 1]} : vector<2x16x128xf32> to vector<2x1x128xf32>
    %150 = vector.extract_strided_slice %145 {offsets = [0, 0, 0], sizes = [2, 1, 128], strides = [1, 1, 1]} : vector<2x16x128xf32> to vector<2x1x128xf32>
    %151 = tpu.concatenate %149, %145, %150 in 1 : vector<2x1x128xf32>, vector<2x16x128xf32>, vector<2x1x128xf32> -> vector<2x18x128xf32>
    %152 = vector.extract_strided_slice %151 {offsets = [0, 0, 127], sizes = [2, 18, 1], strides = [1, 1, 1]} : vector<2x18x128xf32> to vector<2x18x1xf32>
    %153 = vector.extract_strided_slice %151 {offsets = [0, 0, 0], sizes = [2, 18, 1], strides = [1, 1, 1]} : vector<2x18x128xf32> to vector<2x18x1xf32>
    %154 = tpu.concatenate %152, %151, %153 in 2 : vector<2x18x1xf32>, vector<2x18x128xf32>, vector<2x18x1xf32> -> vector<2x18x130xf32>
    %155 = vector.extract_strided_slice %148 {offsets = [0, 15, 0], sizes = [2, 1, 128], strides = [1, 1, 1]} : vector<2x16x128xf32> to vector<2x1x128xf32>
    %156 = vector.extract_strided_slice %148 {offsets = [0, 0, 0], sizes = [2, 1, 128], strides = [1, 1, 1]} : vector<2x16x128xf32> to vector<2x1x128xf32>
    %157 = tpu.concatenate %155, %148, %156 in 1 : vector<2x1x128xf32>, vector<2x16x128xf32>, vector<2x1x128xf32> -> vector<2x18x128xf32>
    %158 = vector.extract_strided_slice %157 {offsets = [0, 0, 127], sizes = [2, 18, 1], strides = [1, 1, 1]} : vector<2x18x128xf32> to vector<2x18x1xf32>
    %159 = vector.extract_strided_slice %157 {offsets = [0, 0, 0], sizes = [2, 18, 1], strides = [1, 1, 1]} : vector<2x18x128xf32> to vector<2x18x1xf32>
    %160 = tpu.concatenate %158, %157, %159 in 2 : vector<2x18x1xf32>, vector<2x18x128xf32>, vector<2x18x1xf32> -> vector<2x18x130xf32>
    %cst_20 = arith.constant 0.000000e+00 : f32
    %161 = vector.broadcast %cst_20 : f32 to vector<2x16x128xf32>
    %c18 = arith.constant 18 : index
    %162 = memref.load %arg1[%c18] : memref<54xf32, #tpu.memory_space<smem>>
    %c27 = arith.constant 27 : index
    %163 = memref.load %arg1[%c27] : memref<54xf32, #tpu.memory_space<smem>>
    %164 = vector.extract_strided_slice %154 {offsets = [0, 0, 0], sizes = [2, 16, 128], strides = [1, 1, 1]} : vector<2x18x130xf32> to vector<2x16x128xf32>
    %165 = vector.broadcast %162 : f32 to vector<2x16x128xf32>
    %166 = arith.mulf %165, %164 : vector<2x16x128xf32>
    %167 = arith.addf %161, %166 : vector<2x16x128xf32>
    %168 = vector.extract_strided_slice %160 {offsets = [0, 0, 0], sizes = [2, 16, 128], strides = [1, 1, 1]} : vector<2x18x130xf32> to vector<2x16x128xf32>
    %169 = vector.broadcast %163 : f32 to vector<2x16x128xf32>
    %170 = arith.mulf %169, %168 : vector<2x16x128xf32>
    %171 = arith.addf %167, %170 : vector<2x16x128xf32>
    %c19 = arith.constant 19 : index
    %172 = memref.load %arg1[%c19] : memref<54xf32, #tpu.memory_space<smem>>
    %c28 = arith.constant 28 : index
    %173 = memref.load %arg1[%c28] : memref<54xf32, #tpu.memory_space<smem>>
    %174 = vector.extract_strided_slice %154 {offsets = [0, 0, 1], sizes = [2, 16, 128], strides = [1, 1, 1]} : vector<2x18x130xf32> to vector<2x16x128xf32>
    %175 = vector.broadcast %172 : f32 to vector<2x16x128xf32>
    %176 = arith.mulf %175, %174 : vector<2x16x128xf32>
    %177 = arith.addf %171, %176 : vector<2x16x128xf32>
    %178 = vector.extract_strided_slice %160 {offsets = [0, 0, 1], sizes = [2, 16, 128], strides = [1, 1, 1]} : vector<2x18x130xf32> to vector<2x16x128xf32>
    %179 = vector.broadcast %173 : f32 to vector<2x16x128xf32>
    %180 = arith.mulf %179, %178 : vector<2x16x128xf32>
    %181 = arith.addf %177, %180 : vector<2x16x128xf32>
    %c20 = arith.constant 20 : index
    %182 = memref.load %arg1[%c20] : memref<54xf32, #tpu.memory_space<smem>>
    %c29 = arith.constant 29 : index
    %183 = memref.load %arg1[%c29] : memref<54xf32, #tpu.memory_space<smem>>
    %184 = vector.extract_strided_slice %154 {offsets = [0, 0, 2], sizes = [2, 16, 128], strides = [1, 1, 1]} : vector<2x18x130xf32> to vector<2x16x128xf32>
    %185 = vector.broadcast %182 : f32 to vector<2x16x128xf32>
    %186 = arith.mulf %185, %184 : vector<2x16x128xf32>
    %187 = arith.addf %181, %186 : vector<2x16x128xf32>
    %188 = vector.extract_strided_slice %160 {offsets = [0, 0, 2], sizes = [2, 16, 128], strides = [1, 1, 1]} : vector<2x18x130xf32> to vector<2x16x128xf32>
    %189 = vector.broadcast %183 : f32 to vector<2x16x128xf32>
    %190 = arith.mulf %189, %188 : vector<2x16x128xf32>
    %191 = arith.addf %187, %190 : vector<2x16x128xf32>
    %c21 = arith.constant 21 : index
    %192 = memref.load %arg1[%c21] : memref<54xf32, #tpu.memory_space<smem>>
    %c30 = arith.constant 30 : index
    %193 = memref.load %arg1[%c30] : memref<54xf32, #tpu.memory_space<smem>>
    %194 = vector.extract_strided_slice %154 {offsets = [0, 1, 0], sizes = [2, 16, 128], strides = [1, 1, 1]} : vector<2x18x130xf32> to vector<2x16x128xf32>
    %195 = vector.broadcast %192 : f32 to vector<2x16x128xf32>
    %196 = arith.mulf %195, %194 : vector<2x16x128xf32>
    %197 = arith.addf %191, %196 : vector<2x16x128xf32>
    %198 = vector.extract_strided_slice %160 {offsets = [0, 1, 0], sizes = [2, 16, 128], strides = [1, 1, 1]} : vector<2x18x130xf32> to vector<2x16x128xf32>
    %199 = vector.broadcast %193 : f32 to vector<2x16x128xf32>
    %200 = arith.mulf %199, %198 : vector<2x16x128xf32>
    %201 = arith.addf %197, %200 : vector<2x16x128xf32>
    %c22 = arith.constant 22 : index
    %202 = memref.load %arg1[%c22] : memref<54xf32, #tpu.memory_space<smem>>
    %c31 = arith.constant 31 : index
    %203 = memref.load %arg1[%c31] : memref<54xf32, #tpu.memory_space<smem>>
    %204 = vector.extract_strided_slice %154 {offsets = [0, 1, 1], sizes = [2, 16, 128], strides = [1, 1, 1]} : vector<2x18x130xf32> to vector<2x16x128xf32>
    %205 = vector.broadcast %202 : f32 to vector<2x16x128xf32>
    %206 = arith.mulf %205, %204 : vector<2x16x128xf32>
    %207 = arith.addf %201, %206 : vector<2x16x128xf32>
    %208 = vector.extract_strided_slice %160 {offsets = [0, 1, 1], sizes = [2, 16, 128], strides = [1, 1, 1]} : vector<2x18x130xf32> to vector<2x16x128xf32>
    %209 = vector.broadcast %203 : f32 to vector<2x16x128xf32>
    %210 = arith.mulf %209, %208 : vector<2x16x128xf32>
    %211 = arith.addf %207, %210 : vector<2x16x128xf32>
    %c23 = arith.constant 23 : index
    %212 = memref.load %arg1[%c23] : memref<54xf32, #tpu.memory_space<smem>>
    %c32 = arith.constant 32 : index
    %213 = memref.load %arg1[%c32] : memref<54xf32, #tpu.memory_space<smem>>
    %214 = vector.extract_strided_slice %154 {offsets = [0, 1, 2], sizes = [2, 16, 128], strides = [1, 1, 1]} : vector<2x18x130xf32> to vector<2x16x128xf32>
    %215 = vector.broadcast %212 : f32 to vector<2x16x128xf32>
    %216 = arith.mulf %215, %214 : vector<2x16x128xf32>
    %217 = arith.addf %211, %216 : vector<2x16x128xf32>
    %218 = vector.extract_strided_slice %160 {offsets = [0, 1, 2], sizes = [2, 16, 128], strides = [1, 1, 1]} : vector<2x18x130xf32> to vector<2x16x128xf32>
    %219 = vector.broadcast %213 : f32 to vector<2x16x128xf32>
    %220 = arith.mulf %219, %218 : vector<2x16x128xf32>
    %221 = arith.addf %217, %220 : vector<2x16x128xf32>
    %c24 = arith.constant 24 : index
    %222 = memref.load %arg1[%c24] : memref<54xf32, #tpu.memory_space<smem>>
    %c33 = arith.constant 33 : index
    %223 = memref.load %arg1[%c33] : memref<54xf32, #tpu.memory_space<smem>>
    %224 = vector.extract_strided_slice %154 {offsets = [0, 2, 0], sizes = [2, 16, 128], strides = [1, 1, 1]} : vector<2x18x130xf32> to vector<2x16x128xf32>
    %225 = vector.broadcast %222 : f32 to vector<2x16x128xf32>
    %226 = arith.mulf %225, %224 : vector<2x16x128xf32>
    %227 = arith.addf %221, %226 : vector<2x16x128xf32>
    %228 = vector.extract_strided_slice %160 {offsets = [0, 2, 0], sizes = [2, 16, 128], strides = [1, 1, 1]} : vector<2x18x130xf32> to vector<2x16x128xf32>
    %229 = vector.broadcast %223 : f32 to vector<2x16x128xf32>
    %230 = arith.mulf %229, %228 : vector<2x16x128xf32>
    %231 = arith.addf %227, %230 : vector<2x16x128xf32>
    %c25 = arith.constant 25 : index
    %232 = memref.load %arg1[%c25] : memref<54xf32, #tpu.memory_space<smem>>
    %c34 = arith.constant 34 : index
    %233 = memref.load %arg1[%c34] : memref<54xf32, #tpu.memory_space<smem>>
    %234 = vector.extract_strided_slice %154 {offsets = [0, 2, 1], sizes = [2, 16, 128], strides = [1, 1, 1]} : vector<2x18x130xf32> to vector<2x16x128xf32>
    %235 = vector.broadcast %232 : f32 to vector<2x16x128xf32>
    %236 = arith.mulf %235, %234 : vector<2x16x128xf32>
    %237 = arith.addf %231, %236 : vector<2x16x128xf32>
    %238 = vector.extract_strided_slice %160 {offsets = [0, 2, 1], sizes = [2, 16, 128], strides = [1, 1, 1]} : vector<2x18x130xf32> to vector<2x16x128xf32>
    %239 = vector.broadcast %233 : f32 to vector<2x16x128xf32>
    %240 = arith.mulf %239, %238 : vector<2x16x128xf32>
    %241 = arith.addf %237, %240 : vector<2x16x128xf32>
    %c26 = arith.constant 26 : index
    %242 = memref.load %arg1[%c26] : memref<54xf32, #tpu.memory_space<smem>>
    %c35 = arith.constant 35 : index
    %243 = memref.load %arg1[%c35] : memref<54xf32, #tpu.memory_space<smem>>
    %244 = vector.extract_strided_slice %154 {offsets = [0, 2, 2], sizes = [2, 16, 128], strides = [1, 1, 1]} : vector<2x18x130xf32> to vector<2x16x128xf32>
    %245 = vector.broadcast %242 : f32 to vector<2x16x128xf32>
    %246 = arith.mulf %245, %244 : vector<2x16x128xf32>
    %247 = arith.addf %241, %246 : vector<2x16x128xf32>
    %248 = vector.extract_strided_slice %160 {offsets = [0, 2, 2], sizes = [2, 16, 128], strides = [1, 1, 1]} : vector<2x18x130xf32> to vector<2x16x128xf32>
    %249 = vector.broadcast %243 : f32 to vector<2x16x128xf32>
    %250 = arith.mulf %249, %248 : vector<2x16x128xf32>
    %251 = arith.addf %247, %250 : vector<2x16x128xf32>
    %c2_21 = arith.constant 2 : index
    %252 = memref.load %arg2[%c2_21] : memref<6xf32, #tpu.memory_space<smem>>
    %c3_22 = arith.constant 3 : index
    %253 = memref.load %arg2[%c3_22] : memref<6xf32, #tpu.memory_space<smem>>
    %254 = vector.shape_cast %251 : vector<2x16x128xf32> to vector<1x2x16x128xf32>
    %cst_23 = arith.constant dense<0.000000e+00> : vector<1xf32>
    %255 = vector.multi_reduction <add>, %254, %cst_23 [1, 2, 3] : vector<1x2x16x128xf32> to vector<1xf32>
    %256 = vector.shape_cast %255 : vector<1xf32> to vector<1x1x1x1xf32>
    %257 = vector.extract %256[0, 0, 0, 0] : f32 from vector<1x1x1x1xf32>
    %258 = vector.broadcast %257 : f32 to vector<1x1x1xf32>
    %cst_24 = arith.constant 4.096000e+03 : f32
    %259 = vector.broadcast %cst_24 : f32 to vector<1x1x1xf32>
    %260 = arith.divf %258, %259 : vector<1x1x1xf32>
    %261 = vector.broadcast %260 : vector<1x1x1xf32> to vector<2x16x128xf32>
    %262 = arith.subf %251, %261 : vector<2x16x128xf32>
    %263 = arith.mulf %262, %262 : vector<2x16x128xf32>
    %264 = vector.shape_cast %263 : vector<2x16x128xf32> to vector<1x2x16x128xf32>
    %cst_25 = arith.constant dense<0.000000e+00> : vector<1xf32>
    %265 = vector.multi_reduction <add>, %264, %cst_25 [1, 2, 3] : vector<1x2x16x128xf32> to vector<1xf32>
    %266 = vector.shape_cast %265 : vector<1xf32> to vector<1x1x1x1xf32>
    %267 = vector.extract %266[0, 0, 0, 0] : f32 from vector<1x1x1x1xf32>
    %268 = vector.broadcast %267 : f32 to vector<1x1x1xf32>
    %cst_26 = arith.constant 4.096000e+03 : f32
    %269 = vector.broadcast %cst_26 : f32 to vector<1x1x1xf32>
    %270 = arith.divf %268, %269 : vector<1x1x1xf32>
    %271 = vector.broadcast %260 : vector<1x1x1xf32> to vector<2x16x128xf32>
    %272 = arith.subf %251, %271 : vector<2x16x128xf32>
    %cst_27 = arith.constant 9.99999974E-6 : f32
    %273 = vector.broadcast %cst_27 : f32 to vector<1x1x1xf32>
    %274 = arith.addf %270, %273 : vector<1x1x1xf32>
    %275 = math.rsqrt %274 : vector<1x1x1xf32>
    %276 = vector.broadcast %275 : vector<1x1x1xf32> to vector<2x16x128xf32>
    %277 = arith.mulf %272, %276 : vector<2x16x128xf32>
    %278 = vector.broadcast %252 : f32 to vector<2x16x128xf32>
    %279 = arith.mulf %277, %278 : vector<2x16x128xf32>
    %280 = vector.broadcast %253 : f32 to vector<2x16x128xf32>
    %281 = arith.addf %279, %280 : vector<2x16x128xf32>
    %cst_28 = arith.constant 0.000000e+00 : f32
    %282 = vector.broadcast %cst_28 : f32 to vector<2x16x128xf32>
    %283 = arith.subf %282, %281 : vector<2x16x128xf32>
    %284 = math.exp %283 : vector<2x16x128xf32>
    %cst_29 = arith.constant 1.000000e+00 : f32
    %285 = vector.broadcast %cst_29 : f32 to vector<2x16x128xf32>
    %286 = arith.addf %285, %284 : vector<2x16x128xf32>
    %cst_30 = arith.constant 1.000000e+00 : f32
    %287 = vector.broadcast %cst_30 : f32 to vector<2x16x128xf32>
    %288 = arith.divf %287, %286 : vector<2x16x128xf32>
    %cst_31 = arith.constant dense<0xFF800000> : vector<2x16x8xf32>
    %289 = vector.multi_reduction <maximumf>, %0, %cst_31 [3] : vector<2x16x8x128xf32> to vector<2x16x8xf32>
    %cst_32 = arith.constant dense<0.000000e+00> : vector<2x16x8xf32>
    %290 = vector.multi_reduction <add>, %0, %cst_32 [3] : vector<2x16x8x128xf32> to vector<2x16x8xf32>
    %cst_33 = arith.constant 1.280000e+02 : f32
    %291 = vector.broadcast %cst_33 : f32 to vector<2x16x8xf32>
    %292 = arith.divf %290, %291 : vector<2x16x8xf32>
    %293 = vector.extract_strided_slice %289 {offsets = [0, 15, 0], sizes = [2, 1, 8], strides = [1, 1, 1]} : vector<2x16x8xf32> to vector<2x1x8xf32>
    %294 = vector.extract_strided_slice %289 {offsets = [0, 0, 0], sizes = [2, 1, 8], strides = [1, 1, 1]} : vector<2x16x8xf32> to vector<2x1x8xf32>
    %295 = tpu.concatenate %293, %289, %294 in 1 : vector<2x1x8xf32>, vector<2x16x8xf32>, vector<2x1x8xf32> -> vector<2x18x8xf32>
    %296 = vector.extract_strided_slice %295 {offsets = [0, 0, 7], sizes = [2, 18, 1], strides = [1, 1, 1]} : vector<2x18x8xf32> to vector<2x18x1xf32>
    %297 = vector.extract_strided_slice %295 {offsets = [0, 0, 0], sizes = [2, 18, 1], strides = [1, 1, 1]} : vector<2x18x8xf32> to vector<2x18x1xf32>
    %298 = tpu.concatenate %296, %295, %297 in 2 : vector<2x18x1xf32>, vector<2x18x8xf32>, vector<2x18x1xf32> -> vector<2x18x10xf32>
    %299 = vector.extract_strided_slice %292 {offsets = [0, 15, 0], sizes = [2, 1, 8], strides = [1, 1, 1]} : vector<2x16x8xf32> to vector<2x1x8xf32>
    %300 = vector.extract_strided_slice %292 {offsets = [0, 0, 0], sizes = [2, 1, 8], strides = [1, 1, 1]} : vector<2x16x8xf32> to vector<2x1x8xf32>
    %301 = tpu.concatenate %299, %292, %300 in 1 : vector<2x1x8xf32>, vector<2x16x8xf32>, vector<2x1x8xf32> -> vector<2x18x8xf32>
    %302 = vector.extract_strided_slice %301 {offsets = [0, 0, 7], sizes = [2, 18, 1], strides = [1, 1, 1]} : vector<2x18x8xf32> to vector<2x18x1xf32>
    %303 = vector.extract_strided_slice %301 {offsets = [0, 0, 0], sizes = [2, 18, 1], strides = [1, 1, 1]} : vector<2x18x8xf32> to vector<2x18x1xf32>
    %304 = tpu.concatenate %302, %301, %303 in 2 : vector<2x18x1xf32>, vector<2x18x8xf32>, vector<2x18x1xf32> -> vector<2x18x10xf32>
    %cst_34 = arith.constant 0.000000e+00 : f32
    %305 = vector.broadcast %cst_34 : f32 to vector<2x16x8xf32>
    %c36 = arith.constant 36 : index
    %306 = memref.load %arg1[%c36] : memref<54xf32, #tpu.memory_space<smem>>
    %c45 = arith.constant 45 : index
    %307 = memref.load %arg1[%c45] : memref<54xf32, #tpu.memory_space<smem>>
    %308 = vector.extract_strided_slice %298 {offsets = [0, 0, 0], sizes = [2, 16, 8], strides = [1, 1, 1]} : vector<2x18x10xf32> to vector<2x16x8xf32>
    %309 = vector.broadcast %306 : f32 to vector<2x16x8xf32>
    %310 = arith.mulf %309, %308 : vector<2x16x8xf32>
    %311 = arith.addf %305, %310 : vector<2x16x8xf32>
    %312 = vector.extract_strided_slice %304 {offsets = [0, 0, 0], sizes = [2, 16, 8], strides = [1, 1, 1]} : vector<2x18x10xf32> to vector<2x16x8xf32>
    %313 = vector.broadcast %307 : f32 to vector<2x16x8xf32>
    %314 = arith.mulf %313, %312 : vector<2x16x8xf32>
    %315 = arith.addf %311, %314 : vector<2x16x8xf32>
    %c37 = arith.constant 37 : index
    %316 = memref.load %arg1[%c37] : memref<54xf32, #tpu.memory_space<smem>>
    %c46 = arith.constant 46 : index
    %317 = memref.load %arg1[%c46] : memref<54xf32, #tpu.memory_space<smem>>
    %318 = vector.extract_strided_slice %298 {offsets = [0, 0, 1], sizes = [2, 16, 8], strides = [1, 1, 1]} : vector<2x18x10xf32> to vector<2x16x8xf32>
    %319 = vector.broadcast %316 : f32 to vector<2x16x8xf32>
    %320 = arith.mulf %319, %318 : vector<2x16x8xf32>
    %321 = arith.addf %315, %320 : vector<2x16x8xf32>
    %322 = vector.extract_strided_slice %304 {offsets = [0, 0, 1], sizes = [2, 16, 8], strides = [1, 1, 1]} : vector<2x18x10xf32> to vector<2x16x8xf32>
    %323 = vector.broadcast %317 : f32 to vector<2x16x8xf32>
    %324 = arith.mulf %323, %322 : vector<2x16x8xf32>
    %325 = arith.addf %321, %324 : vector<2x16x8xf32>
    %c38 = arith.constant 38 : index
    %326 = memref.load %arg1[%c38] : memref<54xf32, #tpu.memory_space<smem>>
    %c47 = arith.constant 47 : index
    %327 = memref.load %arg1[%c47] : memref<54xf32, #tpu.memory_space<smem>>
    %328 = vector.extract_strided_slice %298 {offsets = [0, 0, 2], sizes = [2, 16, 8], strides = [1, 1, 1]} : vector<2x18x10xf32> to vector<2x16x8xf32>
    %329 = vector.broadcast %326 : f32 to vector<2x16x8xf32>
    %330 = arith.mulf %329, %328 : vector<2x16x8xf32>
    %331 = arith.addf %325, %330 : vector<2x16x8xf32>
    %332 = vector.extract_strided_slice %304 {offsets = [0, 0, 2], sizes = [2, 16, 8], strides = [1, 1, 1]} : vector<2x18x10xf32> to vector<2x16x8xf32>
    %333 = vector.broadcast %327 : f32 to vector<2x16x8xf32>
    %334 = arith.mulf %333, %332 : vector<2x16x8xf32>
    %335 = arith.addf %331, %334 : vector<2x16x8xf32>
    %c39 = arith.constant 39 : index
    %336 = memref.load %arg1[%c39] : memref<54xf32, #tpu.memory_space<smem>>
    %c48 = arith.constant 48 : index
    %337 = memref.load %arg1[%c48] : memref<54xf32, #tpu.memory_space<smem>>
    %338 = vector.extract_strided_slice %298 {offsets = [0, 1, 0], sizes = [2, 16, 8], strides = [1, 1, 1]} : vector<2x18x10xf32> to vector<2x16x8xf32>
    %339 = vector.broadcast %336 : f32 to vector<2x16x8xf32>
    %340 = arith.mulf %339, %338 : vector<2x16x8xf32>
    %341 = arith.addf %335, %340 : vector<2x16x8xf32>
    %342 = vector.extract_strided_slice %304 {offsets = [0, 1, 0], sizes = [2, 16, 8], strides = [1, 1, 1]} : vector<2x18x10xf32> to vector<2x16x8xf32>
    %343 = vector.broadcast %337 : f32 to vector<2x16x8xf32>
    %344 = arith.mulf %343, %342 : vector<2x16x8xf32>
    %345 = arith.addf %341, %344 : vector<2x16x8xf32>
    %c40 = arith.constant 40 : index
    %346 = memref.load %arg1[%c40] : memref<54xf32, #tpu.memory_space<smem>>
    %c49 = arith.constant 49 : index
    %347 = memref.load %arg1[%c49] : memref<54xf32, #tpu.memory_space<smem>>
    %348 = vector.extract_strided_slice %298 {offsets = [0, 1, 1], sizes = [2, 16, 8], strides = [1, 1, 1]} : vector<2x18x10xf32> to vector<2x16x8xf32>
    %349 = vector.broadcast %346 : f32 to vector<2x16x8xf32>
    %350 = arith.mulf %349, %348 : vector<2x16x8xf32>
    %351 = arith.addf %345, %350 : vector<2x16x8xf32>
    %352 = vector.extract_strided_slice %304 {offsets = [0, 1, 1], sizes = [2, 16, 8], strides = [1, 1, 1]} : vector<2x18x10xf32> to vector<2x16x8xf32>
    %353 = vector.broadcast %347 : f32 to vector<2x16x8xf32>
    %354 = arith.mulf %353, %352 : vector<2x16x8xf32>
    %355 = arith.addf %351, %354 : vector<2x16x8xf32>
    %c41 = arith.constant 41 : index
    %356 = memref.load %arg1[%c41] : memref<54xf32, #tpu.memory_space<smem>>
    %c50 = arith.constant 50 : index
    %357 = memref.load %arg1[%c50] : memref<54xf32, #tpu.memory_space<smem>>
    %358 = vector.extract_strided_slice %298 {offsets = [0, 1, 2], sizes = [2, 16, 8], strides = [1, 1, 1]} : vector<2x18x10xf32> to vector<2x16x8xf32>
    %359 = vector.broadcast %356 : f32 to vector<2x16x8xf32>
    %360 = arith.mulf %359, %358 : vector<2x16x8xf32>
    %361 = arith.addf %355, %360 : vector<2x16x8xf32>
    %362 = vector.extract_strided_slice %304 {offsets = [0, 1, 2], sizes = [2, 16, 8], strides = [1, 1, 1]} : vector<2x18x10xf32> to vector<2x16x8xf32>
    %363 = vector.broadcast %357 : f32 to vector<2x16x8xf32>
    %364 = arith.mulf %363, %362 : vector<2x16x8xf32>
    %365 = arith.addf %361, %364 : vector<2x16x8xf32>
    %c42 = arith.constant 42 : index
    %366 = memref.load %arg1[%c42] : memref<54xf32, #tpu.memory_space<smem>>
    %c51 = arith.constant 51 : index
    %367 = memref.load %arg1[%c51] : memref<54xf32, #tpu.memory_space<smem>>
    %368 = vector.extract_strided_slice %298 {offsets = [0, 2, 0], sizes = [2, 16, 8], strides = [1, 1, 1]} : vector<2x18x10xf32> to vector<2x16x8xf32>
    %369 = vector.broadcast %366 : f32 to vector<2x16x8xf32>
    %370 = arith.mulf %369, %368 : vector<2x16x8xf32>
    %371 = arith.addf %365, %370 : vector<2x16x8xf32>
    %372 = vector.extract_strided_slice %304 {offsets = [0, 2, 0], sizes = [2, 16, 8], strides = [1, 1, 1]} : vector<2x18x10xf32> to vector<2x16x8xf32>
    %373 = vector.broadcast %367 : f32 to vector<2x16x8xf32>
    %374 = arith.mulf %373, %372 : vector<2x16x8xf32>
    %375 = arith.addf %371, %374 : vector<2x16x8xf32>
    %c43 = arith.constant 43 : index
    %376 = memref.load %arg1[%c43] : memref<54xf32, #tpu.memory_space<smem>>
    %c52 = arith.constant 52 : index
    %377 = memref.load %arg1[%c52] : memref<54xf32, #tpu.memory_space<smem>>
    %378 = vector.extract_strided_slice %298 {offsets = [0, 2, 1], sizes = [2, 16, 8], strides = [1, 1, 1]} : vector<2x18x10xf32> to vector<2x16x8xf32>
    %379 = vector.broadcast %376 : f32 to vector<2x16x8xf32>
    %380 = arith.mulf %379, %378 : vector<2x16x8xf32>
    %381 = arith.addf %375, %380 : vector<2x16x8xf32>
    %382 = vector.extract_strided_slice %304 {offsets = [0, 2, 1], sizes = [2, 16, 8], strides = [1, 1, 1]} : vector<2x18x10xf32> to vector<2x16x8xf32>
    %383 = vector.broadcast %377 : f32 to vector<2x16x8xf32>
    %384 = arith.mulf %383, %382 : vector<2x16x8xf32>
    %385 = arith.addf %381, %384 : vector<2x16x8xf32>
    %c44 = arith.constant 44 : index
    %386 = memref.load %arg1[%c44] : memref<54xf32, #tpu.memory_space<smem>>
    %c53 = arith.constant 53 : index
    %387 = memref.load %arg1[%c53] : memref<54xf32, #tpu.memory_space<smem>>
    %388 = vector.extract_strided_slice %298 {offsets = [0, 2, 2], sizes = [2, 16, 8], strides = [1, 1, 1]} : vector<2x18x10xf32> to vector<2x16x8xf32>
    %389 = vector.broadcast %386 : f32 to vector<2x16x8xf32>
    %390 = arith.mulf %389, %388 : vector<2x16x8xf32>
    %391 = arith.addf %385, %390 : vector<2x16x8xf32>
    %392 = vector.extract_strided_slice %304 {offsets = [0, 2, 2], sizes = [2, 16, 8], strides = [1, 1, 1]} : vector<2x18x10xf32> to vector<2x16x8xf32>
    %393 = vector.broadcast %387 : f32 to vector<2x16x8xf32>
    %394 = arith.mulf %393, %392 : vector<2x16x8xf32>
    %395 = arith.addf %391, %394 : vector<2x16x8xf32>
    %c4_35 = arith.constant 4 : index
    %396 = memref.load %arg2[%c4_35] : memref<6xf32, #tpu.memory_space<smem>>
    %c5_36 = arith.constant 5 : index
    %397 = memref.load %arg2[%c5_36] : memref<6xf32, #tpu.memory_space<smem>>
    %398 = vector.shape_cast %395 : vector<2x16x8xf32> to vector<1x2x16x8xf32>
    %cst_37 = arith.constant dense<0.000000e+00> : vector<1xf32>
    %399 = vector.multi_reduction <add>, %398, %cst_37 [1, 2, 3] : vector<1x2x16x8xf32> to vector<1xf32>
    %400 = vector.shape_cast %399 : vector<1xf32> to vector<1x1x1x1xf32>
    %401 = vector.extract %400[0, 0, 0, 0] : f32 from vector<1x1x1x1xf32>
    %402 = vector.broadcast %401 : f32 to vector<1x1x1xf32>
    %cst_38 = arith.constant 2.560000e+02 : f32
    %403 = vector.broadcast %cst_38 : f32 to vector<1x1x1xf32>
    %404 = arith.divf %402, %403 : vector<1x1x1xf32>
    %405 = vector.broadcast %404 : vector<1x1x1xf32> to vector<2x16x8xf32>
    %406 = arith.subf %395, %405 : vector<2x16x8xf32>
    %407 = arith.mulf %406, %406 : vector<2x16x8xf32>
    %408 = vector.shape_cast %407 : vector<2x16x8xf32> to vector<1x2x16x8xf32>
    %cst_39 = arith.constant dense<0.000000e+00> : vector<1xf32>
    %409 = vector.multi_reduction <add>, %408, %cst_39 [1, 2, 3] : vector<1x2x16x8xf32> to vector<1xf32>
    %410 = vector.shape_cast %409 : vector<1xf32> to vector<1x1x1x1xf32>
    %411 = vector.extract %410[0, 0, 0, 0] : f32 from vector<1x1x1x1xf32>
    %412 = vector.broadcast %411 : f32 to vector<1x1x1xf32>
    %cst_40 = arith.constant 2.560000e+02 : f32
    %413 = vector.broadcast %cst_40 : f32 to vector<1x1x1xf32>
    %414 = arith.divf %412, %413 : vector<1x1x1xf32>
    %415 = vector.broadcast %404 : vector<1x1x1xf32> to vector<2x16x8xf32>
    %416 = arith.subf %395, %415 : vector<2x16x8xf32>
    %cst_41 = arith.constant 9.99999974E-6 : f32
    %417 = vector.broadcast %cst_41 : f32 to vector<1x1x1xf32>
    %418 = arith.addf %414, %417 : vector<1x1x1xf32>
    %419 = math.rsqrt %418 : vector<1x1x1xf32>
    %420 = vector.broadcast %419 : vector<1x1x1xf32> to vector<2x16x8xf32>
    %421 = arith.mulf %416, %420 : vector<2x16x8xf32>
    %422 = vector.broadcast %396 : f32 to vector<2x16x8xf32>
    %423 = arith.mulf %421, %422 : vector<2x16x8xf32>
    %424 = vector.broadcast %397 : f32 to vector<2x16x8xf32>
    %425 = arith.addf %423, %424 : vector<2x16x8xf32>
    %cst_42 = arith.constant 0.000000e+00 : f32
    %426 = vector.broadcast %cst_42 : f32 to vector<2x16x8xf32>
    %427 = arith.subf %426, %425 : vector<2x16x8xf32>
    %428 = math.exp %427 : vector<2x16x8xf32>
    %cst_43 = arith.constant 1.000000e+00 : f32
    %429 = vector.broadcast %cst_43 : f32 to vector<2x16x8xf32>
    %430 = arith.addf %429, %428 : vector<2x16x8xf32>
    %cst_44 = arith.constant 1.000000e+00 : f32
    %431 = vector.broadcast %cst_44 : f32 to vector<2x16x8xf32>
    %432 = arith.divf %431, %430 : vector<2x16x8xf32>
    %433 = vector.shape_cast %144 : vector<2x8x128xf32> to vector<2x1x8x128xf32>
    %434 = vector.shape_cast %288 : vector<2x16x128xf32> to vector<2x16x1x128xf32>
    %435 = vector.broadcast %433 : vector<2x1x8x128xf32> to vector<2x16x8x128xf32>
    %436 = vector.broadcast %434 : vector<2x16x1x128xf32> to vector<2x16x8x128xf32>
    %437 = arith.addf %435, %436 : vector<2x16x8x128xf32>
    %438 = vector.shape_cast %432 : vector<2x16x8xf32> to vector<2x16x8x1xf32>
    %439 = vector.broadcast %438 : vector<2x16x8x1xf32> to vector<2x16x8x128xf32>
    %440 = arith.addf %437, %439 : vector<2x16x8x128xf32>
    %441 = arith.mulf %0, %440 : vector<2x16x8x128xf32>
    %cst_45 = arith.constant 0.333333343 : f32
    %442 = vector.broadcast %cst_45 : f32 to vector<2x16x8x128xf32>
    %443 = arith.mulf %441, %442 : vector<2x16x8x128xf32>
    %c0_46 = arith.constant 0 : index
    %c0_47 = arith.constant 0 : index
    %c0_48 = arith.constant 0 : index
    %c0_49 = arith.constant 0 : index
    %444 = vector.load %arg3[%c0_46, %c0_47, %c0_48, %c0_49] : memref<2x16x8x128xf32, #tpu.memory_space<vmem>>, vector<2x16x8x128xf32>
    tpu.vector_store %arg3[%c0_46, %c0_47, %c0_48, %c0_49], %443 {strides = array<i32>} : memref<2x16x8x128xf32, #tpu.memory_space<vmem>>, vector<2x16x8x128xf32>,
    return
  }
}

</mosaic_0001>

<bundles_post_ra>
// kernel: triplet_attention_pallas.1
= control target key start
LH: loop header
LB: loop body
LE: loop exit
PB: predicated region body
PF: predicated region fallthrough
CT: control target
= control target key end

     0   :  { %8 = vsyncpa [#allocation3], 0  ;;  %s6418_s0 = inlined_call_operand.hbm [shape: f32[2,16,8,128], index: 0, kind: input, shape index: {}]   ;;  %s6419_s1 = inlined_call_operand.vmem [shape: f32[54], index: 1, kind: input, shape index: {}]   ;;  %s6420_s2 = inlined_call_operand.vmem [shape: f32[6], index: 2, kind: input, shape index: {}]   ;;  %s6421_s3 = inlined_call_operand.hbm [shape: f32[2,16,8,128], index: 3, kind: output, shape index: {}]  }
   0x1   :  { %9 = vsyncpa [#allocation5], 0 }
   0x2   :  { %10 = vsyncpa [#allocation8], 0 }
   0x3   :  { %11 = vsyncpa [#allocation4], 0  ;;  %s4140_s12 = smov [#allocation2]   ;;  %s30_s16 = sshll.u32 %s6419_s1, 4  ;;  %s31_s16 = int_to_ptr.vmem [resolvable:$true] %s30_s16 }
   0x4   :  { %s17_s13 = sshll.u32 %s4140_s12, 4  ;;  %s18_s13 = int_to_ptr.vmem [resolvable:$true] %s17_s13 }
   0x5   :  { %s4076_s17 = scalar_lea.vmem %s18_s13, 4096  ;;  %p4081_p1 = scmp.lt.s32.totalorder %s18_s13, %s18_s13 }
   0x6   :  { %p4077_p0 = scmp.ne.s32.totalorder %s18_s13, %s4076_s17  ;;  %p4082_p2 = scmp.lt.s32.totalorder %s4076_s17, %s4076_s17 }
   0x8   :  { %p4083_p3 = por %p4082_p2, %p4081_p1 }
   0xa   :  { %p4084_p4 = pnand %p4083_p3, %p4077_p0 }
   0xc   :  { %4087 = shalt.err (!%p4084_p4)
}
   0xd   :  { %s4141_s18 = smov 128   ;;  %s4142_s19 = smov 8  }
   0xe   :  { %23 = dma.hbm_to_vmem [thread:$0]  %s6418_s0, 4096, %s18_s13, [#allocation3], %s4141_s18, %s4141_s18, %s4142_s19  }
   0xf   :  { %s4088_s22 = scalar_lea.vmem %s31_s16, 16  ;;  %p4093_p6 = scmp.lt.s32.totalorder %s31_s16, %s31_s16 }
  0x10   :  { %p4089_p5 = scmp.ne.s32.totalorder %s31_s16, %s4088_s22  ;;  %p4094_p7 = scmp.lt.s32.totalorder %s4088_s22, %s4088_s22 }
  0x12   :  { %p4095_p8 = por %p4094_p7, %p4093_p6 }
  0x14   :  { %p4096_p9 = pnand %p4095_p8, %p4089_p5 }
  0x16   :  { %4099 = shalt.err (!%p4096_p9)
}
  0x17   :  { %s4143_s1 = smov [#allocation6]   ;;  %s40_s25 = sshll.u32 %s6420_s2, 4  ;;  %s41_s25 = int_to_ptr.vmem [resolvable:$true] %s40_s25 }
  0x18   :  { %33 = dma.vmem_to_smem %s31_s16, 16, %s4143_s1, [#allocation5]  }
  0x19   :  { %s4100_s26 = scalar_lea.vmem %s41_s25, 16  ;;  %p4105_p11 = scmp.lt.s32.totalorder %s41_s25, %s41_s25 }
  0x1a   :  { %p4101_p10 = scmp.ne.s32.totalorder %s41_s25, %s4100_s26  ;;  %p4106_p12 = scmp.lt.s32.totalorder %s4100_s26, %s4100_s26 }
  0x1c   :  { %p4107_p13 = por %p4106_p12, %p4105_p11 }
  0x1e   :  { %p4108_p0 = pnand %p4107_p13, %p4101_p10 }
  0x20   :  { %4111 = shalt.err (!%p4108_p0)
}
  0x21   :  { %s4144_s0 = smov [#allocation7]  }
  0x22   :  { %43 = dma.vmem_to_smem %s41_s25, 16, %s4144_s0, [#allocation8]  }
  0x23   :  { %4132 = dma.done.wait [#allocation3], 4096  }
  0x24   :  { %4133 = vsyncadd [#allocation3], 4294963200 }
  0x25   :  { %4134 = dma.done.wait [#allocation5], 16  }
  0x26   :  { %4135 = vsyncadd [#allocation5], 4294967280 }
  0x27   :  { %4136 = dma.done.wait [#allocation8], 16  }
  0x28   :  { %4137 = vsyncadd [#allocation8], 4294967280 }
  0x29   :  { %53 = sfence }
  0x2a   :  { %v4184_v0 = vld [vmem:[#allocation2] sm:$0xff]  ;;  %v4186_v1 = vld [vmem:[#allocation2 + $0x8] sm:$0xff]  ;;  %v4188_v2 = vld [vmem:[#allocation2 + $0x10] sm:$0xff]  ;;  %vm967_vm0 = vcmask 1041409   ;;  %vm955_vm1 = vcmask 1042434   ;;  %vm957_vm2 = vcmask 1043459  }
  0x2b   :  { %v4190_v3 = vld [vmem:[#allocation2 + $0x18] sm:$0xff]  ;;  %v4192_v4 = vld [vmem:[#allocation2 + $0x20] sm:$0xff]  ;;  %v4194_v5 = vld [vmem:[#allocation2 + $0x28] sm:$0xff]  ;;  %v86_v6 = vmax.f32 %v4184_v0, %v4188_v2  ;;  %v506_v17 = vrot.slane %v4184_v0, 4  ;;  %vm959_vm3 = vcmask 1044484   ;;  %vm961_vm4 = vcmask 1045509  }
  0x2c   :  { %v4198_v7 = vld [vmem:[#allocation2 + $0x30] sm:$0xff]  ;;  %v4200_v8 = vld [vmem:[#allocation2 + $0x38] sm:$0xff]  ;;  %v4202_v9 = vld [vmem:[#allocation2 + $0x40] sm:$0xff]  ;;  %v87_v10 = vmax.f32 %v4186_v1, %v4190_v3  ;;  %vm963_vm5 = vcmask 1046534   ;;  %vm965_vm6 = vcmask 1047559   ;;  %s4145_s2 = smov 1  }
  0x2d   :  { %v4206_v11 = vld [vmem:[#allocation2 + $0x48] sm:$0xff]  ;;  %v4208_v12 = vld [vmem:[#allocation2 + $0x50] sm:$0xff]  ;;  %v4210_v13 = vld [vmem:[#allocation2 + $0x58] sm:$0xff]  ;;  %v88_v14 = vmax.f32 %v86_v6, %v4192_v4  ;;  %v6437_v15 = vrot.slane %v4200_v8, 4  ;;  %v6436_v16 = vrot.slane %v4202_v9, 4  ;;  %vm155_vm7 = vcmask 1040384  }
  0x2e   :  { %v4216_v18 = vld [vmem:[#allocation2 + $0x60] sm:$0xff]  ;;  %v89_v19 = vmax.f32 %v87_v10, %v4194_v5  ;;  %v6435_v20 = vrot.slane %v4206_v11, 4  ;;  %v6434_v21 = vrot.slane %v4208_v12, 4  ;;  %v6433_v22 = vrot.slane %v4210_v13, 4  ;;  %v4247_v47 = vld [vmem:[#allocation2 + $0x68] sm:$0xff]  ;;  %v4249_v48 = vld [vmem:[#allocation2 + $0x78] sm:$0xff] }
  0x2f   :  { %v90_v23 = vmax.f32 %v88_v14, %v4198_v7  ;;  %v549_v24 = vmax.f32 %v4200_v8, %v6437_v15  ;;  %v555_v25 = vmax.f32 %v4202_v9, %v6436_v16  ;;  %v6432_v26 = vrot.slane %v4216_v18, 4  ;;  %v4252_v53 = vld [vmem:[#allocation2 + $0x70] sm:$0xff]  ;;  %v4255_v58 = vld [vmem:[#allocation2 + $0x80] sm:$0xff]  ;;  %v4258_v63 = vld [vmem:[#allocation2 + $0x88] sm:$0xff]  ;;  %s4626_s27 = sld [smem:[#allocation6 + $0x1]]  ;;  %s4146_s30 = smov 127  }
  0x30   :  { %v91_v27 = vmax.f32 %v89_v19, %v4200_v8  ;;  %v561_v28 = vmax.f32 %v4206_v11, %v6435_v20  ;;  %v567_v29 = vmax.f32 %v4208_v12, %v6434_v21  ;;  %v573_v30 = vmax.f32 %v4210_v13, %v6433_v22  ;;  %v4260_v6 = vld [vmem:[#allocation2 + $0x90] sm:$0xff]  ;;  %v4262_v10 = vld [vmem:[#allocation2 + $0x98] sm:$0xff]  ;;  %s4630_s28 = sld [smem:[#allocation6 + $0x2]]  ;;  %s4147_s5 = smov 126  }
  0x31   :  { %v92_v31 = vmax.f32 %v90_v23, %v4202_v9  ;;  %v550_v32 = vrot.slane %v549_v24, 2  ;;  %v556_v33 = vrot.slane %v555_v25, 2  ;;  %v579_v34 = vmax.f32 %v4216_v18, %v6432_v26  ;;  %s3896_s29 = sld [smem:[#allocation6 + $0x13]] }
  0x32   :  { %v93_v35 = vmax.f32 %v91_v27, %v4206_v11  ;;  %v562_v36 = vrot.slane %v561_v28, 2  ;;  %v568_v37 = vrot.slane %v567_v29, 2  ;;  %v574_v38 = vrot.slane %v573_v30, 2  ;;  %s4641_s4 = sld [smem:[#allocation6 + $0x4]] }
  0x33   :  { %v94_v39 = vmax.f32 %v92_v31, %v4208_v12  ;;  %v551_v40 = vmax.f32 %v549_v24, %v550_v32  ;;  %v557_v41 = vmax.f32 %v555_v25, %v556_v33  ;;  %v580_v42 = vrot.slane %v579_v34, 2  ;;  %v4265_v25 = vld [vmem:[#allocation2 + $0xb8] sm:$0xff]  ;;  %v4270_v31 = vld [vmem:[#allocation2 + $0xa0] sm:$0xff]  ;;  %v4272_v32 = vld [vmem:[#allocation2 + $0xa8] sm:$0xff]  ;;  %s4645_s6 = sld [smem:[#allocation6 + $0x5]] }
  0x34   :  { %v95_v43 = vmax.f32 %v93_v35, %v4210_v13  ;;  %v563_v44 = vmax.f32 %v561_v28, %v562_v36  ;;  %v569_v45 = vmax.f32 %v567_v29, %v568_v37  ;;  %v575_v46 = vmax.f32 %v573_v30, %v574_v38  ;;  %s4651_s7 = sld [smem:[#allocation6 + $0x7]] }
  0x35   :  { %v96_v49 = vmax.f32 %v94_v39, %v4216_v18  ;;  %v552_v50 = vrot.slane %v551_v40, 1  ;;  %v558_v51 = vrot.slane %v557_v41, 1  ;;  %v581_v52 = vmax.f32 %v579_v34, %v580_v42  ;;  %v4290_v42 = vld [vmem:[#allocation2 + $0xc8] sm:$0xff]  ;;  %s4660_s8 = sld [smem:[#allocation6 + $0x8]] }
  0x36   :  { %v97_v54 = vmax.f32 %v95_v43, %v4247_v47  ;;  %v564_v55 = vrot.slane %v563_v44, 1  ;;  %v570_v56 = vrot.slane %v569_v45, 1  ;;  %v576_v57 = vrot.slane %v575_v46, 1  ;;  %s3897_s9 = sld [smem:[#allocation6 + $0x1c]] }
  0x37   :  { %v98_v59 = vmax.f32 %v96_v49, %v4252_v53  ;;  %v553_v60 = vmax.f32 %v551_v40, %v552_v50  ;;  %v559_v61 = vmax.f32 %v557_v41, %v558_v51  ;;  %v582_v62 = vrot.slane %v581_v52, 1  ;;  %v4286_v40 = vld [vmem:[#allocation2 + $0xb0] sm:$0xff]  ;;  %v4288_v41 = vld [vmem:[#allocation2 + $0xc0] sm:$0xff]  ;;  %s3878_s10 = sld [smem:[#allocation6 + $0xa]] }
  0x38   :  { %v99_v14 = vmax.f32 %v97_v54, %v4249_v48  ;;  %v565_v19 = vmax.f32 %v563_v44, %v564_v55  ;;  %v571_v23 = vmax.f32 %v569_v45, %v570_v56  ;;  %v577_v24 = vmax.f32 %v575_v46, %v576_v57  ;;  %v4294_v46 = vld [vmem:[#allocation2 + $0xd0] sm:$0xff]  ;;  %s3880_s11 = sld [smem:[#allocation6 + $0xb]] }
  0x39   :  { %v583_v27 = vmax.f32 %v581_v52, %v582_v62  ;;  %v6427_v28 = vrot.slane %v4247_v47, 4  ;;  %v6426_v29 = vrot.slane %v4252_v53, 4  ;;  %v968_v30 = vsel %vm967_vm0, %v559_v61, %v553_v60  ;;  %s3884_s12 = sld [smem:[#allocation6 + $0xd]] }
  0x3a   :  { %v100_v33 = vmax.f32 %v98_v59, %v99_v14  ;;  %v969_v34 = vsel %vm955_vm1, %v565_v19, %v968_v30  ;;  %v101_v35 = vmax.f32 %v4255_v58, %v4260_v6  ;;  %v102_v36 = vmax.f32 %v4258_v63, %v4262_v10  ;;  %s3886_s13 = sld [smem:[#allocation6 + $0xe]] }
  0x3b   :  { %v585_v37 = vmax.f32 %v4247_v47, %v6427_v28  ;;  %v591_v38 = vmax.f32 %v4252_v53, %v6426_v29  ;;  %v970_v39 = vsel %vm957_vm2, %v571_v23, %v969_v34  ;;  %v6425_v43 = vrot.slane %v4265_v25, 4  ;;  %s3890_s14 = sld [smem:[#allocation6 + $0x10]] }
  0x3c   :  { %v151_v44 = vrot.slane %v100_v33, 7  ;;  %v971_v45 = vsel %vm959_vm3, %v577_v24, %v970_v39  ;;  %v103_v49 = vmax.f32 %v101_v35, %v4270_v31  ;;  %v104_v50 = vmax.f32 %v102_v36, %v4272_v32  ;;  %v4316_v35 = vld [vmem:[#allocation2 + $0xd8] sm:$0xff]  ;;  %s4720_s15 = sld [smem:[#allocation6 + $0x11]] }
  0x3d   :  { %v586_v51 = vrot.slane %v585_v37, 2  ;;  %v592_v52 = vrot.slane %v591_v38, 2  ;;  %v972_v54 = vsel %vm961_vm4, %v583_v27, %v971_v45  ;;  %v645_v55 = vmax.f32 %v4265_v25, %v6425_v43  ;;  %s3898_s16 = sld [smem:[#allocation6 + $0x14]] }
  0x3e   :  { %160 = vrot.lane.b32.xlu0 %v151_v44, %s4145_s2  ;;  %v105_v56 = vmax.f32 %v103_v49, %v4286_v40  ;;  %v106_v57 = vmax.f32 %v104_v50, %v4265_v25  ;;  %v6424_v59 = vrot.slane %v4288_v41, 4  ;;  %v6423_v60 = vrot.slane %v4290_v42, 4  ;;  %s3899_s17 = sld [smem:[#allocation6 + $0x1d]] }
  0x3f   :  { %v587_v61 = vmax.f32 %v585_v37, %v586_v51  ;;  %v593_v62 = vmax.f32 %v591_v38, %v592_v52  ;;  %v646_v14 = vrot.slane %v645_v55, 2  ;;  %v6422_v19 = vrot.slane %v4294_v46, 4  ;;  %v4323_v51 = vld [vmem:[#allocation2 + $0xe0] sm:$0xff]  ;;  %v4325_v52 = vld [vmem:[#allocation2 + $0xe8] sm:$0xff]  ;;  %s3876_s20 = sld [smem:[#allocation6 + $0x9]] }
  0x40   :  { %v107_v23 = vmax.f32 %v105_v56, %v4288_v41  ;;  %v108_v24 = vmax.f32 %v106_v57, %v4290_v42  ;;  %v651_v27 = vmax.f32 %v4288_v41, %v6424_v59  ;;  %v657_v30 = vmax.f32 %v4290_v42, %v6423_v60  ;;  %v4327_v56 = vld [vmem:[#allocation2 + $0xf8] sm:$0xff]  ;;  %v4332_v59 = vld [vmem:[#allocation2 + $0xf0] sm:$0xff]  ;;  %s183_s21 = sld [smem:[#allocation6]] }
  0x41   :  { %v588_v33 = vrot.slane %v587_v61, 1  ;;  %v594_v34 = vrot.slane %v593_v62, 1  ;;  %v647_v36 = vmax.f32 %v645_v55, %v646_v14  ;;  %v663_v37 = vmax.f32 %v4294_v46, %v6422_v19  ;;  %6472 = vst [vmem:[#allocation14_spill] sm:$0xff] %v4332_v59  ;;  %s3881_s22 = sld [smem:[#allocation6 + $0x3]] }
  0x42   :  { %v109_v38 = vmax.f32 %v107_v23, %v4294_v46  ;;  %v110_v39 = vmax.f32 %v108_v24, %v4316_v35  ;;  %v652_v44 = vrot.slane %v651_v27, 2  ;;  %v658_v45 = vrot.slane %v657_v30, 2  ;;  %s3882_s1 = sld [smem:[#allocation6 + $0xc]] }
  0x43   :  { %v589_v49 = vmax.f32 %v587_v61, %v588_v33  ;;  %v595_v50 = vmax.f32 %v593_v62, %v594_v34  ;;  %v648_v57 = vrot.slane %v647_v36, 1  ;;  %v664_v55 = vrot.slane %v663_v37, 2  ;;  %s3887_s23 = sld [smem:[#allocation6 + $0x6]] }
  0x44   :  { %v111_v14 = vmax.f32 %v109_v38, %v4323_v51  ;;  %v112_v19 = vmax.f32 %v110_v39, %v4325_v52  ;;  %v653_v60 = vmax.f32 %v651_v27, %v652_v44  ;;  %v659_v23 = vmax.f32 %v657_v30, %v658_v45  ;;  %s3888_s24 = sld [smem:[#allocation6 + $0xf]] }
  0x45   :  { %v973_v24 = vsel %vm963_vm5, %v589_v49, %v972_v54  ;;  %v649_v61 = vmax.f32 %v647_v36, %v648_v57  ;;  %v665_v62 = vmax.f32 %v663_v37, %v664_v55  ;;  %v6431_v33 = vrot.slane %v4316_v35, 4  ;;  %s3902_s25 = sld [smem:[#allocation6 + $0x16]] }
  0x46   :  { %v974_v34 = vsel %vm965_vm6, %v595_v50, %v973_v24  ;;  %v113_v43 = vmax.f32 %v111_v14, %v4332_v59  ;;  %v114_v29 = vmax.f32 %v112_v19, %v4327_v56  ;;  %v654_v28 = vrot.slane %v653_v60, 1  ;;  %s3903_s26 = sld [smem:[#allocation6 + $0x1f]] }
  0x47   :  { %1002 = vrot.lane.b32.xlu1 %v974_v34, %s4145_s2  ;;  %v660_v38 = vrot.slane %v659_v23, 1  ;;  %v666_v27 = vrot.slane %v665_v62, 1  ;;  %v669_v54 = vmax.f32 %v4316_v35, %v6431_v33  ;;  %v6430_v30 = vrot.slane %v4323_v51, 4  ;;  %s3904_s0 = sld [smem:[#allocation6 + $0x17]] }
  0x48   :  { %v115_v36 = vmax.f32 %v113_v43, %v114_v29  ;;  %v655_v37 = vmax.f32 %v653_v60, %v654_v28  ;;  %v6429_v39 = vrot.slane %v4325_v52, 4  ;;  %v6428_v44 = vrot.slane %v4332_v59, 4 }
  0x49   :  { %v661_v45 = vmax.f32 %v659_v23, %v660_v38  ;;  %v667_v49 = vmax.f32 %v665_v62, %v666_v27  ;;  %v670_v19 = vrot.slane %v669_v54, 2  ;;  %v675_v50 = vmax.f32 %v4323_v51, %v6430_v30 }
  0x4a   :  { %v152_v57 = vrot.slane %v115_v36, 7  ;;  %v681_v55 = vmax.f32 %v4325_v52, %v6429_v39  ;;  %v687_v28 = vmax.f32 %v4332_v59, %v6428_v44  ;;  %v981_v29 = vsel %vm967_vm0, %v655_v37, %v649_v61 }
  0x4b   :  { %v671_v43 = vmax.f32 %v669_v54, %v670_v19  ;;  %v676_v60 = vrot.slane %v675_v50, 2  ;;  %v982_v14 = vsel %vm955_vm1, %v661_v45, %v981_v29  ;;  %v507_v23 = vmax.f32 %v4184_v0, %v506_v17 }
  0x4c   :  { %162 = vrot.lane.b32.xlu0 %v152_v57, %s4145_s2  ;;  %v682_v24 = vrot.slane %v681_v55, 2  ;;  %v688_v62 = vrot.slane %v687_v28, 2  ;;  %v983_v34 = vsel %vm957_vm2, %v667_v49, %v982_v14  ;;  %v512_v38 = vrot.slane %v4186_v1, 4 }
  0x4d   :  { %v672_v27 = vrot.slane %v671_v43, 1  ;;  %v677_v36 = vmax.f32 %v675_v50, %v676_v60  ;;  %v508_v44 = vrot.slane %v507_v23, 2  ;;  %v518_v61 = vrot.slane %v4188_v2, 4 }
  0x4e   :  { %v683_v54 = vmax.f32 %v681_v55, %v682_v24  ;;  %v689_v37 = vmax.f32 %v687_v28, %v688_v62  ;;  %v513_v45 = vmax.f32 %v4186_v1, %v512_v38  ;;  %v524_v19 = vrot.slane %v4190_v3, 4 }
  0x4f   :  { %v673_v29 = vmax.f32 %v671_v43, %v672_v27  ;;  %v678_v39 = vrot.slane %v677_v36, 1  ;;  %v509_v57 = vmax.f32 %v507_v23, %v508_v44  ;;  %v519_v30 = vmax.f32 %v4188_v2, %v518_v61 }
  0x50   :  { %v684_v33 = vrot.slane %v683_v54, 1  ;;  %v690_v49 = vrot.slane %v689_v37, 1  ;;  %v514_v14 = vrot.slane %v513_v45, 2  ;;  %v525_v26 = vmax.f32 %v4190_v3, %v524_v19 }
  0x51   :  { %v679_v50 = vmax.f32 %v677_v36, %v678_v39  ;;  %v984_v60 = vsel %vm959_vm3, %v673_v29, %v983_v34  ;;  %v510_v22 = vrot.slane %v509_v57, 1  ;;  %v520_v55 = vrot.slane %v519_v30, 2 }
  0x52   :  { %v685_v28 = vmax.f32 %v683_v54, %v684_v33  ;;  %v691_v24 = vmax.f32 %v689_v37, %v690_v49  ;;  %v515_v62 = vmax.f32 %v513_v45, %v514_v14  ;;  %v526_v21 = vrot.slane %v525_v26, 2 }
  0x53   :  { %v985_v43 = vsel %vm961_vm4, %v679_v50, %v984_v60  ;;  %v4369_v27 = vmax.f32 %v509_v57, %v510_v22  ;;  %v521_v44 = vmax.f32 %v519_v30, %v520_v55  ;;  %v530_v23 = vrot.slane %v4192_v4, 4 }
  0x54   :  { %v986_v20 = vsel %vm963_vm5, %v685_v28, %v985_v43  ;;  %v516_v16 = vrot.slane %v515_v62, 1  ;;  %v527_v15 = vmax.f32 %v525_v26, %v526_v21  ;;  %v536_v39 = vrot.slane %v4194_v5, 4 }
  0x55   :  { %6473 = vst [vmem:[#allocation15_spill] sm:$0xff] %v4369_v27  ;;  %v987_v34 = vsel %vm965_vm6, %v691_v24, %v986_v20  ;;  %v522_v36 = vrot.slane %v521_v44, 1  ;;  %v531_v33 = vmax.f32 %v4192_v4, %v530_v23  ;;  %v542_v54 = vrot.slane %v4198_v7, 4 }
  0x56   :  { %1008 = vrot.lane.b32.xlu1 %v987_v34, %s4145_s2  ;;  %v517_v22 = vmax.f32 %v515_v62, %v516_v16  ;;  %v528_v37 = vrot.slane %v527_v15, 1  ;;  %v537_v30 = vmax.f32 %v4194_v5, %v536_v39  ;;  %v596_v45 = vrot.slane %v4249_v48, 4 }
  0x57   :  { %v523_v29 = vmax.f32 %v521_v44, %v522_v36  ;;  %v532_v21 = vrot.slane %v531_v33, 2  ;;  %v543_v26 = vmax.f32 %v4198_v7, %v542_v54  ;;  %v699_v20 = vadd.f32 %v506_v17, %v4184_v0 }
  0x58   :  { %v529_v57 = vmax.f32 %v527_v15, %v528_v37  ;;  %v538_v49 = vrot.slane %v537_v30, 2  ;;  %v597_v14 = vmax.f32 %v4249_v48, %v596_v45  ;;  %v956_v16 = vsel %vm955_vm1, %v517_v22, %v4369_v27 }
  0x59   :  { %v533_v50 = vmax.f32 %v531_v33, %v532_v21  ;;  %v544_v60 = vrot.slane %v543_v26, 2  ;;  %v958_v55 = vsel %vm957_vm2, %v523_v29, %v956_v16  ;;  %v700_v28 = vrot.slane %v699_v20, 2 }
  0x5a   :  { %v539_v24 = vmax.f32 %v537_v30, %v538_v49  ;;  %v598_v62 = vrot.slane %v597_v14, 2  ;;  %v960_v43 = vsel %vm959_vm3, %v529_v57, %v958_v55  ;;  %v705_v44 = vadd.f32 %v512_v38, %v4186_v1 }
  0x5b   :  { %v534_v34 = vrot.slane %v533_v50, 1  ;;  %v545_v0 = vmax.f32 %v543_v26, %v544_v60  ;;  %v701_v15 = vadd.f32 %v700_v28, %v699_v20  ;;  %v711_v17 = vadd.f32 %v518_v61, %v4188_v2 }
  0x5c   :  { %v540_v36 = vrot.slane %v539_v24, 1  ;;  %v599_v37 = vmax.f32 %v597_v14, %v598_v62  ;;  %v706_v59 = vrot.slane %v705_v44, 2  ;;  %v717_v33 = vadd.f32 %v524_v19, %v4190_v3 }
  0x5d   :  { %v535_v22 = vmax.f32 %v533_v50, %v534_v34  ;;  %v546_v21 = vrot.slane %v545_v0, 1  ;;  %v702_v29 = vrot.slane %v701_v15, 1  ;;  %v712_v16 = vrot.slane %v711_v17, 2 }
  0x5e   :  { %v541_v30 = vmax.f32 %v539_v24, %v540_v36  ;;  %v600_v49 = vrot.slane %v599_v37, 1  ;;  %v707_v27 = vadd.f32 %v706_v59, %v705_v44  ;;  %v718_v57 = vrot.slane %v717_v33, 2 }
  0x5f   :  { %v547_v55 = vmax.f32 %v545_v0, %v546_v21  ;;  %v962_v1 = vsel %vm961_vm4, %v535_v22, %v960_v43  ;;  %v703_v38 = vadd.f32 %v702_v29, %v701_v15  ;;  %v713_v26 = vadd.f32 %v712_v16, %v711_v17 }
  0x60   :  { %v4393_v20 = vmax.f32 %v599_v37, %v600_v49  ;;  %v964_v2 = vsel %vm963_vm5, %v541_v30, %v962_v1  ;;  %v708_v61 = vrot.slane %v707_v27, 1  ;;  %v719_v14 = vadd.f32 %v718_v57, %v717_v33 }
  0x61   :  { %v966_v3 = vsel %vm965_vm6, %v547_v55, %v964_v2  ;;  %v714_v19 = vrot.slane %v713_v26, 1  ;;  %v723_v50 = vadd.f32 %v530_v23, %v4192_v4  ;;  %v729_v60 = vadd.f32 %v536_v39, %v4194_v5 }
  0x62   :  { %v992_v59 = vsel %vm155_vm7, %v4393_v20, %v966_v3  ;;  %v709_v28 = vadd.f32 %v708_v61, %v707_v27  ;;  %v720_v24 = vrot.slane %v719_v14, 1  ;;  %v735_v62 = vadd.f32 %v542_v54, %v4198_v7 }
  0x63   :  { %1000 = vrot.lane.b32.xlu0 %v992_v59, %s4145_s2  ;;  %v715_v43 = vadd.f32 %v714_v19, %v713_v26  ;;  %v724_v44 = vrot.slane %v723_v50, 2  ;;  %v730_v34 = vrot.slane %v729_v60, 2  ;;  %v789_v0 = vadd.f32 %v596_v45, %v4249_v48 }
  0x64   :  { %v721_v15 = vadd.f32 %v720_v24, %v719_v14  ;;  %v736_v17 = vrot.slane %v735_v62, 2  ;;  %v891_v36 = vmul.f32 0.125, %v703_v38  ;;  %v892_v4 = vmul.f32 0.125, %v709_v28 }
  0x65   :  { %v725_v23 = vadd.f32 %v724_v44, %v723_v50  ;;  %v731_v5 = vadd.f32 %v730_v34, %v729_v60  ;;  %v790_v39 = vrot.slane %v789_v0, 2  ;;  %v893_v37 = vmul.f32 0.125, %v715_v43 }
  0x66   :  { %v737_v33 = vadd.f32 %v736_v17, %v735_v62  ;;  %v894_v27 = vmul.f32 0.125, %v721_v15  ;;  %v1050_v22 = vsel %vm955_vm1, %v892_v4, %v891_v36  ;;  %v602_v7 = vrot.slane %v4255_v58, 4 }
  0x67   :  { %v726_v54 = vrot.slane %v725_v23, 1  ;;  %v732_v21 = vrot.slane %v731_v5, 1  ;;  %v791_v29 = vadd.f32 %v790_v39, %v789_v0  ;;  %v1051_v16 = vsel %vm957_vm2, %v893_v37, %v1050_v22 }
  0x68   :  { %v738_v45 = vrot.slane %v737_v33, 1  ;;  %v1052_v30 = vsel %vm959_vm3, %v894_v27, %v1051_v16  ;;  %v603_v49 = vmax.f32 %v4255_v58, %v602_v7  ;;  %v608_v57 = vrot.slane %v4258_v63, 4 }
  0x69   :  { %v727_v55 = vadd.f32 %v726_v54, %v725_v23  ;;  %v733_v1 = vadd.f32 %v732_v21, %v731_v5  ;;  %v792_v38 = vrot.slane %v791_v29, 1  ;;  %v614_v26 = vrot.slane %v4260_v6, 4 }
  0x6a   :  { %v739_v2 = vadd.f32 %v738_v45, %v737_v33  ;;  %v604_v61 = vrot.slane %v603_v49, 2  ;;  %v609_v14 = vmax.f32 %v4258_v63, %v608_v57  ;;  %v620_v3 = vrot.slane %v4262_v10, 4 }
  0x6b   :  { %v793_v19 = vadd.f32 %v792_v38, %v791_v29  ;;  %v895_v50 = vmul.f32 0.125, %v727_v55  ;;  %v896_v60 = vmul.f32 0.125, %v733_v1  ;;  %v615_v59 = vmax.f32 %v4260_v6, %v614_v26 }
  0x6c   :  { %v897_v28 = vmul.f32 0.125, %v739_v2  ;;  %v605_v24 = vmax.f32 %v603_v49, %v604_v61  ;;  %v610_v62 = vrot.slane %v609_v14, 2  ;;  %v621_v43 = vmax.f32 %v4262_v10, %v620_v3 }
  0x6d   :  { %v906_v44 = vmul.f32 0.125, %v793_v19  ;;  %v1053_v34 = vsel %vm961_vm4, %v895_v50, %v1052_v30  ;;  %v616_v0 = vrot.slane %v615_v59, 2  ;;  %v626_v15 = vrot.slane %v4270_v31, 4 }
  0x6e   :  { %v1054_v17 = vsel %vm963_vm5, %v896_v60, %v1053_v34  ;;  %v606_v4 = vrot.slane %v605_v24, 1  ;;  %v611_v23 = vmax.f32 %v609_v14, %v610_v62  ;;  %v622_v5 = vrot.slane %v621_v43, 2 }
  0x6f   :  { %v1055_v39 = vsel %vm965_vm6, %v897_v28, %v1054_v17  ;;  %v617_v37 = vmax.f32 %v615_v59, %v616_v0  ;;  %v627_v33 = vmax.f32 %v4270_v31, %v626_v15  ;;  %v632_v27 = vrot.slane %v4272_v32, 4 }
  0x70   :  { %v1080_v22 = vsel %vm155_vm7, %v906_v44, %v1055_v39  ;;  %v4432_v54 = vmax.f32 %v605_v24, %v606_v4  ;;  %v612_v21 = vrot.slane %v611_v23, 1  ;;  %v623_v29 = vmax.f32 %v621_v43, %v622_v5 }
  0x71   :  { %1088 = vrot.lane.b32.xlu1 %v1080_v22, %s4145_s2  ;;  %v618_v16 = vrot.slane %v617_v37, 1  ;;  %v628_v45 = vrot.slane %v627_v33, 2  ;;  %v633_v30 = vmax.f32 %v4272_v32, %v632_v27  ;;  %v638_v49 = vrot.slane %v4286_v40, 4 }
  0x72   :  { %v613_v55 = vmax.f32 %v611_v23, %v612_v21  ;;  %v624_v1 = vrot.slane %v623_v29, 1  ;;  %v692_v38 = vrot.slane %v4327_v56, 4  ;;  %v1082_v2 = vsel %vm155_vm7, %v906_v44, %v891_v36 }
  0x73   :  { %v619_v61 = vmax.f32 %v617_v37, %v618_v16  ;;  %v629_v14 = vmax.f32 %v627_v33, %v628_v45  ;;  %v634_v19 = vrot.slane %v633_v30, 2  ;;  %v639_v50 = vmax.f32 %v4286_v40, %v638_v49 }
  0x74   :  { %v625_v60 = vmax.f32 %v623_v29, %v624_v1  ;;  %v693_v59 = vmax.f32 %v4327_v56, %v692_v38  ;;  %v975_v28 = vsel %vm955_vm1, %v613_v55, %v4432_v54  ;;  %v6474_v24 = vrot.slane %v4200_v8, 4 }
  0x75   :  { %v630_v36 = vrot.slane %v629_v14, 1  ;;  %v635_v43 = vmax.f32 %v633_v30, %v634_v19  ;;  %v640_v44 = vrot.slane %v639_v50, 2  ;;  %v976_v34 = vsel %vm957_vm2, %v619_v61, %v975_v28  ;;  %1092 = vrot.lane.b32.xlu1 %v1082_v2, %s4145_s2 }
  0x76   :  { %v741_v62 = vadd.f32 %v6474_v24, %v4200_v8  ;;  %v694_v0 = vrot.slane %v693_v59, 2  ;;  %v977_v17 = vsel %vm959_vm3, %v625_v60, %v976_v34  ;;  %v6475_v23 = vrot.slane %v4202_v9, 4 }
  0x77   :  { %v631_v39 = vmax.f32 %v629_v14, %v630_v36  ;;  %v636_v37 = vrot.slane %v635_v43, 1  ;;  %v641_v33 = vmax.f32 %v639_v50, %v640_v44  ;;  %v6476_v8 = vrot.slane %v4206_v11, 4 }
  0x78   :  { %v742_v4 = vrot.slane %v741_v62, 2  ;;  %v747_v5 = vadd.f32 %v6475_v23, %v4202_v9  ;;  %v695_v21 = vmax.f32 %v693_v59, %v694_v0  ;;  %v6477_v45 = vrot.slane %v4208_v12, 4 }
  0x79   :  { %v753_v22 = vadd.f32 %v6476_v8, %v4206_v11  ;;  %v637_v55 = vmax.f32 %v635_v43, %v636_v37  ;;  %v642_v1 = vrot.slane %v641_v33, 1  ;;  %v978_v2 = vsel %vm961_vm4, %v631_v39, %v977_v17 }
  0x7a   :  { %v743_v29 = vadd.f32 %v742_v4, %v741_v62  ;;  %v748_v16 = vrot.slane %v747_v5, 2  ;;  %v759_v30 = vadd.f32 %v6477_v45, %v4208_v12  ;;  %v696_v9 = vrot.slane %v695_v21, 1 }
  0x7b   :  { %v754_v61 = vrot.slane %v753_v22, 2  ;;  %v643_v60 = vmax.f32 %v641_v33, %v642_v1  ;;  %v979_v28 = vsel %vm963_vm5, %v637_v55, %v978_v2  ;;  %v6478_v59 = vrot.slane %v4210_v13, 4 }
  0x7c   :  { %v744_v14 = vrot.slane %v743_v29, 1  ;;  %v749_v19 = vadd.f32 %v748_v16, %v747_v5  ;;  %v760_v50 = vrot.slane %v759_v30, 2  ;;  %v4469_v62 = vmax.f32 %v695_v21, %v696_v9 }
  0x7d   :  { %v755_v11 = vadd.f32 %v754_v61, %v753_v22  ;;  %v765_v24 = vadd.f32 %v6478_v59, %v4210_v13  ;;  %v980_v44 = vsel %vm965_vm6, %v643_v60, %v979_v28  ;;  %v6479_v17 = vrot.slane %v4216_v18, 4 }
  0x7e   :  { %v745_v12 = vadd.f32 %v744_v14, %v743_v29  ;;  %v750_v36 = vrot.slane %v749_v19, 1  ;;  %v761_v43 = vadd.f32 %v760_v50, %v759_v30  ;;  %v993_v23 = vsel %vm155_vm7, %v4469_v62, %v980_v44 }
  0x7f   :  { %v756_v34 = vrot.slane %v755_v11, 1  ;;  %v766_v0 = vrot.slane %v765_v24, 2  ;;  %v771_v4 = vadd.f32 %v6479_v17, %v4216_v18  ;;  %v6480_v13 = vrot.slane %v4247_v47, 4  ;;  %1006 = vrot.lane.b32.xlu0 %v993_v23, %s4145_s2 }
  0x80   :  { %v751_v5 = vadd.f32 %v750_v36, %v749_v19  ;;  %v762_v39 = vrot.slane %v761_v43, 1  ;;  %v6481_v21 = vrot.slane %v4252_v53, 4  ;;  %v898_v45 = vmul.f32 0.125, %v745_v12 }
  0x81   :  { %v777_v37 = vadd.f32 %v6480_v13, %v4247_v47  ;;  %v757_v33 = vadd.f32 %v756_v34, %v755_v11  ;;  %v767_v8 = vadd.f32 %v766_v0, %v765_v24  ;;  %v772_v22 = vrot.slane %v771_v4, 2 }
  0x82   :  { %v783_v29 = vadd.f32 %v6481_v21, %v4252_v53  ;;  %v763_v16 = vadd.f32 %v762_v39, %v761_v43  ;;  %v899_v30 = vmul.f32 0.125, %v751_v5  ;;  %v6482_v50 = vrot.slane %v4265_v25, 4 }
  0x83   :  { %v778_v18 = vrot.slane %v777_v37, 2  ;;  %v768_v55 = vrot.slane %v767_v8, 1  ;;  %v773_v1 = vadd.f32 %v772_v22, %v771_v4  ;;  %v900_v61 = vmul.f32 0.125, %v757_v33 }
  0x84   :  { %v784_v2 = vrot.slane %v783_v29, 2  ;;  %v901_v14 = vmul.f32 0.125, %v763_v16  ;;  %v1056_v19 = vsel %vm967_vm0, %v899_v30, %v898_v45  ;;  %v837_v60 = vadd.f32 %v6482_v50, %v4265_v25 }
  0x85   :  { %v779_v9 = vadd.f32 %v778_v18, %v777_v37  ;;  %v769_v28 = vadd.f32 %v768_v55, %v767_v8  ;;  %v774_v11 = vrot.slane %v773_v1, 1  ;;  %v1057_v24 = vsel %vm955_vm1, %v900_v61, %v1056_v19 }
  0x86   :  { %v785_v59 = vadd.f32 %v784_v2, %v783_v29  ;;  %v1058_v12 = vsel %vm957_vm2, %v901_v14, %v1057_v24  ;;  %v838_v43 = vrot.slane %v837_v60, 2  ;;  %v6483_v44 = vrot.slane %v4288_v41, 4 }
  0x87   :  { %v780_v36 = vrot.slane %v779_v9, 1  ;;  %v775_v0 = vadd.f32 %v774_v11, %v773_v1  ;;  %v902_v4 = vmul.f32 0.125, %v769_v28  ;;  %v6484_v23 = vrot.slane %v4290_v42, 4 }
  0x88   :  { %v843_v34 = vadd.f32 %v6483_v44, %v4288_v41  ;;  %v786_v17 = vrot.slane %v785_v59, 1  ;;  %v839_v13 = vadd.f32 %v838_v43, %v837_v60  ;;  %v6485_v33 = vrot.slane %v4294_v46, 4 }
  0x89   :  { %v849_v5 = vadd.f32 %v6484_v23, %v4290_v42  ;;  %v781_v39 = vadd.f32 %v780_v36, %v779_v9  ;;  %v903_v21 = vmul.f32 0.125, %v775_v0  ;;  %v1059_v29 = vsel %vm959_vm3, %v902_v4, %v1058_v12 }
  0x8a   :  { %v844_v37 = vrot.slane %v843_v34, 2  ;;  %v855_v8 = vadd.f32 %v6485_v33, %v4294_v46  ;;  %v787_v22 = vadd.f32 %v786_v17, %v785_v59  ;;  %v840_v45 = vrot.slane %v839_v13, 1  ;;  %v6489_v17 = vld [vmem:[#allocation14_spill] sm:$0xff] }
  0x8b   :  { %v850_v16 = vrot.slane %v849_v5, 2  ;;  %v904_v18 = vmul.f32 0.125, %v781_v39  ;;  %v1060_v2 = vsel %vm961_vm4, %v903_v21, %v1059_v29  ;;  %v6486_v9 = vrot.slane %v4316_v35, 4 }
  0x8c   :  { %v845_v30 = vadd.f32 %v844_v37, %v843_v34  ;;  %v856_v55 = vrot.slane %v855_v8, 2  ;;  %v905_v1 = vmul.f32 0.125, %v787_v22  ;;  %v841_v50 = vadd.f32 %v840_v45, %v839_v13 }
  0x8d   :  { %v851_v61 = vadd.f32 %v850_v16, %v849_v5  ;;  %v861_v14 = vadd.f32 %v6486_v9, %v4316_v35  ;;  %v1061_v19 = vsel %vm963_vm5, %v904_v18, %v1060_v2  ;;  %v6487_v36 = vrot.slane %v4323_v51, 4 }
  0x8e   :  { %v846_v60 = vrot.slane %v845_v30, 1  ;;  %v857_v28 = vadd.f32 %v856_v55, %v855_v8  ;;  %v1062_v11 = vsel %vm965_vm6, %v905_v1, %v1061_v19  ;;  %v6488_v34 = vrot.slane %v4325_v52, 4 }
  0x8f   :  { %v852_v59 = vrot.slane %v851_v61, 1  ;;  %v862_v24 = vrot.slane %v861_v14, 2  ;;  %v867_v12 = vadd.f32 %v6487_v36, %v4323_v51  ;;  %1090 = vrot.lane.b32.xlu0 %v1062_v11, %s4145_s2  ;;  %v6490_v4 = vrot.slane %v6489_v17, 4 }
  0x90   :  { %v847_v43 = vadd.f32 %v846_v60, %v845_v30  ;;  %v858_v44 = vrot.slane %v857_v28, 1  ;;  %v873_v0 = vadd.f32 %v6488_v34, %v4325_v52  ;;  %v914_v37 = vmul.f32 0.125, %v841_v50 }
  0x91   :  { %v879_v23 = vadd.f32 %v6490_v4, %v6489_v17  ;;  %v853_v5 = vadd.f32 %v852_v59, %v851_v61  ;;  %v863_v39 = vadd.f32 %v862_v24, %v861_v14  ;;  %v868_v13 = vrot.slane %v867_v12, 2 }
  0x92   :  { %v859_v33 = vadd.f32 %v858_v44, %v857_v28  ;;  %v874_v8 = vrot.slane %v873_v0, 2  ;;  %v915_v21 = vmul.f32 0.125, %v847_v43  ;;  %v795_v45 = vadd.f32 %v602_v7, %v4255_v58 }
  0x93   :  { %v880_v22 = vrot.slane %v879_v23, 2  ;;  %v864_v29 = vrot.slane %v863_v39, 1  ;;  %v869_v16 = vadd.f32 %v868_v13, %v867_v12  ;;  %v916_v18 = vmul.f32 0.125, %v853_v5 }
  0x94   :  { %v875_v30 = vadd.f32 %v874_v8, %v873_v0  ;;  %v917_v1 = vmul.f32 0.125, %v859_v33  ;;  %v1069_v2 = vsel %vm967_vm0, %v915_v21, %v914_v37  ;;  %v796_v19 = vrot.slane %v795_v45, 2 }
  0x95   :  { %v881_v55 = vadd.f32 %v880_v22, %v879_v23  ;;  %v865_v61 = vadd.f32 %v864_v29, %v863_v39  ;;  %v870_v9 = vrot.slane %v869_v16, 1  ;;  %v1070_v14 = vsel %vm955_vm1, %v916_v18, %v1069_v2 }
  0x96   :  { %v876_v50 = vrot.slane %v875_v30, 1  ;;  %v1071_v28 = vsel %vm957_vm2, %v917_v1, %v1070_v14  ;;  %v801_v11 = vadd.f32 %v608_v57, %v4258_v63  ;;  %v797_v24 = vadd.f32 %v796_v19, %v795_v45 }
  0x97   :  { %v882_v60 = vrot.slane %v881_v55, 1  ;;  %v871_v59 = vadd.f32 %v870_v9, %v869_v16  ;;  %v918_v7 = vmul.f32 0.125, %v865_v61  ;;  %v807_v36 = vadd.f32 %v614_v26, %v4260_v6 }
  0x98   :  { %v877_v12 = vadd.f32 %v876_v50, %v875_v30  ;;  %v802_v44 = vrot.slane %v801_v11, 2  ;;  %v813_v34 = vadd.f32 %v620_v3, %v4262_v10  ;;  %v798_v23 = vrot.slane %v797_v24, 1 }
  0x99   :  { %v883_v43 = vadd.f32 %v882_v60, %v881_v55  ;;  %v919_v0 = vmul.f32 0.125, %v871_v59  ;;  %v1072_v4 = vsel %vm959_vm3, %v918_v7, %v1071_v28  ;;  %v808_v5 = vrot.slane %v807_v36, 2 }
  0x9a   :  { %v920_v57 = vmul.f32 0.125, %v877_v12  ;;  %v803_v13 = vadd.f32 %v802_v44, %v801_v11  ;;  %v814_v37 = vrot.slane %v813_v34, 2  ;;  %v799_v8 = vadd.f32 %v798_v23, %v797_v24 }
  0x9b   :  { %v921_v39 = vmul.f32 0.125, %v883_v43  ;;  %v1073_v33 = vsel %vm961_vm4, %v919_v0, %v1072_v4  ;;  %v809_v26 = vadd.f32 %v808_v5, %v807_v36  ;;  %v819_v22 = vadd.f32 %v626_v15, %v4270_v31  ;;  %v4551_v5 = vld [vmem:[#allocation2] sm:$0xff] }
  0x9c   :  { %v1074_v21 = vsel %vm963_vm5, %v920_v57, %v1073_v33  ;;  %v804_v3 = vrot.slane %v803_v13, 1  ;;  %v815_v29 = vadd.f32 %v814_v37, %v813_v34  ;;  %v825_v16 = vadd.f32 %v632_v27, %v4272_v32  ;;  %v4553_v57 = vld [vmem:[#allocation2 + $0x8] sm:$0xff] }
  0x9d   :  { %v1075_v18 = vsel %vm965_vm6, %v921_v39, %v1074_v21  ;;  %v810_v45 = vrot.slane %v809_v26, 1  ;;  %v820_v30 = vrot.slane %v819_v22, 2  ;;  %v831_v55 = vadd.f32 %v638_v49, %v4286_v40 }
  0x9e   :  { %1096 = vrot.lane.b32.xlu1 %v1075_v18, %s4145_s2  ;;  %v805_v1 = vadd.f32 %v804_v3, %v803_v13  ;;  %v816_v15 = vrot.slane %v815_v29, 1  ;;  %v826_v2 = vrot.slane %v825_v16, 2  ;;  %v885_v61 = vadd.f32 %v692_v38, %v4327_v56 }
  0x9f   :  { %v811_v9 = vadd.f32 %v810_v45, %v809_v26  ;;  %v821_v14 = vadd.f32 %v820_v30, %v819_v22  ;;  %v832_v27 = vrot.slane %v831_v55, 2  ;;  %v907_v19 = vmul.f32 0.125, %v799_v8  ;;  %v4559_v22 = vld [vmem:[#allocation2 + $0x10] sm:$0xff]  ;;  %v4565_v30 = vld [vmem:[#allocation2 + $0x18] sm:$0xff] }
  0xa0   :  { %v817_v50 = vadd.f32 %v816_v15, %v815_v29  ;;  %v827_v60 = vadd.f32 %v826_v2, %v825_v16  ;;  %v886_v28 = vrot.slane %v885_v61, 2  ;;  %v908_v11 = vmul.f32 0.125, %v805_v1  ;;  %v4571_v15 = vld [vmem:[#allocation2 + $0x20] sm:$0xff] }
  0xa1   :  { %v822_v59 = vrot.slane %v821_v14, 1  ;;  %v833_v7 = vadd.f32 %v832_v27, %v831_v55  ;;  %v909_v49 = vmul.f32 0.125, %v811_v9  ;;  %v116_v39 = vadd.f32 %v4553_v57, %v4551_v5 }
  0xa2   :  { %v828_v24 = vrot.slane %v827_v60, 1  ;;  %v887_v36 = vadd.f32 %v886_v28, %v885_v61  ;;  %v910_v12 = vmul.f32 0.125, %v817_v50  ;;  %v1063_v43 = vsel %vm955_vm1, %v908_v11, %v907_v19  ;;  %v6491_v61 = vld [vmem:[#allocation15_spill] sm:$0xff]  ;;  %v4583_v50 = vld [vmem:[#allocation2 + $0x30] sm:$0xff]  ;;  %v4591_v11 = vld [vmem:[#allocation2 + $0x38] sm:$0xff] }
  0xa3   :  { %v823_v44 = vadd.f32 %v822_v59, %v821_v14  ;;  %v834_v34 = vrot.slane %v833_v7, 1  ;;  %v1064_v38 = vsel %vm957_vm2, %v909_v49, %v1063_v43  ;;  %v131_v33 = vadd.f32 %v4258_v63, %v4255_v58  ;;  %v4579_v14 = vld [vmem:[#allocation2 + $0x28] sm:$0xff] }
  0xa4   :  { %v829_v0 = vadd.f32 %v828_v24, %v827_v60  ;;  %v888_v4 = vrot.slane %v887_v36, 1  ;;  %v1065_v23 = vsel %vm959_vm3, %v910_v12, %v1064_v38  ;;  %v117_v21 = vadd.f32 %v4559_v22, %v116_v39  ;;  %v4606_v12 = vld [vmem:[#allocation2 + $0x58] sm:$0xff] }
  0xa5   :  { %v835_v13 = vadd.f32 %v834_v34, %v833_v7  ;;  %v911_v37 = vmul.f32 0.125, %v823_v44  ;;  %v132_v16 = vadd.f32 %v131_v33, %v4260_v6  ;;  %v994_v9 = vsel %vm155_vm7, %v4393_v20, %v6491_v61  ;;  %v4012_v7 = vld [vmem:[#allocation2 + $0x40] sm:$0xff] }
  0xa6   :  { %v889_v8 = vadd.f32 %v888_v4, %v887_v36  ;;  %v912_v26 = vmul.f32 0.125, %v829_v0  ;;  %v118_v55 = vadd.f32 %v4565_v30, %v117_v21  ;;  %v4598_v36 = vld [vmem:[#allocation2 + $0x48] sm:$0xff]  ;;  %v4610_v44 = vld [vmem:[#allocation2 + $0x60] sm:$0xff]  ;;  %v419_v61 = vstv %s4660_s8  ;;  %s4149_s8 = smov 9  }
  0xa7   :  { %v913_v3 = vmul.f32 0.125, %v835_v13  ;;  %v1066_v29 = vsel %vm961_vm4, %v911_v37, %v1065_v23  ;;  %v133_v63 = vadd.f32 %v132_v16, %v4262_v10  ;;  %vm258_vm8 = vcmask 1046528  }
  0xa8   :  { %v922_v18 = vmul.f32 0.125, %v889_v8  ;;  %v1067_v45 = vsel %vm963_vm5, %v912_v26, %v1066_v29  ;;  %v119_v2 = vadd.f32 %v4571_v15, %v118_v55  ;;  %v1128_v8 = vstv %s3896_s29  ;;  %s3909_s29 = sld [smem:[#allocation6 + $0x22]] }
  0xa9   :  { %v1068_v58 = vsel %vm965_vm6, %v913_v3, %v1067_v45  ;;  %v134_v6 = vadd.f32 %v133_v63, %v4270_v31  ;;  %v995_v31 = vsel %vm155_vm7, %v4469_v62, %v4432_v54  ;;  %v4602_v54 = vld [vmem:[#allocation2 + $0x50] sm:$0xff]  ;;  %v282_v3 = vstv %s4641_s4  ;;  %s3910_s4 = sld [smem:[#allocation6 + $0x1a]] }
  0xaa   :  { %v1081_v1 = vsel %vm155_vm7, %v922_v18, %v1068_v58  ;;  %v120_v27 = vadd.f32 %v4579_v14, %v119_v2  ;;  %v1083_v24 = vsel %vm155_vm7, %v922_v18, %v907_v19  ;;  %v318_v55 = vstv %s4645_s6  ;;  %s3911_s6 = sld [smem:[#allocation6 + $0x23]] }
  0xab   :  { %1094 = vrot.lane.b32.xlu0 %v1081_v1, %s4145_s2  ;;  %v135_v10 = vadd.f32 %v134_v6, %v4272_v32  ;;  %v383_v1 = vstv %s4651_s7  ;;  %vm359_vm9 = vcmask 1045504   ;;  %s4148_s7 = smov 121   ;;  %vm166_vm10 = vcmask 7168  }
  0xac   :  { %v121_v60 = vadd.f32 %v4583_v50, %v120_v27  ;;  %vm2180_vm11 = vcmask 72704   ;;  %vm3027_vm12 = vcmask 64512  }
  0xad   :  { %v136_v28 = vadd.f32 %v135_v10, %v4286_v40 }
  0xae   :  { %v122_v20 = vadd.f32 %v4591_v11, %v121_v60 }
  0xaf   :  { %1004 = vrot.lane.b32.xlu0 %v994_v9, %s4145_s2  ;;  %v137_v59 = vadd.f32 %v136_v28, %v4265_v25  ;;  %v4678_v28 = vstv %s3897_s9  ;;  %s3895_s9 = sld [smem:[#allocation6 + $0x1b]] }
  0xb0   :  { %v123_v32 = vadd.f32 %v4012_v7, %v122_v20 }
  0xb1   :  { %v138_v49 = vadd.f32 %v137_v59, %v4288_v41 }
  0xb2   :  { %v124_v40 = vadd.f32 %v4598_v36, %v123_v32 }
  0xb3   :  { %1010 = vrot.lane.b32.xlu0 %v995_v31, %s4145_s2  ;;  %v139_v25 = vadd.f32 %v138_v49, %v4290_v42 }
  0xb4   :  { %v125_v62 = vadd.f32 %v4602_v54, %v124_v40 }
  0xb5   :  { %v140_v41 = vadd.f32 %v139_v25, %v4294_v46 }
  0xb6   :  { %v126_v43 = vadd.f32 %v4606_v12, %v125_v62 }
  0xb7   :  { %1098 = vrot.lane.b32.xlu0 %v1083_v24, %s4145_s2  ;;  %v141_v34 = vadd.f32 %v140_v41, %v4316_v35 }
  0xb8   :  { %v127_v19 = vadd.f32 %v4610_v44, %v126_v43 }
  0xb9   :  { %v142_v0 = vadd.f32 %v141_v34, %v4323_v51  ;;  %v4647_v21 = vpop.permute.xlu1 %1002 }
  0xba   :  { %v128_v38 = vadd.f32 %v127_v19, %v4247_v47  ;;  %6493 = vst [vmem:[#allocation15_spill] sm:$0xff] %v4647_v21  ;;  %v1130_v29 = vmul.f32 %v1128_v8, %v4647_v21 }
  0xbb   :  { %v143_v4 = vadd.f32 %v142_v0, %v4325_v52 }
  0xbc   :  { %v129_v42 = vadd.f32 %v128_v38, %v4252_v53  ;;  %v4628_v53 = vpop.permute.xlu0 %160 }
  0xbd   :  { %v144_v23 = vadd.f32 %v143_v4, %v6489_v17  ;;  %v283_v45 = vmul.f32 %v282_v3, %v4628_v53  ;;  %v319_v63 = vmul.f32 %v318_v55, %v4628_v53  ;;  %v384_v6 = vmul.f32 %v383_v1, %v4628_v53 }
  0xbe   :  { %v130_v46 = vadd.f32 %v129_v42, %v4249_v48  ;;  %v197_v48 = vstv %s4626_s27  ;;  %v420_v27 = vmul.f32 %v419_v61, %v4628_v53  ;;  %v210_v42 = vstv %s3878_s10  ;;  %s3905_s27 = sld [smem:[#allocation6 + $0x20]] }
  0xbf   :  { %v145_v13 = vadd.f32 %v144_v23, %v4327_v56  ;;  %v198_v52 = vmul.f32 %v197_v48, %v4628_v53  ;;  %v225_v56 = vstv %s4630_s28  ;;  %v287_v58 = vrot.slane %v283_v45, 1  ;;  %s3908_s28 = sld [smem:[#allocation6 + $0x19]] }
  0xc0   :  { %v147_v39 = vmul.f32 0.0625, %v130_v46  ;;  %v4633_v51 = vpop.permute.xlu0 %162  ;;  %v226_v17 = vmul.f32 %v225_v56, %v4628_v53  ;;  %v323_v2 = vrot.slane %v319_v63, 1  ;;  %v388_v9 = vrot.slane %v384_v6, 2  ;;  %s3894_s10 = sld [smem:[#allocation6 + $0x12]] }
  0xc1   :  { %v148_v37 = vmul.f32 0.0625, %v145_v13  ;;  %v227_v59 = vmul.f32 %v225_v56, %v4633_v51  ;;  %v320_v24 = vmul.f32 %v318_v55, %v4633_v51  ;;  %v385_v62 = vmul.f32 %v383_v1, %v4633_v51 }
  0xc2   :  { %1759 = vmax.xlane.f32.xlu1 %v4553_v57  ;;  %v169_v35 = vrot.slane %v147_v39, 7  ;;  %v421_v43 = vmul.f32 %v419_v61, %v4633_v51  ;;  %v238_v23 = vstv %s3880_s11  ;;  %v299_v39 = vstv %s3884_s12  ;;  %s3900_s11 = sld [smem:[#allocation6 + $0x15]] }
  0xc3   :  { %v170_v47 = vrot.slane %v148_v37, 7  ;;  %v325_v40 = vrot.slane %v320_v24, 1  ;;  %v390_v25 = vrot.slane %v385_v62, 2  ;;  %v436_v55 = vstv %s4720_s15  ;;  %s3901_s12 = sld [smem:[#allocation6 + $0x1e]] }
  0xc4   :  { %v426_v41 = vrot.slane %v421_v43, 2 }
  0xc6   :  { %1771 = vmax.xlane.f32.xlu1 %v4591_v11 }
  0xc8   :  { %v4672_v10 = vpop.permute.xlu1 %1008 }
  0xc9   :  { %v1132_v32 = vmul.f32 %v1128_v8, %v4672_v10 }
  0xd5   :  { %v4639_v33 = vpop.permute.xlu0 %1000 }
  0xd6   :  { %1757 = vmax.xlane.f32.xlu0 %v4551_v5  ;;  %6492 = vst [vmem:[#allocation14_spill] sm:$0xff] %v4639_v33  ;;  %v1129_v26 = vmul.f32 %v1128_v8, %v4639_v33 }
  0xd7   :  { %177 = vrot.lane.b32.xlu1 %v169_v35, %s4145_s2 }
  0xda   :  { %1837 = vadd.xlane.f32.xlu0 %v4012_v7 }
  0xdb   :  { %179 = vrot.lane.b32.xlu1 %v170_v47, %s4145_s2 }
  0xe3   :  { %v4676_v60 = vpop.permute.xlu1 %1088 }
  0xe7   :  { %v4703_v19 = vpop.permute.xlu1 %1092 }
  0xf0   :  { %202 = vrot.lane.b32.xlu0 %v198_v52, %s4146_s30 }
  0xf1   :  { %v4654_v16 = vpop.permute.xlu0 %1006 }
  0xf2   :  { %v1131_v18 = vmul.f32 %v1128_v8, %v4654_v16 }
  0xf4   :  { %230 = vrot.lane.b32.xlu0 %v226_v17, %s4147_s5 }
  0xf8   :  { %1137 = vrot.lane.b32.xlu0 %v1129_v26, %s4146_s30  ;;  %v400_v26 = vstv %s3890_s14  ;;  %s3907_s14 = sld [smem:[#allocation6 + $0x21]] }
  0xfc   :  { %1139 = vrot.lane.b32.xlu0 %v1130_v29, %s4146_s30 }
  0xff   :  { %1773 = vmax.xlane.f32.xlu1 %v4012_v7  ;;  %v284_v7 = vmul.f32 %v282_v3, %v4633_v51 }
 0x100   :  { %1141 = vrot.lane.b32.xlu0 %v1131_v18, %s4146_s30 }
 0x101   :  { %v4683_v31 = vpop.permute.xlu0 %1090  ;;  %v289_v49 = vrot.slane %v284_v7, 1 }
 0x102   :  { %6494 = vst [vmem:[#allocation16_spill] sm:$0xff] %v4683_v31  ;;  %v1155_v20 = vmul.f32 %v4678_v28, %v4683_v31 }
 0x103   :  { %1821 = vadd.xlane.f32.xlu1 %v4551_v5  ;;  %v424_v5 = vrot.slane %v420_v27, 2  ;;  %v4742_v27 = vstv %s3898_s16  ;;  %s3924_s16 = sld [smem:[#allocation6 + $0x29]] }
 0x104   :  { %291 = vrot.lane.b32.xlu0 %v287_v58, %s4146_s30 }
 0x107   :  { %1823 = vadd.xlane.f32.xlu1 %v4553_v57  ;;  %v1154_v57 = vmul.f32 %v4678_v28, %v4676_v60 }
 0x108   :  { %327 = vrot.lane.b32.xlu0 %v323_v2, %s4147_s5 }
 0x10b   :  { %1835 = vadd.xlane.f32.xlu1 %v4591_v11  ;;  %v199_v11 = vmul.f32 %v197_v48, %v4633_v51  ;;  %v335_v48 = vstv %s3886_s13  ;;  %s5408_s13 = sld [smem:[#allocation6 + $0x18]] }
 0x10c   :  { %392 = vrot.lane.b32.xlu0 %v388_v9, %s4146_s30 }
 0x110   :  { %428 = vrot.lane.b32.xlu0 %v424_v5, %s4147_s5  ;;  %v4705_v34 = vpop.permute.xlu1 %1096  ;;  %v1181_v5 = vmul.f32 %v4742_v27, %v4639_v33 }
 0x114   :  { %1162 = vrot.lane.b32.xlu0 %v1154_v57, %s4146_s30 }
 0x118   :  { %1164 = vrot.lane.b32.xlu0 %v1155_v20, %s4146_s30 }
 0x11c   :  { %204 = vrot.lane.b32.xlu1 %v199_v11, %s4146_s30  ;;  %v1182_v11 = vmul.f32 %v4742_v27, %v4647_v21 }
 0x11d   :  { %v4738_v6 = vpop.permute.xlu0 %1094 }
 0x11e   :  { %v1156_v57 = vmul.f32 %v4678_v28, %v4738_v6 }
 0x120   :  { %232 = vrot.lane.b32.xlu1 %v227_v59, %s4147_s5 }
 0x121   :  { %v4748_v20 = vpop.permute.xlu0 %1004 }
 0x124   :  { %1143 = vrot.lane.b32.xlu1 %v1132_v32, %s4146_s30 }
 0x125   :  { %v4756_v7 = vpop.permute.xlu0 %1010 }
 0x128   :  { %293 = vrot.lane.b32.xlu1 %v289_v49, %s4146_s30 }
 0x129   :  { %v4759_v49 = vpop.permute.xlu0 %1098 }
 0x12c   :  { %329 = vrot.lane.b32.xlu1 %v325_v40, %s4147_s5 }
 0x130   :  { %394 = vrot.lane.b32.xlu1 %v390_v25, %s4146_s30 }
 0x134   :  { %430 = vrot.lane.b32.xlu1 %v426_v41, %s4147_s5 }
 0x14b   :  { %v4707_v38 = vpop.xlane.xlu1 %1759 }
 0x14f   :  { %v4709_v0 = vpop.xlane.xlu1 %1771 }
 0x153   :  { %v4711_v4 = vpop.permute.xlu1 %177 }
 0x154   :  { %v211_v46 = vmul.f32 %v210_v42, %v4711_v4  ;;  %v239_v37 = vmul.f32 %v238_v23, %v4711_v4  ;;  %v300_v47 = vmul.f32 %v299_v39, %v4711_v4  ;;  %v336_v8 = vmul.f32 %v335_v48, %v4711_v4 }
 0x155   :  { %v401_v45 = vmul.f32 %v400_v26, %v4711_v4  ;;  %v437_v2 = vmul.f32 %v436_v55, %v4711_v4 }
 0x156   :  { %215 = vrot.lane.b32.xlu0 %v211_v46, %s4146_s30  ;;  %v304_v56 = vrot.slane %v300_v47, 1  ;;  %v340_v29 = vrot.slane %v336_v8, 1 }
 0x157   :  { %v4715_v13 = vpop.permute.xlu1 %179  ;;  %v405_v63 = vrot.slane %v401_v45, 2  ;;  %v441_v9 = vrot.slane %v437_v2, 2  ;;  %v190_v45 = vstv %s3876_s20  ;;  %s3930_s20 = sld [smem:[#allocation6 + $0x2c]] }
 0x158   :  { %v212_v35 = vmul.f32 %v210_v42, %v4715_v13  ;;  %v240_v52 = vmul.f32 %v238_v23, %v4715_v13  ;;  %v301_v17 = vmul.f32 %v299_v39, %v4715_v13  ;;  %v337_v18 = vmul.f32 %v335_v48, %v4715_v13  ;;  %v4017_v39 = vld [vmem:[#allocation2 + $0x88] sm:$0xff] }
 0x159   :  { %v402_v1 = vmul.f32 %v400_v26, %v4715_v13  ;;  %v438_v59 = vmul.f32 %v436_v55, %v4715_v13  ;;  %v1157_v26 = vmul.f32 %v4678_v28, %v4705_v34  ;;  %v191_v28 = vmul.f32 %v190_v45, %v4711_v4 }
 0x15a   :  { %217 = vrot.lane.b32.xlu1 %v212_v35, %s4146_s30  ;;  %243 = vrot.lane.b32.xlu0 %v239_v37, %s4147_s5  ;;  %v306_v3 = vrot.slane %v301_v17, 1  ;;  %v342_v58 = vrot.slane %v337_v18, 1  ;;  %v4018_v37 = vld [vmem:[#allocation2 + $0x80] sm:$0xff] }
 0x15b   :  { %v407_v61 = vrot.slane %v402_v1, 2  ;;  %v443_v32 = vrot.slane %v438_v59, 2 }
 0x15e   :  { %245 = vrot.lane.b32.xlu1 %v240_v52, %s4147_s5  ;;  %308 = vrot.lane.b32.xlu0 %v304_v56, %s4146_s30 }
 0x15f   :  { %v4761_v24 = vpop.xlane.xlu0 %1757 }
 0x162   :  { %310 = vrot.lane.b32.xlu1 %v306_v3, %s4146_s30  ;;  %344 = vrot.lane.b32.xlu0 %v340_v29, %s4147_s5  ;;  %v4801_v3 = vstv %s3899_s17  ;;  %s3928_s17 = sld [smem:[#allocation6 + $0x2b]] }
 0x163   :  { %v4763_v40 = vpop.xlane.xlu0 %1837  ;;  %v1206_v18 = vmul.f32 %v4801_v3, %v4676_v60 }
 0x166   :  { %346 = vrot.lane.b32.xlu1 %v342_v58, %s4147_s5  ;;  %409 = vrot.lane.b32.xlu0 %v405_v63, %s4146_s30  ;;  %v185_v58 = vstv %s183_s21  ;;  %v1207_v63 = vmul.f32 %v4801_v3, %v4683_v31  ;;  %s3920_s21 = sld [smem:[#allocation6 + $0x27]] }
 0x167   :  { %v203_v62 = vpop.permute.xlu0 %202  ;;  %v186_v2 = vmul.f32 %v185_v58, %v4628_v53 }
 0x16a   :  { %411 = vrot.lane.b32.xlu1 %v407_v61, %s4146_s30  ;;  %445 = vrot.lane.b32.xlu0 %v441_v9, %s4147_s5  ;;  %v193_v9 = vadd.f32 %v191_v28, %v186_v2 }
 0x16b   :  { %v231_v43 = vpop.permute.xlu0 %230 }
 0x16e   :  { %1189 = vrot.lane.b32.xlu1 %v1181_v5, %s4147_s5  ;;  %1166 = vrot.lane.b32.xlu0 %v1156_v57, %s4146_s30  ;;  %v192_v5 = vmul.f32 %v190_v45, %v4715_v13  ;;  %v208_v57 = vadd.f32 %v203_v62, %v193_v9  ;;  %v267_v45 = vstv %s3882_s1  ;;  %s5525_s1 = sld [smem:[#allocation6 + $0x25]] }
 0x16f   :  { %v4771_v42 = vpop.permute.xlu0 %1137 }
 0x170   :  { %6495 = vst [vmem:[#allocation17_spill] sm:$0xff] %v4771_v42 }
 0x172   :  { %1191 = vrot.lane.b32.xlu1 %v1182_v11, %s4147_s5  ;;  %v187_v11 = vmul.f32 %v185_v58, %v4633_v51  ;;  %v269_v58 = vmul.f32 %v267_v45, %v4715_v13 }
 0x173   :  { %v4777_v23 = vpop.permute.xlu0 %1139 }
 0x174   :  { %6496 = vst [vmem:[#allocation18_spill] sm:$0xff] %v4777_v23 }
 0x176   :  { %447 = vrot.lane.b32.xlu1 %v443_v32, %s4147_s5 }
 0x188   :  { %v4765_v25 = vpop.xlane.xlu1 %1773 }
 0x18c   :  { %v4769_v41 = vpop.xlane.xlu1 %1821 }
 0x18d   :  { %1761 = vmax.xlane.f32.xlu0 %v4559_v22 }
 0x190   :  { %v4774_v46 = vpop.xlane.xlu1 %1823 }
 0x191   :  { %1825 = vadd.xlane.f32.xlu0 %v4559_v22  ;;  %v4783_v22 = vpop.permute.xlu0 %1141 }
 0x192   :  { %6497 = vst [vmem:[#allocation19_spill] sm:$0xff] %v4783_v22 }
 0x194   :  { %v4780_v35 = vpop.xlane.xlu1 %1835 }
 0x195   :  { %1839 = vadd.xlane.f32.xlu0 %v4598_v36  ;;  %v4786_v48 = vpop.permute.xlu0 %291 }
 0x198   :  { %v205_v47 = vpop.permute.xlu1 %204 }
 0x199   :  { %1777 = vmax.xlane.f32.xlu0 %v4602_v54 }
 0x19a   :  { %1775 = vmax.xlane.f32.xlu1 %v4598_v36  ;;  %v4789_v36 = vpop.permute.xlu0 %327 }
 0x19c   :  { %v233_v52 = vpop.permute.xlu1 %232 }
 0x19d   :  { %1791 = vmax.xlane.f32.xlu0 %v4017_v39 }
 0x19e   :  { %1763 = vmax.xlane.f32.xlu1 %v4565_v30  ;;  %v4793_v17 = vpop.permute.xlu0 %392 }
 0x1a0   :  { %v4791_v56 = vpop.permute.xlu1 %1143 }
 0x1a1   :  { %1841 = vadd.xlane.f32.xlu0 %v4602_v54  ;;  %6498 = vst [vmem:[#allocation20_spill] sm:$0xff] %v4791_v56 }
 0x1a2   :  { %1789 = vmax.xlane.f32.xlu1 %v4018_v37  ;;  %v4795_v54 = vpop.permute.xlu0 %428 }
 0x1a4   :  { %v294_v8 = vpop.permute.xlu1 %293 }
 0x1a5   :  { %1855 = vadd.xlane.f32.xlu0 %v4017_v39  ;;  %v194_v39 = vadd.f32 %v192_v5, %v187_v11  ;;  %v274_v11 = vrot.slane %v269_v58, 1 }
 0x1a6   :  { %1827 = vadd.xlane.f32.xlu1 %v4565_v30  ;;  %v1183_v30 = vmul.f32 %v4742_v27, %v4654_v16  ;;  %v4807_v55 = vpop.permute.xlu0 %1162 }
 0x1a7   :  { %6499 = vst [vmem:[#allocation21_spill] sm:$0xff] %v4807_v55 }
 0x1a8   :  { %v330_v29 = vpop.permute.xlu1 %329 }
 0x1aa   :  { %1853 = vadd.xlane.f32.xlu1 %v4018_v37  ;;  %v4817_v61 = vpop.permute.xlu0 %1164 }
 0x1ab   :  { %6500 = vst [vmem:[#allocation22_spill] sm:$0xff] %v4817_v61 }
 0x1ac   :  { %v4813_v1 = vpop.permute.xlu1 %394 }
 0x1b0   :  { %v4821_v59 = vpop.permute.xlu1 %430 }
 0x1bb   :  { %1168 = vrot.lane.b32.xlu1 %v1157_v26, %s4146_s30  ;;  %1193 = vrot.lane.b32.xlu0 %v1183_v30, %s4147_s5  ;;  %v253_v26 = vstv %s3881_s22  ;;  %v209_v30 = vadd.f32 %v205_v47, %v194_v39  ;;  %s3926_s22 = sld [smem:[#allocation6 + $0x2a]] }
 0x1bc   :  { %v254_v61 = vmul.f32 %v253_v26, %v4628_v53  ;;  %v255_v28 = vmul.f32 %v253_v26, %v4633_v51 }
 0x1be   :  { %v259_v23 = vrot.slane %v254_v61, 1  ;;  %v261_v55 = vrot.slane %v255_v28, 1  ;;  %v4019_v61 = vld [vmem:[#allocation2 + $0x90] sm:$0xff] }
 0x1bf   :  { %1214 = vrot.lane.b32.xlu1 %v1206_v18, %s4147_s5 }
 0x1c3   :  { %1216 = vrot.lane.b32.xlu1 %v1207_v63, %s4147_s5 }
 0x1c8   :  { %v216_v32 = vpop.permute.xlu0 %215 }
 0x1c9   :  { %v221_v37 = vadd.f32 %v216_v32, %v208_v57  ;;  %v268_v57 = vmul.f32 %v267_v45, %v4711_v4 }
 0x1cb   :  { %v236_v18 = vadd.f32 %v231_v43, %v221_v37  ;;  %v272_v32 = vrot.slane %v268_v57, 1 }
 0x1cc   :  { %v218_v22 = vpop.permute.xlu1 %217  ;;  %v244_v56 = vpop.permute.xlu0 %243 }
 0x1cd   :  { %v222_v63 = vadd.f32 %v218_v22, %v209_v30  ;;  %v249_v2 = vadd.f32 %v244_v56, %v236_v18 }
 0x1cf   :  { %v237_v62 = vadd.f32 %v233_v52, %v222_v63  ;;  %v265_v47 = vadd.f32 %v259_v23, %v249_v2  ;;  %v354_v23 = vstv %s3887_s23  ;;  %s3915_s23 = sld [smem:[#allocation6 + $0x2d]] }
 0x1d0   :  { %v246_v9 = vpop.permute.xlu1 %245  ;;  %v309_v30 = vpop.permute.xlu0 %308  ;;  %v355_v45 = vmul.f32 %v354_v23, %v4628_v53 }
 0x1d1   :  { %v250_v5 = vadd.f32 %v246_v9, %v237_v62  ;;  %v278_v39 = vadd.f32 %v272_v32, %v265_v47  ;;  %v368_v62 = vstv %s3888_s24  ;;  %v4020_v32 = vld [vmem:[#allocation2 + $0xb8] sm:$0xff]  ;;  %s3914_s24 = sld [smem:[#allocation6 + $0x24]] }
 0x1d2   :  { %v360_v57 = vrot.slane %v355_v45, 2  ;;  %v4027_v45 = vld [vmem:[#allocation2 + $0xd0] sm:$0xff] }
 0x1d3   :  { %v266_v43 = vadd.f32 %v261_v55, %v250_v5  ;;  %v297_v52 = vadd.f32 %v4786_v48, %v278_v39  ;;  %v370_v5 = vmul.f32 %v368_v62, %v4715_v13  ;;  %v4021_v39 = vld [vmem:[#allocation2 + $0x98] sm:$0xff] }
 0x1d4   :  { %v311_v56 = vpop.permute.xlu1 %310  ;;  %v345_v48 = vpop.permute.xlu0 %344 }
 0x1d5   :  { %v279_v22 = vadd.f32 %v274_v11, %v266_v43  ;;  %v314_v18 = vadd.f32 %v309_v30, %v297_v52 }
 0x1d7   :  { %v298_v37 = vadd.f32 %v294_v8, %v279_v22  ;;  %v333_v28 = vadd.f32 %v4789_v36, %v314_v18  ;;  %v356_v8 = vmul.f32 %v354_v23, %v4633_v51  ;;  %v375_v36 = vrot.slane %v370_v5, 2  ;;  %v4031_v5 = vld [vmem:[#allocation2 + $0xd8] sm:$0xff] }
 0x1d8   :  { %v347_v55 = vpop.permute.xlu1 %346  ;;  %v410_v52 = vpop.permute.xlu0 %409  ;;  %v1208_v23 = vmul.f32 %v4801_v3, %v4738_v6 }
 0x1d9   :  { %v315_v26 = vadd.f32 %v311_v56, %v298_v37  ;;  %v350_v58 = vadd.f32 %v345_v48, %v333_v28  ;;  %v362_v9 = vrot.slane %v356_v8, 2  ;;  %v4026_v28 = vld [vmem:[#allocation2 + $0x78] sm:$0xff] }
 0x1da   :  { %1765 = vmax.xlane.f32.xlu0 %v4571_v15 }
 0x1db   :  { %v334_v63 = vadd.f32 %v330_v29, %v315_v26  ;;  %v366_v51 = vadd.f32 %v360_v57, %v350_v58  ;;  %v4022_v26 = vld [vmem:[#allocation2 + $0xc0] sm:$0xff] }
 0x1dc   :  { %v412_v29 = vpop.permute.xlu1 %411 }
 0x1dd   :  { %v351_v2 = vadd.f32 %v347_v55, %v334_v63  ;;  %v4025_v55 = vld [vmem:[#allocation2 + $0xa0] sm:$0xff] }
 0x1de   :  { %1793 = vmax.xlane.f32.xlu0 %v4019_v61 }
 0x1df   :  { %v367_v47 = vadd.f32 %v362_v9, %v351_v2  ;;  %v4028_v2 = vld [vmem:[#allocation2 + $0x70] sm:$0xff] }
 0x1e0   :  { %v4838_v11 = vpop.permute.xlu1 %1189  ;;  %v4030_v9 = vld [vmem:[#allocation2 + $0xb0] sm:$0xff] }
 0x1e1   :  { %v380_v43 = vadd.f32 %v375_v36, %v367_v47  ;;  %6501 = vst [vmem:[#allocation23_spill] sm:$0xff] %v4838_v11 }
 0x1e2   :  { %1829 = vadd.xlane.f32.xlu0 %v4571_v15  ;;  %v369_v15 = vmul.f32 %v368_v62, %v4711_v4  ;;  %v4029_v62 = vld [vmem:[#allocation2 + $0xa8] sm:$0xff] }
 0x1e3   :  { %v399_v22 = vadd.f32 %v4813_v1, %v380_v43  ;;  %v4033_v43 = vld [vmem:[#allocation2 + $0xe0] sm:$0xff] }
 0x1e4   :  { %v373_v53 = vrot.slane %v369_v15, 2  ;;  %v4844_v37 = vpop.permute.xlu1 %1191 }
 0x1e5   :  { %6502 = vst [vmem:[#allocation24_spill] sm:$0xff] %v4844_v37 }
 0x1e6   :  { %1857 = vadd.xlane.f32.xlu0 %v4019_v61  ;;  %v379_v13 = vadd.f32 %v373_v53, %v366_v51  ;;  %v4032_v51 = vld [vmem:[#allocation2 + $0xf8] sm:$0xff] }
 0x1e7   :  { %1779 = vmax.xlane.f32.xlu1 %v4606_v12 }
 0x1e8   :  { %v398_v4 = vadd.f32 %v4793_v17, %v379_v13  ;;  %v448_v61 = vpop.permute.xlu1 %447  ;;  %v446_v17 = vpop.permute.xlu0 %445 }
 0x1ea   :  { %1781 = vmax.xlane.f32.xlu0 %v4610_v44  ;;  %v415_v56 = vadd.f32 %v410_v52, %v398_v4  ;;  %v4898_v52 = vstv %s3902_s25  ;;  %s3925_s25 = sld [smem:[#allocation6 + $0x32]] }
 0x1eb   :  { %1843 = vadd.xlane.f32.xlu1 %v4606_v12  ;;  %v416_v12 = vadd.f32 %v412_v29, %v399_v22 }
 0x1ec   :  { %v434_v1 = vadd.f32 %v4795_v54, %v415_v56  ;;  %v1184_v54 = vmul.f32 %v4742_v27, %v4672_v10  ;;  %v4867_v48 = vpop.permute.xlu0 %1166 }
 0x1ed   :  { %v435_v30 = vadd.f32 %v4821_v59, %v416_v12  ;;  %v4024_v59 = vld [vmem:[#allocation2 + $0xc8] sm:$0xff]  ;;  %6505 = vst [vmem:[#allocation27_spill] sm:$0xff] %v4867_v48 }
 0x1ee   :  { %1803 = vmax.xlane.f32.xlu0 %v4020_v32  ;;  %v4851_v18 = vadd.f32 %v446_v17, %v434_v1  ;;  %v1299_v17 = vmul.f32 %v4898_v52, %v4748_v20 }
 0x1ef   :  { %1767 = vmax.xlane.f32.xlu1 %v4579_v14 }
 0x1f0   :  { %6504 = vst [vmem:[#allocation26_spill] sm:$0xff] %v4851_v18 }
 0x1f2   :  { %1831 = vadd.xlane.f32.xlu0 %v4579_v14  ;;  %v4849_v14 = vadd.f32 %v448_v61, %v435_v30  ;;  %v1298_v30 = vmul.f32 %v4898_v52, %v4647_v21 }
 0x1f3   :  { %1795 = vmax.xlane.f32.xlu1 %v4021_v39 }
 0x1f4   :  { %6503 = vst [vmem:[#allocation25_spill] sm:$0xff] %v4849_v14  ;;  %v455_v63 = vadd.f32 %v4849_v14, %v4851_v18  ;;  %v1300_v18 = vmul.f32 %v4898_v52, %v4654_v16 }
 0x1f6   :  { %1859 = vadd.xlane.f32.xlu0 %v4021_v39 }
 0x1f7   :  { %1805 = vmax.xlane.f32.xlu1 %v4022_v26 }
 0x1fa   :  { %1869 = vadd.xlane.f32.xlu0 %v4022_v26 }
 0x1fb   :  { %1845 = vadd.xlane.f32.xlu1 %v4610_v44  ;;  %v4023_v44 = vld [vmem:[#allocation2 + $0x68] sm:$0xff] }
 0x1ff   :  { %1867 = vadd.xlane.f32.xlu1 %v4020_v32  ;;  %v1209_v32 = vmul.f32 %v4801_v3, %v4705_v34  ;;  %v1297_v3 = vmul.f32 %v4898_v52, %v4639_v33 }
 0x201   :  { %v1309_v1 = vrot.slane %v1297_v3, 1  ;;  %v4034_v3 = vld [vmem:[#allocation2 + $0xe8] sm:$0xff] }
 0x203   :  { %456 = vadd.xlane.f32.xlu1 %v455_v63 }
 0x210   :  { %1218 = vrot.lane.b32.xlu0 %v1208_v23, %s4147_s5  ;;  %v1310_v23 = vrot.slane %v1298_v30, 1 }
 0x214   :  { %1195 = vrot.lane.b32.xlu1 %v1184_v54, %s4147_s5 }
 0x223   :  { %v4863_v8 = vpop.xlane.xlu1 %1775 }
 0x227   :  { %v4865_v27 = vpop.xlane.xlu1 %1763 }
 0x22b   :  { %v4869_v58 = vpop.xlane.xlu1 %1789 }
 0x22f   :  { %1783 = vmax.xlane.f32.xlu0 %v4023_v44  ;;  %v4873_v29 = vpop.xlane.xlu1 %1827 }
 0x233   :  { %1807 = vmax.xlane.f32.xlu0 %v4024_v59  ;;  %v4877_v47 = vpop.xlane.xlu1 %1853 }
 0x234   :  { %6506 = vst [vmem:[#allocation28_spill] sm:$0xff] %v4877_v47 }
 0x237   :  { %1847 = vadd.xlane.f32.xlu0 %v4023_v44  ;;  %v4881_v36 = vpop.permute.xlu1 %1168  ;;  %v1311_v44 = vsel %vm258_vm8, %v1309_v1, %v1310_v23 }
 0x238   :  { %1769 = vmax.xlane.f32.xlu1 %v4583_v50  ;;  %6507 = vst [vmem:[#allocation29_spill] sm:$0xff] %v4881_v36 }
 0x23b   :  { %1871 = vadd.xlane.f32.xlu0 %v4024_v59  ;;  %v4888_v13 = vpop.permute.xlu1 %1214  ;;  %v1312_v59 = vrot.slane %v1299_v17, 1  ;;  %v4035_v17 = vld [vmem:[#allocation2 + $0xf0] sm:$0xff] }
 0x23c   :  { %1797 = vmax.xlane.f32.xlu1 %v4025_v55  ;;  %6508 = vst [vmem:[#allocation30_spill] sm:$0xff] %v4888_v13  ;;  %v1376_v13 = vstv %s3904_s0  ;;  %s3921_s0 = sld [smem:[#allocation6 + $0x30]] }
 0x23f   :  { %1787 = vmax.xlane.f32.xlu0 %v4026_v28  ;;  %v4892_v4 = vpop.permute.xlu1 %1216 }
 0x240   :  { %1833 = vadd.xlane.f32.xlu1 %v4583_v50  ;;  %v4871_v50 = vpop.xlane.xlu0 %1761  ;;  %6509 = vst [vmem:[#allocation31_spill] sm:$0xff] %v4892_v4 }
 0x243   :  { %1809 = vmax.xlane.f32.xlu0 %v4027_v45 }
 0x244   :  { %1861 = vadd.xlane.f32.xlu1 %v4025_v55  ;;  %v4875_v57 = vpop.xlane.xlu0 %1825 }
 0x247   :  { %1851 = vadd.xlane.f32.xlu0 %v4026_v28 }
 0x248   :  { %1785 = vmax.xlane.f32.xlu1 %v4028_v2  ;;  %v4879_v15 = vpop.xlane.xlu0 %1839 }
 0x24b   :  { %1873 = vadd.xlane.f32.xlu0 %v4027_v45  ;;  %v1313_v45 = vsel %vm258_vm8, %v1310_v23, %v1312_v59 }
 0x24c   :  { %1799 = vmax.xlane.f32.xlu1 %v4029_v62  ;;  %v4883_v53 = vpop.xlane.xlu0 %1777 }
 0x24f   :  { %1801 = vmax.xlane.f32.xlu0 %v4030_v9 }
 0x250   :  { %1849 = vadd.xlane.f32.xlu1 %v4028_v2  ;;  %v4890_v22 = vpop.xlane.xlu0 %1791 }
 0x253   :  { %1811 = vmax.xlane.f32.xlu0 %v4031_v5 }
 0x254   :  { %1863 = vadd.xlane.f32.xlu1 %v4029_v62  ;;  %v4894_v39 = vpop.xlane.xlu0 %1841 }
 0x257   :  { %1865 = vadd.xlane.f32.xlu0 %v4030_v9 }
 0x258   :  { %v4900_v56 = vpop.xlane.xlu0 %1855 }
 0x259   :  { %6510 = vst [vmem:[#allocation32_spill] sm:$0xff] %v4900_v56 }
 0x25b   :  { %1875 = vadd.xlane.f32.xlu0 %v4031_v5 }
 0x25c   :  { %v4912_v63 = vpop.permute.xlu0 %1193 }
 0x25d   :  { %6511 = vst [vmem:[#allocation33_spill] sm:$0xff] %v4912_v63  ;;  %v1314_v63 = vrot.slane %v1300_v18, 1 }
 0x25f   :  { %1819 = vmax.xlane.f32.xlu0 %v4032_v51 }
 0x263   :  { %1877 = vadd.xlane.f32.xlu0 %v4033_v43  ;;  %v4918_v55 = vpop.xlane.xlu0 %1765 }
 0x265   :  { %1220 = vrot.lane.b32.xlu1 %v1209_v32, %s4147_s5 }
 0x267   :  { %1883 = vadd.xlane.f32.xlu0 %v4032_v51  ;;  %v4924_v2 = vpop.xlane.xlu0 %1793 }
 0x26b   :  { %v4930_v5 = vpop.xlane.xlu0 %1829 }
 0x26c   :  { %6514 = vst [vmem:[#allocation36_spill] sm:$0xff] %v4930_v5 }
 0x26f   :  { %v4932_v1 = vpop.xlane.xlu0 %1857 }
 0x270   :  { %v4896_v12 = vpop.xlane.xlu1 %1779  ;;  %6515 = vst [vmem:[#allocation37_spill] sm:$0xff] %v4932_v1 }
 0x274   :  { %v4902_v26 = vpop.xlane.xlu1 %1843 }
 0x278   :  { %v4908_v61 = vpop.xlane.xlu1 %1767 }
 0x27c   :  { %v4914_v54 = vpop.xlane.xlu1 %1795 }
 0x27d   :  { %1319 = vrot.lane.b32.xlu0 %v1311_v44, %s4146_s30 }
 0x280   :  { %v4920_v28 = vpop.xlane.xlu1 %1805 }
 0x281   :  { %6512 = vst [vmem:[#allocation34_spill] sm:$0xff] %v4920_v28  ;;  %1321 = vrot.lane.b32.xlu0 %v1313_v45, %s4146_s30  ;;  %v4934_v45 = vpop.xlane.xlu0 %1781 }
 0x284   :  { %v4926_v62 = vpop.xlane.xlu1 %1845 }
 0x288   :  { %v4928_v9 = vpop.xlane.xlu1 %1867 }
 0x289   :  { %6513 = vst [vmem:[#allocation35_spill] sm:$0xff] %v4928_v9  ;;  %1813 = vmax.xlane.f32.xlu1 %v4033_v43  ;;  %v4936_v43 = vpop.xlane.xlu0 %1803 }
 0x28a   :  { %6516 = vst [vmem:[#allocation38_spill] sm:$0xff] %v4936_v43  ;;  %v1520_v43 = vstv %s3908_s28  ;;  %s3917_s28 = sld [smem:[#allocation6 + $0x2e]] }
 0x28b   :  { %v1524_v56 = vmul.f32 %v1520_v43, %v4654_v16 }
 0x28c   :  { %v457_v51 = vpop.xlane.xlu1 %456 }
 0x28d   :  { %v458_v32 = vrot.slane %v457_v51, 4  ;;  %1815 = vmax.xlane.f32.xlu1 %v4034_v3 }
 0x28f   :  { %v459_v30 = vadd.f32 %v458_v32, %v457_v51  ;;  %v1301_v51 = vmul.f32 %v4898_v52, %v4672_v10  ;;  %v1335_v32 = vstv %s3903_s26  ;;  %s3931_s26 = sld [smem:[#allocation6 + $0x35]] }
 0x290   :  { %v1338_v4 = vmul.f32 %v1335_v32, %v4703_v19  ;;  %v1339_v36 = vmul.f32 %v1335_v32, %v4738_v6  ;;  %v1340_v37 = vmul.f32 %v1335_v32, %v4705_v34 }
 0x291   :  { %1817 = vmax.xlane.f32.xlu1 %v4035_v17  ;;  %v460_v23 = vrot.slane %v459_v30, 2 }
 0x292   :  { %v1354_v42 = vrot.slane %v1340_v37, 1 }
 0x293   :  { %v461_v44 = vadd.f32 %v460_v23, %v459_v30  ;;  %v1337_v30 = vmul.f32 %v1335_v32, %v4683_v31  ;;  %v1315_v23 = vrot.slane %v1301_v51, 1  ;;  %v1351_v51 = vrot.slane %v1338_v4, 1 }
 0x295   :  { %1881 = vadd.xlane.f32.xlu1 %v4035_v17  ;;  %v462_v59 = vrot.slane %v461_v44, 1  ;;  %v4943_v17 = vpop.xlane.xlu0 %1831 }
 0x296   :  { %6517 = vst [vmem:[#allocation39_spill] sm:$0xff] %v4943_v17 }
 0x297   :  { %v463_v14 = vadd.f32 %v462_v59, %v461_v44  ;;  %v1336_v44 = vmul.f32 %v1335_v32, %v4676_v60  ;;  %v1349_v59 = vrot.slane %v1337_v30, 1 }
 0x299   :  { %3934 = vpush %v463_v14  ;;  %v1316_v14 = vsel %vm258_vm8, %v1314_v63, %v1315_v23  ;;  %v1348_v48 = vrot.slane %v1336_v44, 1  ;;  %v1377_v63 = vmul.f32 %v1376_v13, %v4639_v33  ;;  %v1352_v30 = vsel %vm258_vm8, %v1349_v59, %v1351_v51 }
 0x29a   :  { %v1353_v44 = vrot.slane %v1339_v36, 1  ;;  %v1379_v36 = vmul.f32 %v1376_v13, %v4748_v20 }
 0x29b   :  { %v1350_v18 = vsel %vm258_vm8, %v1348_v48, %v1349_v59  ;;  %v1378_v48 = vmul.f32 %v1376_v13, %v4647_v21  ;;  %v1389_v4 = vrot.slane %v1377_v63, 1 }
 0x2a0   :  { %1879 = vadd.xlane.f32.xlu0 %v4034_v3  ;;  %v4949_v3 = vpop.xlane.xlu0 %1859 }
 0x2a1   :  { %6518 = vst [vmem:[#allocation40_spill] sm:$0xff] %v4949_v3  ;;  %v1355_v3 = vsel %vm258_vm8, %v1353_v44, %v1354_v42  ;;  %v1382_v44 = vmul.f32 %v1376_v13, %v4756_v7 }
 0x2a4   :  { %v4959_v11 = vpop.xlane.xlu0 %1869 }
 0x2a5   :  { %6519 = vst [vmem:[#allocation41_spill] sm:$0xff] %v4959_v11  ;;  %v1392_v11 = vrot.slane %v1379_v36, 1 }
 0x2a6   :  { %1323 = vrot.lane.b32.xlu1 %v1316_v14, %s4146_s30  ;;  %v1302_v14 = vmul.f32 %v4898_v52, %v4756_v7  ;;  %v1390_v52 = vrot.slane %v1378_v48, 1  ;;  %v1381_v48 = vmul.f32 %v1376_v13, %v4672_v10 }
 0x2a8   :  { %v1317_v1 = vrot.slane %v1302_v14, 1  ;;  %v4970_v51 = vpop.permute.xlu0 %1218  ;;  %v1341_v14 = vmul.f32 %v1335_v32, %v4759_v49 }
 0x2a9   :  { %6520 = vst [vmem:[#allocation42_spill] sm:$0xff] %v4970_v51 }
 0x2aa   :  { %1358 = vrot.lane.b32.xlu1 %v1350_v18, %s4146_s30  ;;  %v1415_v18 = vstv %s3905_s27  ;;  %v1318_v63 = vsel %vm258_vm8, %v1315_v23, %v1317_v1  ;;  %v1393_v1 = vsel %vm258_vm8, %v1390_v52, %v1392_v11  ;;  %v1397_v23 = vrot.slane %v1382_v44, 1  ;;  %s3927_s27 = sld [smem:[#allocation6 + $0x33]] }
 0x2ab   :  { %v4964_v9 = vmul.f32 %v1415_v18, %v4683_v31  ;;  %v1416_v59 = vmul.f32 %v1415_v18, %v4676_v60  ;;  %v1356_v36 = vrot.slane %v1341_v14, 1  ;;  %v1421_v32 = vmul.f32 %v1415_v18, %v4759_v49 }
 0x2ac   :  { %v1522_v14 = vmul.f32 %v1520_v43, %v4647_v21 }
 0x2ad   :  { %v1429_v37 = vrot.slane %v4964_v9, 1  ;;  %v1436_v11 = vrot.slane %v1421_v32, 1  ;;  %v1419_v32 = vmul.f32 %v1415_v18, %v4738_v6 }
 0x2ae   :  { %1360 = vrot.lane.b32.xlu1 %v1352_v30, %s4146_s30  ;;  %v1391_v30 = vsel %vm258_vm8, %v1389_v4, %v1390_v52  ;;  %v1380_v4 = vmul.f32 %v1376_v13, %v4654_v16  ;;  %v1357_v13 = vsel %vm258_vm8, %v1354_v42, %v1356_v36  ;;  %v1523_v52 = vmul.f32 %v1520_v43, %v4748_v20 }
 0x2b0   :  { %v1394_v28 = vrot.slane %v1380_v4, 1  ;;  %v1536_v36 = vrot.slane %v1523_v52, 2  ;;  %v1433_v52 = vrot.slane %v1419_v32, 1 }
 0x2b2   :  { %1362 = vrot.lane.b32.xlu1 %v1355_v3, %s4146_s30  ;;  %v1428_v3 = vrot.slane %v1416_v59, 1  ;;  %v1395_v59 = vrot.slane %v1381_v48, 1  ;;  %v1418_v48 = vmul.f32 %v1415_v18, %v4703_v19 }
 0x2b4   :  { %v1430_v9 = vsel %vm258_vm8, %v1428_v3, %v1429_v37  ;;  %v1398_v3 = vsel %vm258_vm8, %v1395_v59, %v1397_v23  ;;  %v1396_v23 = vsel %vm258_vm8, %v1394_v28, %v1395_v59  ;;  %v1521_v28 = vmul.f32 %v1520_v43, %v4639_v33 }
 0x2b6   :  { %1325 = vrot.lane.b32.xlu0 %v1318_v63, %s4146_s30  ;;  %1399 = vrot.lane.b32.xlu1 %v1391_v30, %s4147_s5  ;;  %v1420_v30 = vmul.f32 %v1415_v18, %v4705_v34 }
 0x2b8   :  { %v4980_v51 = vpop.xlane.xlu0 %1783  ;;  %v1434_v44 = vrot.slane %v1420_v30, 1  ;;  %v1534_v30 = vrot.slane %v1522_v14, 2 }
 0x2ba   :  { %1438 = vrot.lane.b32.xlu0 %v1430_v9, %s4147_s5  ;;  %1401 = vrot.lane.b32.xlu1 %v1393_v1, %s4147_s5  ;;  %v1559_v9 = vstv %s3909_s29  ;;  %v1437_v42 = vsel %vm258_vm8, %v1434_v44, %v1436_v11  ;;  %v1537_v59 = vsel %vm359_vm9, %v1534_v30, %v1536_v36  ;;  %v1435_v32 = vsel %vm258_vm8, %v1433_v52, %v1434_v44  ;;  %s3918_s29 = sld [smem:[#allocation6 + $0x26]] }
 0x2bb   :  { %v5001_v1 = vmul.f32 %v1559_v9, %v4683_v31  ;;  %v1538_v44 = vrot.slane %v1524_v56, 2  ;;  %v1565_v52 = vmul.f32 %v1559_v9, %v4759_v49 }
 0x2bc   :  { %v4989_v63 = vpop.xlane.xlu0 %1807 }
 0x2bd   :  { %6521 = vst [vmem:[#allocation43_spill] sm:$0xff] %v4989_v63  ;;  %v1560_v63 = vmul.f32 %v1559_v9, %v4676_v60  ;;  %v1573_v11 = vrot.slane %v5001_v1, 2  ;;  %v1600_v1 = vstv %s3910_s4  ;;  %s3922_s4 = sld [smem:[#allocation6 + $0x28]] }
 0x2be   :  { %1405 = vrot.lane.b32.xlu0 %v1398_v3, %s4147_s5  ;;  %1364 = vrot.lane.b32.xlu1 %v1357_v13, %s4146_s30  ;;  %v5006_v3 = vpop.permute.xlu1 %1195  ;;  %v1431_v13 = vrot.slane %v1418_v48, 1  ;;  %v1525_v48 = vmul.f32 %v1520_v43, %v4672_v10  ;;  %v1601_v36 = vmul.f32 %v1600_v1, %v4639_v33 }
 0x2bf   :  { %6522 = vst [vmem:[#allocation44_spill] sm:$0xff] %v5006_v3  ;;  %v1572_v14 = vrot.slane %v1560_v63, 2 }
 0x2c0   :  { %v4998_v4 = vpop.xlane.xlu0 %1847  ;;  %v1432_v18 = vsel %vm258_vm8, %v1429_v37, %v1431_v13  ;;  %v1539_v63 = vrot.slane %v1525_v48, 2 }
 0x2c1   :  { %v1574_v37 = vsel %vm359_vm9, %v1572_v14, %v1573_v11 }
 0x2c2   :  { %1444 = vrot.lane.b32.xlu0 %v1437_v42, %s4147_s5  ;;  %1403 = vrot.lane.b32.xlu1 %v1396_v23, %s4147_s5  ;;  %v1526_v42 = vmul.f32 %v1520_v43, %v4756_v7  ;;  %v5018_v3 = vpop.xlane.xlu1 %1769  ;;  %v1639_v43 = vstv %s3911_s6  ;;  %v1540_v56 = vsel %vm359_vm9, %v1538_v44, %v1539_v63  ;;  %s3919_s6 = sld [smem:[#allocation6 + $0x2f]] }
 0x2c4   :  { %v5011_v47 = vpop.xlane.xlu0 %1871  ;;  %v1541_v13 = vrot.slane %v1526_v42, 2  ;;  %v1920_v42 = vlaneseq }
 0x2c5   :  { %6523 = vst [vmem:[#allocation45_spill] sm:$0xff] %v5011_v47  ;;  %v1533_v47 = vrot.slane %v1521_v28, 2  ;;  %v1613_v28 = vrot.slane %v1601_v36, 2  ;;  %v5046_v36 = vmul.f32 %v1639_v43, %v4683_v31 }
 0x2c6   :  { %1545 = vrot.lane.b32.xlu0 %v1537_v59, %s4146_s30  ;;  %1440 = vrot.lane.b32.xlu1 %v1432_v18, %s4147_s5  ;;  %v1602_v59 = vmul.f32 %v1600_v1, %v4647_v21  ;;  %v5032_v18 = vpop.xlane.xlu1 %1797  ;;  %v1542_v33 = vsel %vm359_vm9, %v1539_v63, %v1541_v13 }
 0x2c7   :  { %v1535_v14 = vsel %vm359_vm9, %v1533_v47, %v1534_v30  ;;  %v1580_v30 = vrot.slane %v1565_v52, 2 }
 0x2c8   :  { %v5023_v23 = vpop.xlane.xlu0 %1787  ;;  %v1614_v48 = vrot.slane %v1602_v59, 2  ;;  %v1640_v59 = vmul.f32 %v1639_v43, %v4676_v60 }
 0x2ca   :  { %1582 = vrot.lane.b32.xlu0 %v1574_v37, %s4146_s30  ;;  %1442 = vrot.lane.b32.xlu1 %v1435_v32, %s4147_s5  ;;  %v1564_v37 = vmul.f32 %v1559_v9, %v4705_v34  ;;  %v1562_v32 = vmul.f32 %v1559_v9, %v4703_v19  ;;  %v1615_v47 = vsel %vm359_vm9, %v1613_v28, %v1614_v48  ;;  %v5051_v13 = vpop.xlane.xlu1 %1833  ;;  %s3935_s15 = spop %3934 }
 0x2cb   :  { %v1603_v28 = vmul.f32 %v1600_v1, %v4748_v20 }
 0x2cc   :  { %v5034_v17 = vpop.xlane.xlu0 %1809  ;;  %v1578_v31 = vrot.slane %v1564_v37, 2 }
 0x2cd   :  { %6524 = vst [vmem:[#allocation46_spill] sm:$0xff] %v5034_v17  ;;  %v5056_v17 = vshrl.u32 %v1920_v42, 7 }
 0x2ce   :  { %1549 = vrot.lane.b32.xlu0 %v1542_v33, %s4146_s30  ;;  %1543 = vrot.lane.b32.xlu1 %v1535_v14, %s4146_s30  ;;  %v1563_v33 = vmul.f32 %v1559_v9, %v4738_v6  ;;  %v1921_v14 = vand.u32 127, %v1920_v42  ;;  %v1581_v9 = vsel %vm359_vm9, %v1578_v31, %v1580_v30  ;;  %v1652_v42 = vrot.slane %v1640_v59, 2 }
 0x2cf   :  { %6526 = vst [vmem:[#allocation48_spill] sm:$0xff] %v5056_v17  ;;  %v6527_v30 = vrot.slane %v5046_v36, 2 }
 0x2d0   :  { %v5043_v21 = vpop.xlane.xlu0 %1851  ;;  %v1577_v52 = vrot.slane %v1563_v33, 2  ;;  %v5068_v37 = vsub.s32 %v1921_v14, %v5056_v17  ;;  %v1604_v33 = vmul.f32 %v1600_v1, %v4654_v16 }
 0x2d1   :  { %6525 = vst [vmem:[#allocation47_spill] sm:$0xff] %v5043_v21  ;;  %v1575_v21 = vrot.slane %v1562_v32, 2  ;;  %v1605_v32 = vmul.f32 %v1600_v1, %v4672_v10 }
 0x2d2   :  { %1623 = vrot.lane.b32.xlu0 %v1615_v47, %s4147_s5  ;;  %1547 = vrot.lane.b32.xlu1 %v1540_v56, %s4146_s30  ;;  %v1606_v47 = vmul.f32 %v1600_v1, %v4756_v7  ;;  %v5071_v56 = vpop.xlane.xlu1 %1861  ;;  %v1579_v59 = vsel %vm359_vm9, %v1577_v52, %v1578_v31  ;;  %v2001_v17 = vrot.slane %v4863_v8, %v5068_v37 }
 0x2d3   :  { %v1576_v44 = vsel %vm359_vm9, %v1573_v11, %v1575_v21  ;;  %v1654_v21 = vsel %vm359_vm9, %v1652_v42, %v6527_v30  ;;  %v1616_v11 = vrot.slane %v1603_v28, 2  ;;  %v1993_v28 = vrot.slane %v4709_v0, %v5068_v37 }
 0x2d4   :  { %v5058_v5 = vpop.xlane.xlu0 %1873  ;;  %v1621_v14 = vrot.slane %v1606_v47, 2  ;;  %v1619_v42 = vrot.slane %v1605_v32, 2  ;;  %v1644_v1 = vmul.f32 %v1639_v43, %v4705_v34  ;;  %v2005_v8 = vrot.slane %v4883_v53, %v5068_v37 }
 0x2d5   :  { %v1617_v31 = vsel %vm359_vm9, %v1614_v48, %v1616_v11  ;;  %v2009_v0 = vrot.slane %v4896_v12, %v5068_v37  ;;  %v1643_v48 = vmul.f32 %v1639_v43, %v4738_v6  ;;  %v2013_v11 = vrot.slane %v4934_v45, %v5068_v37 }
 0x2d6   :  { %1588 = vrot.lane.b32.xlu0 %v1581_v9, %s4146_s30  ;;  %1584 = vrot.lane.b32.xlu1 %v1576_v44, %s4146_s30  ;;  %v1997_v9 = vrot.slane %v4765_v25, %v5068_v37  ;;  %v1645_v44 = vmul.f32 %v1639_v43, %v4759_v49  ;;  %v1618_v25 = vrot.slane %v1604_v33, 2  ;;  %v1622_v47 = vsel %vm359_vm9, %v1619_v42, %v1621_v14  ;;  %v1786_v32 = vpop.xlane.xlu1 %1785 }
 0x2d7   :  { %v1658_v33 = vrot.slane %v1644_v1, 2  ;;  %v1642_v53 = vmul.f32 %v1639_v43, %v4703_v19  ;;  %v2021_v14 = vrot.slane %v1786_v32, %v5068_v37  ;;  %v1894_v43 = vmul.f32 0.0078125, %v4763_v40 }
 0x2d8   :  { %v5073_v63 = vpop.xlane.xlu0 %1801  ;;  %v2088_v52 = vsel %vm967_vm0, %v1997_v9, %v1993_v28  ;;  %v2017_v9 = vrot.slane %v4980_v51, %v5068_v37  ;;  %v1657_v51 = vrot.slane %v1643_v48, 2  ;;  %v1977_v40 = vrot.slane %v4865_v27, %v5068_v37 }
 0x2d9   :  { %v1981_v48 = vrot.slane %v4918_v55, %v5068_v37 }
 0x2da   :  { %1662 = vrot.lane.b32.xlu0 %v1654_v21, %s4147_s5  ;;  %1586 = vrot.lane.b32.xlu1 %v1579_v59, %s4146_s30  ;;  %v1660_v21 = vrot.slane %v1645_v44, 2  ;;  %v2089_v59 = vsel %vm955_vm1, %v2001_v17, %v2088_v52  ;;  %v1620_v44 = vsel %vm359_vm9, %v1618_v25, %v1619_v42  ;;  %v1655_v52 = vrot.slane %v1642_v53, 2 }
 0x2db   :  { %v2090_v12 = vsel %vm957_vm2, %v2005_v8, %v2089_v59  ;;  %v1969_v42 = vrot.slane %v4707_v38, %v5068_v37  ;;  %v1893_v25 = vmul.f32 0.0078125, %v4780_v35  ;;  %v1800_v8 = vpop.xlane.xlu1 %1799  ;;  %v1895_v59 = vmul.f32 0.0078125, %v4879_v15 }
 0x2dc   :  { %v5090_v30 = vpop.xlane.xlu0 %1811  ;;  %v1661_v28 = vsel %vm359_vm9, %v1658_v33, %v1660_v21  ;;  %v2091_v45 = vsel %vm959_vm3, %v2009_v0, %v2090_v12  ;;  %v6528_v0 = vrot.slane %v5046_v36, 2  ;;  %v1659_v27 = vsel %vm359_vm9, %v1657_v51, %v1658_v33 }
 0x2dd   :  { %v2092_v1 = vsel %vm961_vm4, %v2013_v11, %v2091_v45  ;;  %v2264_v15 = vrot.slane %v1894_v43, %v5068_v37  ;;  %v2029_v36 = vrot.slane %v4890_v22, %v5068_v37  ;;  %v5151_v11 = vrot.slane %v4869_v58, %v5068_v37 }
 0x2de   :  { %1629 = vrot.lane.b32.xlu0 %v1622_v47, %s4147_s5  ;;  %1625 = vrot.lane.b32.xlu1 %v1617_v31, %s4147_s5  ;;  %v5116_v31 = vrot.slane %v4761_v24, %v5068_v37  ;;  %v1973_v24 = vrot.slane %v4871_v50, %v5068_v37  ;;  %v2093_v21 = vsel %vm963_vm5, %v2017_v9, %v2092_v1  ;;  %v1896_v50 = vmul.f32 0.0078125, %v4894_v39 }
 0x2df   :  { %v1656_v32 = vsel %vm359_vm9, %v6528_v0, %v1655_v52  ;;  %v2094_v38 = vsel %vm965_vm6, %v2021_v14, %v2093_v21  ;;  %v1985_v39 = vrot.slane %v4908_v61, %v5068_v37  ;;  %v2260_v55 = vrot.slane %v1893_v25, %v5068_v37 }
 0x2e0   :  { %v5108_v17 = vpop.xlane.xlu0 %1865  ;;  %v2082_v35 = vsel %vm955_vm1, %v1969_v42, %v5116_v31  ;;  %v2033_v9 = vrot.slane %v4924_v2, %v5068_v37  ;;  %v1989_v33 = vrot.slane %v5018_v3, %v5068_v37  ;;  %v2268_v12 = vrot.slane %v1895_v59, %v5068_v37 }
 0x2e1   :  { %v2083_v53 = vsel %vm957_vm2, %v1973_v24, %v2082_v35  ;;  %v2037_v58 = vrot.slane %v4914_v54, %v5068_v37  ;;  %v5167_v61 = vrot.slane %v5023_v23, %v5068_v37  ;;  %v2272_v14 = vrot.slane %v1896_v50, %v5068_v37 }
 0x2e2   :  { %1627 = vrot.lane.b32.xlu1 %v1620_v44, %s4147_s5  ;;  %1668 = vrot.lane.b32.xlu0 %v1661_v28, %s4147_s5  ;;  %v2084_v22 = vsel %vm959_vm3, %v1977_v40, %v2083_v53  ;;  %v1897_v2 = vmul.f32 0.0078125, %v4902_v26  ;;  %v2041_v3 = vrot.slane %v5032_v18, %v5068_v37  ;;  %v1850_v28 = vpop.xlane.xlu1 %1849  ;;  %v2095_v54 = vsel %vm955_vm1, %v2029_v36, %v5151_v11  ;;  %v6530_v53 = vld [vmem:[#allocation39_spill] sm:$0xff] }
 0x2e3   :  { %v2085_v44 = vsel %vm961_vm4, %v1981_v48, %v2084_v22  ;;  %v1898_v51 = vmul.f32 0.0078125, %v4926_v62  ;;  %v2045_v43 = vrot.slane %v1800_v8, %v5068_v37  ;;  %v2096_v26 = vsel %vm957_vm2, %v2033_v9, %v2095_v54 }
 0x2e4   :  { %v5128_v47 = vpop.xlane.xlu0 %1875  ;;  %v2086_v23 = vsel %vm963_vm5, %v1985_v39, %v2085_v44  ;;  %v1899_v1 = vmul.f32 0.0078125, %v4998_v4  ;;  %v2049_v18 = vrot.slane %v5073_v63, %v5068_v37  ;;  %v2097_v42 = vsel %vm959_vm3, %v2037_v58, %v2096_v26 }
 0x2e5   :  { %v2087_v52 = vsel %vm965_vm6, %v1989_v33, %v2086_v23  ;;  %v1900_v25 = vmul.f32 0.0078125, %v1850_v28  ;;  %v1886_v8 = vmul.f32 0.0078125, %v4769_v41  ;;  %v2276_v21 = vrot.slane %v1897_v2, %v5068_v37 }
 0x2e6   :  { %1664 = vrot.lane.b32.xlu1 %v1656_v32, %s4147_s5  ;;  %2122 = vrot.lane.b32.xlu0 %v2094_v38, %s4148_s7  ;;  %v2112_v62 = vsel %vm155_vm7, %v5167_v61, %v2087_v52  ;;  %v2098_v4 = vsel %vm961_vm4, %v2041_v3, %v2097_v42  ;;  %v1887_v63 = vmul.f32 0.0078125, %v4774_v46  ;;  %v2355_v59 = vsel %vm967_vm0, %v2264_v15, %v2260_v55  ;;  %v6529_v15 = vld [vmem:[#allocation36_spill] sm:$0xff]  ;;  %v1864_v52 = vpop.xlane.xlu1 %1863 }
 0x2e7   :  { %v2280_v40 = vrot.slane %v1898_v51, %v5068_v37  ;;  %v2099_v0 = vsel %vm963_vm5, %v2045_v43, %v2098_v4  ;;  %v1888_v32 = vmul.f32 0.0078125, %v4875_v57  ;;  %v2356_v41 = vsel %vm955_vm1, %v2268_v12, %v2355_v59  ;;  %v6533_v4 = vld [vmem:[#allocation28_spill] sm:$0xff]  ;;  %v6534_v59 = vld [vmem:[#allocation38_spill] sm:$0xff] }
 0x2e8   :  { %v1820_v45 = vpop.xlane.xlu0 %1819  ;;  %v2284_v35 = vrot.slane %v1899_v1, %v5068_v37  ;;  %v2100_v50 = vsel %vm965_vm6, %v2049_v18, %v2099_v0  ;;  %v1889_v48 = vmul.f32 0.0078125, %v4873_v29  ;;  %v2288_v46 = vrot.slane %v1900_v25, %v5068_v37  ;;  %v6535_v0 = vld [vmem:[#allocation34_spill] sm:$0xff] }
 0x2e9   :  { %v5188_v24 = vrot.slane %v1820_v45, %v5068_v37  ;;  %v1890_v36 = vmul.f32 0.0078125, %v6529_v15  ;;  %v5215_v57 = vrot.slane %v1886_v8, %v5068_v37  ;;  %v2236_v55 = vrot.slane %v1887_v63, %v5068_v37 }
 0x2ea   :  { %1666 = vrot.lane.b32.xlu1 %v1659_v27, %s4147_s5  ;;  %2140 = vrot.lane.b32.xlu0 %v2094_v38, %s4145_s2  ;;  %v1891_v29 = vmul.f32 0.0078125, %v6530_v53  ;;  %v2240_v33 = vrot.slane %v1888_v32, %v5068_v37  ;;  %v1892_v12 = vmul.f32 0.0078125, %v5051_v13  ;;  %v2244_v58 = vrot.slane %v1889_v48, %v5068_v37  ;;  %v5250_v42 = vpop.permute.xlu1 %1220  ;;  %v6538_v48 = vld [vmem:[#allocation40_spill] sm:$0xff] }
 0x2eb   :  { %v2113_v27 = vsel %vm155_vm7, %v5188_v24, %v2100_v50  ;;  %v2248_v3 = vrot.slane %v1890_v36, %v5068_v37  ;;  %v2349_v28 = vsel %vm955_vm1, %v2236_v55, %v5215_v57  ;;  %v1902_v63 = vmul.f32 0.0078125, %v6533_v4  ;;  %v6537_v50 = vld [vmem:[#allocation43_spill] sm:$0xff] }
 0x2ec   :  { %v2252_v45 = vrot.slane %v1891_v29, %v5068_v37  ;;  %v2350_v13 = vsel %vm957_vm2, %v2240_v33, %v2349_v28  ;;  %v2256_v54 = vrot.slane %v1892_v12, %v5068_v37  ;;  %v1878_v25 = vpop.xlane.xlu0 %1877  ;;  %v2057_v32 = vrot.slane %v6535_v0, %v5068_v37  ;;  %v6540_v0 = vld [vmem:[#allocation41_spill] sm:$0xff] }
 0x2ed   :  { %v2351_v23 = vsel %vm959_vm3, %v2244_v58, %v2350_v13  ;;  %v2069_v55 = vrot.slane %v5090_v30, %v5068_v37  ;;  %v1907_v12 = vmul.f32 0.0078125, %v1864_v52 }
 0x2ee   :  { %2158 = vrot.lane.b32.xlu0 %v2094_v38, %s4149_s8  ;;  %2120 = vrot.lane.b32.xlu1 %v2112_v62, %s4148_s7  ;;  %v2357_v38 = vsel %vm957_vm2, %v2272_v14, %v2356_v41  ;;  %v6531_v14 = vld [vmem:[#allocation47_spill] sm:$0xff]  ;;  %v2352_v43 = vsel %vm961_vm4, %v2248_v3, %v2351_v23  ;;  %v6536_v41 = vld [vmem:[#allocation37_spill] sm:$0xff] }
 0x2ef   :  { %v2358_v39 = vsel %vm959_vm3, %v2276_v21, %v2357_v38  ;;  %v1901_v44 = vmul.f32 0.0078125, %v6531_v14  ;;  %v2353_v26 = vsel %vm963_vm5, %v2252_v45, %v2352_v43  ;;  %v2061_v38 = vrot.slane %v6537_v50, %v5068_v37 }
 0x2f0   :  { %v2359_v9 = vsel %vm961_vm4, %v2280_v40, %v2358_v39  ;;  %v2354_v1 = vsel %vm965_vm6, %v2256_v54, %v2353_v26  ;;  %v2053_v40 = vrot.slane %v6534_v59, %v5068_v37  ;;  %v1906_v39 = vmul.f32 0.0078125, %v5071_v56  ;;  %v1884_v53 = vpop.xlane.xlu0 %1883 }
 0x2f1   :  { %v2360_v22 = vsel %vm963_vm5, %v2284_v35, %v2359_v9  ;;  %v5236_v51 = vrot.slane %v1901_v44, %v5068_v37  ;;  %v1904_v35 = vmul.f32 0.0078125, %v6536_v41  ;;  %v5269_v9 = vrot.slane %v1902_v63, %v5068_v37  ;;  %v6541_v41 = vld [vmem:[#allocation35_spill] sm:$0xff] }
 0x2f2   :  { %2138 = vrot.lane.b32.xlu1 %v2112_v62, %s4145_s2  ;;  %2144 = vrot.lane.b32.xlu0 %v2113_v27, %s4145_s2  ;;  %v2361_v2 = vsel %vm965_vm6, %v2288_v46, %v2360_v22  ;;  %v1905_v46 = vmul.f32 0.0078125, %v6538_v48  ;;  %v2101_v33 = vsel %vm967_vm0, %v2057_v32, %v2053_v40  ;;  %v1908_v44 = vmul.f32 0.0078125, %v5108_v17 }
 0x2f3   :  { %v2379_v18 = vsel %vm155_vm7, %v5236_v51, %v2354_v1  ;;  %v2300_v58 = vrot.slane %v1904_v35, %v5068_v37  ;;  %v2102_v14 = vsel %vm955_vm1, %v2061_v38, %v2101_v33  ;;  %v1917_v3 = vmul.f32 0.0078125, %v1884_v53  ;;  %v6542_v38 = vld [vmem:[#allocation45_spill] sm:$0xff] }
 0x2f4   :  { %v2304_v30 = vrot.slane %v1905_v46, %v5068_v37  ;;  %v2308_v28 = vrot.slane %v1906_v39, %v5068_v37  ;;  %v2312_v23 = vrot.slane %v1907_v12, %v5068_v37  ;;  %v2316_v1 = vrot.slane %v1908_v44, %v5068_v37  ;;  %v5297_v63 = vpop.permute.xlu0 %1319 }
 0x2f5   :  { %v1910_v32 = vmul.f32 0.0078125, %v6540_v0  ;;  %v1909_v35 = vmul.f32 0.0078125, %v6541_v41  ;;  %v1911_v48 = vmul.f32 0.0078125, %v6542_v38  ;;  %v6546_v38 = vld [vmem:[#allocation15_spill] sm:$0xff] }
 0x2f6   :  { %2156 = vrot.lane.b32.xlu1 %v2112_v62, %s4149_s8  ;;  %2389 = vrot.lane.b32.xlu0 %v2361_v2, %s4148_s7  ;;  %v6532_v62 = vld [vmem:[#allocation32_spill] sm:$0xff] }
 0x2f7   :  { %v1903_v8 = vmul.f32 0.0078125, %v6532_v62  ;;  %v5291_v62 = vrot.slane %v1917_v3, %v5068_v37  ;;  %v2320_v39 = vrot.slane %v1909_v35, %v5068_v37  ;;  %v6545_v35 = vld [vmem:[#allocation17_spill] sm:$0xff] }
 0x2f8   :  { %v5314_v53 = vpop.permute.xlu0 %1321 }
 0x2f9   :  { %v2296_v36 = vrot.slane %v1903_v8, %v5068_v37 }
 0x2fa   :  { %2407 = vrot.lane.b32.xlu0 %v2361_v2, %s4145_s2  ;;  %2126 = vrot.lane.b32.xlu1 %v2113_v27, %s4148_s7 }
 0x2fb   :  { %v2362_v54 = vsel %vm955_vm1, %v2296_v36, %v5269_v9  ;;  %v2324_v36 = vrot.slane %v1910_v32, %v5068_v37 }
 0x2fc   :  { %v2363_v26 = vsel %vm957_vm2, %v2300_v58, %v2362_v54  ;;  %v1117_v54 = vstv %s3895_s9  ;;  %s3912_s9 = sld [smem:[#allocation7 + $0x2]] }
 0x2fd   :  { %v2364_v52 = vsel %vm959_vm3, %v2304_v30, %v2363_v26  ;;  %v2368_v12 = vsel %vm967_vm0, %v2324_v36, %v2320_v39  ;;  %v1108_v26 = vstv %s3894_s10  ;;  %v1121_v32 = vmul.f32 %v1117_v54, %v4705_v34  ;;  %v6547_v36 = vld [vmem:[#allocation21_spill] sm:$0xff]  ;;  %s3913_s10 = sld [smem:[#allocation7 + $0x3]] }
 0x2fe   :  { %2423 = vrot.lane.b32.xlu0 %v2379_v18, %s4149_s8  ;;  %2387 = vrot.lane.b32.xlu1 %v2379_v18, %s4148_s7 }
 0x302   :  { %2405 = vrot.lane.b32.xlu1 %v2379_v18, %s4145_s2 }
 0x306   :  { %2162 = vrot.lane.b32.xlu1 %v2113_v27, %s4149_s8  ;;  %v6539_v27 = vld [vmem:[#allocation46_spill] sm:$0xff] }
 0x307   :  { %v2065_v15 = vrot.slane %v6539_v27, %v5068_v37  ;;  %v1912_v27 = vmul.f32 0.0078125, %v5058_v5 }
 0x309   :  { %v2332_v5 = vrot.slane %v1912_v27, %v5068_v37  ;;  %v1232_v27 = vstv %s3900_s11  ;;  %s6184_s11 = sld [smem:[#allocation7]] }
 0x30a   :  { %2425 = vrot.lane.b32.xlu1 %v2361_v2, %s4149_s8  ;;  %v2103_v2 = vsel %vm957_vm2, %v2065_v15, %v2102_v14  ;;  %v1913_v15 = vmul.f32 0.0078125, %v5128_v47 }
 0x30b   :  { %v2104_v45 = vsel %vm959_vm3, %v2069_v55, %v2103_v2  ;;  %v1914_v55 = vmul.f32 0.0078125, %v1878_v25 }
 0x30c   :  { %v2336_v47 = vrot.slane %v1913_v15, %v5068_v37 }
 0x30d   :  { %v2340_v25 = vrot.slane %v1914_v55, %v5068_v37 }
 0x312   :  { %v1814_v21 = vpop.xlane.xlu1 %1813 }
 0x313   :  { %v2073_v22 = vrot.slane %v1814_v21, %v5068_v37  ;;  %v2365_v21 = vsel %vm961_vm4, %v2308_v28, %v2364_v52 }
 0x314   :  { %v2366_v59 = vsel %vm963_vm5, %v2312_v23, %v2365_v21  ;;  %v2114_v21 = vsel %vm155_vm7, %v5167_v61, %v5116_v31  ;;  %v1112_v31 = vmul.f32 %v1108_v26, %v4672_v10 }
 0x315   :  { %v2105_v43 = vsel %vm961_vm4, %v2073_v22, %v2104_v45  ;;  %v2367_v40 = vsel %vm965_vm6, %v2316_v1, %v2366_v59  ;;  %v6543_v1 = vld [vmem:[#allocation14_spill] sm:$0xff]  ;;  %v6544_v59 = vld [vmem:[#allocation16_spill] sm:$0xff] }
 0x316   :  { %v1816_v29 = vpop.xlane.xlu1 %1815  ;;  %v2380_v50 = vsel %vm155_vm7, %v5291_v62, %v2367_v40  ;;  %v1119_v40 = vmul.f32 %v1117_v54, %v6544_v59  ;;  %v1233_v61 = vmul.f32 %v1232_v27, %v6543_v1 }
 0x317   :  { %v2077_v56 = vrot.slane %v1816_v29, %v5068_v37  ;;  %v2328_v29 = vrot.slane %v1911_v48, %v5068_v37  ;;  %v1110_v48 = vmul.f32 %v1108_v26, %v6546_v38 }
 0x319   :  { %v2106_v18 = vsel %vm963_vm5, %v2077_v56, %v2105_v43  ;;  %v2369_v14 = vsel %vm955_vm1, %v2328_v29, %v2368_v12  ;;  %v1123_v15 = vadd.f32 %v1119_v40, %v1110_v48  ;;  %v1111_v29 = vmul.f32 %v1108_v26, %v4654_v16 }
 0x31a   :  { %v1818_v13 = vpop.xlane.xlu1 %1817  ;;  %v2370_v30 = vsel %vm957_vm2, %v2332_v5, %v2369_v14  ;;  %v1125_v5 = vadd.f32 %v1121_v32, %v1112_v31  ;;  %v1263_v12 = vstv %s3901_s12  ;;  %v1120_v14 = vmul.f32 %v1117_v54, %v4738_v6  ;;  %v6554_v31 = vld [vmem:[#allocation29_spill] sm:$0xff]  ;;  %s6189_s12 = sld [smem:[#allocation7 + $0x1]] }
 0x31b   :  { %v2081_v17 = vrot.slane %v1818_v13, %v5068_v37  ;;  %v2371_v2 = vsel %vm959_vm3, %v2336_v47, %v2370_v30  ;;  %v1234_v47 = vmul.f32 %v1232_v27, %v6546_v38  ;;  %v1264_v40 = vmul.f32 %v1263_v12, %v4676_v60 }
 0x31c   :  { %v2372_v13 = vsel %vm961_vm4, %v2340_v25, %v2371_v2  ;;  %v2381_v2 = vsel %vm155_vm7, %v5236_v51, %v5215_v57  ;;  %v1237_v57 = vmul.f32 %v1232_v27, %v4672_v10  ;;  %v1238_v51 = vmul.f32 %v1232_v27, %v4756_v7 }
 0x31d   :  { %v2107_v8 = vsel %vm965_vm6, %v2081_v17, %v2106_v18  ;;  %v1109_v18 = vmul.f32 %v1108_v26, %v6543_v1  ;;  %v6551_v26 = vld [vmem:[#allocation20_spill] sm:$0xff] }
 0x31e   :  { %v1882_v4 = vpop.xlane.xlu1 %1881  ;;  %2128 = vrot.lane.b32.xlu0 %v2107_v8, %s4148_s7  ;;  %2146 = vrot.lane.b32.xlu1 %v2107_v8, %s4145_s2 }
 0x31f   :  { %v1916_v22 = vmul.f32 0.0078125, %v1882_v4 }
 0x321   :  { %v2348_v28 = vrot.slane %v1916_v22, %v5068_v37  ;;  %v6548_v22 = vld [vmem:[#allocation18_spill] sm:$0xff] }
 0x322   :  { %v5306_v46 = vpop.permute.xlu1 %1323  ;;  %2411 = vrot.lane.b32.xlu1 %v2380_v50, %s4145_s2  ;;  %2393 = vrot.lane.b32.xlu0 %v2380_v50, %s4148_s7 }
 0x326   :  { %v5317_v33 = vpop.permute.xlu1 %1358  ;;  %2429 = vrot.lane.b32.xlu1 %v2380_v50, %s4149_s8  ;;  %2164 = vrot.lane.b32.xlu0 %v2107_v8, %s4149_s8 }
 0x329   :  { %v1880_v58 = vpop.xlane.xlu0 %1879 }
 0x32a   :  { %v1915_v44 = vmul.f32 0.0078125, %v1880_v58  ;;  %v5326_v56 = vpop.permute.xlu1 %1360  ;;  %v1150_v58 = vadd.f32 %v6548_v22, %v1123_v15  ;;  %v5396_v15 = vsel %vm155_vm7, %v5188_v24, %v5151_v11  ;;  %v1236_v24 = vmul.f32 %v1232_v27, %v4654_v16 }
 0x32c   :  { %v2344_v3 = vrot.slane %v1915_v44, %v5068_v37  ;;  %v1118_v37 = vmul.f32 %v1117_v54, %v4676_v60  ;;  %v6549_v44 = vld [vmem:[#allocation23_spill] sm:$0xff]  ;;  %v6552_v54 = vld [vmem:[#allocation30_spill] sm:$0xff] }
 0x32d   :  { %v5332_v45 = vpop.permute.xlu0 %1325 }
 0x32e   :  { %v5335_v23 = vpop.permute.xlu1 %1362  ;;  %v2373_v43 = vsel %vm963_vm5, %v2344_v3, %v2372_v13  ;;  %v1122_v4 = vadd.f32 %v1118_v37, %v1109_v18  ;;  %v1245_v3 = vrot.slane %v1233_v61, 1  ;;  %v1265_v13 = vmul.f32 %v1263_v12, %v6544_v59 }
 0x32f   :  { %v2374_v17 = vsel %vm965_vm6, %v2348_v28, %v2373_v43  ;;  %v1235_v28 = vmul.f32 %v1232_v27, %v4748_v20  ;;  %v6550_v43 = vld [vmem:[#allocation22_spill] sm:$0xff]  ;;  %v1152_v18 = vadd.f32 %v6551_v26, %v1125_v5  ;;  %v6558_v26 = vld [vmem:[#allocation27_spill] sm:$0xff]  ;;  %v6559_v27 = vld [vmem:[#allocation33_spill] sm:$0xff] }
 0x330   :  { %2413 = vrot.lane.b32.xlu1 %v2374_v17, %s4145_s2  ;;  %2395 = vrot.lane.b32.xlu0 %v2374_v17, %s4148_s7  ;;  %v1149_v50 = vadd.f32 %v6545_v35, %v1122_v4  ;;  %v1246_v4 = vrot.slane %v1234_v47, 1  ;;  %v1124_v35 = vadd.f32 %v1120_v14, %v1111_v29  ;;  %v1277_v5 = vrot.slane %v1265_v13, 1  ;;  %v6555_v29 = vld [vmem:[#allocation19_spill] sm:$0xff] }
 0x331   :  { %v5343_v52 = vpop.permute.xlu0 %1438  ;;  %v1177_v61 = vadd.f32 %v6554_v31, %v1152_v18  ;;  %v1266_v47 = vmul.f32 %v1263_v12, %v4703_v19  ;;  %v6556_v14 = vld [vmem:[#allocation31_spill] sm:$0xff]  ;;  %v1269_v13 = vmul.f32 %v1263_v12, %v4759_v49 }
 0x332   :  { %v5345_v8 = vpop.permute.xlu1 %1399  ;;  %v1174_v39 = vadd.f32 %v6547_v36, %v1149_v50  ;;  %v6553_v50 = vld [vmem:[#allocation24_spill] sm:$0xff]  ;;  %v1247_v36 = vsel %vm258_vm8, %v1245_v3, %v1246_v4  ;;  %v1151_v22 = vadd.f32 %v6555_v29, %v1124_v35  ;;  %v1253_v3 = vrot.slane %v1238_v51, 1  ;;  %v6560_v29 = vld [vmem:[#allocation42_spill] sm:$0xff] }
 0x333   :  { %v1279_v31 = vrot.slane %v1266_v47, 1 }
 0x334   :  { %2124 = vrot.lane.b32.xlu1 %v2114_v21, %s4148_s7  ;;  %2431 = vrot.lane.b32.xlu0 %v2374_v17, %s4149_s8  ;;  %v1201_v30 = vadd.f32 %v6549_v44, %v1174_v39  ;;  %v1175_v17 = vadd.f32 %v6550_v43, %v1150_v58  ;;  %v1248_v39 = vrot.slane %v1235_v28, 1  ;;  %v1276_v28 = vrot.slane %v1264_v40, 1 }
 0x335   :  { %v5353_v0 = vpop.permute.xlu0 %1405 }
 0x336   :  { %v5356_v41 = vpop.permute.xlu1 %1401  ;;  %v1226_v37 = vadd.f32 %v6552_v54, %v1201_v30  ;;  %v1202_v48 = vadd.f32 %v6553_v50, %v1175_v17  ;;  %v6557_v30 = vld [vmem:[#allocation44_spill] sm:$0xff]  ;;  %v1249_v54 = vsel %vm258_vm8, %v1246_v4, %v1248_v39  ;;  %v1278_v35 = vsel %vm258_vm8, %v1276_v28, %v1277_v5 }
 0x337   :  { %v1204_v43 = vadd.f32 %v6557_v30, %v1177_v61  ;;  %v1268_v50 = vmul.f32 %v1263_v12, %v4705_v34  ;;  %v1456_v28 = vstv %s5408_s13 }
 0x338   :  { %2160 = vrot.lane.b32.xlu1 %v2114_v21, %s4149_s8  ;;  %2142 = vrot.lane.b32.xlu0 %v2114_v21, %s4145_s2  ;;  %v1259_v58 = vadd.f32 %v1247_v36, %v1226_v37  ;;  %v1227_v44 = vadd.f32 %v6556_v14, %v1202_v48  ;;  %v1251_v37 = vrot.slane %v1237_v57, 1  ;;  %v1267_v57 = vmul.f32 %v1263_v12, %v4738_v6 }
 0x339   :  { %v5365_v55 = vpop.permute.xlu0 %1444  ;;  %v1229_v18 = vadd.f32 %v5250_v42, %v1204_v43  ;;  %v1250_v42 = vrot.slane %v1236_v24, 1  ;;  %v1284_v36 = vrot.slane %v1269_v13, 1 }
 0x33a   :  { %v5369_v25 = vpop.permute.xlu1 %1364  ;;  %v1260_v40 = vadd.f32 %v1249_v54, %v1227_v44  ;;  %v1290_v48 = vadd.f32 %v1278_v35, %v1259_v58  ;;  %v1254_v4 = vsel %vm258_vm8, %v1251_v37, %v1253_v3  ;;  %v1280_v58 = vsel %vm258_vm8, %v1277_v5, %v1279_v31 }
 0x33b   :  { %v1262_v14 = vadd.f32 %v1254_v4, %v1229_v18  ;;  %v1282_v44 = vrot.slane %v1268_v50, 1  ;;  %v1252_v3 = vsel %vm258_vm8, %v1250_v42, %v1251_v37  ;;  %v1281_v12 = vrot.slane %v1267_v57, 1 }
 0x33c   :  { %2409 = vrot.lane.b32.xlu1 %v2381_v2, %s4145_s2  ;;  %2391 = vrot.lane.b32.xlu0 %v2381_v2, %s4148_s7  ;;  %v1331_v30 = vadd.f32 %v5297_v63, %v1290_v48  ;;  %v1291_v47 = vadd.f32 %v1280_v58, %v1260_v40  ;;  %v1458_v35 = vmul.f32 %v1456_v28, %v6546_v38 }
 0x33d   :  { %v5384_v21 = vpop.permute.xlu0 %1545  ;;  %v1285_v13 = vsel %vm258_vm8, %v1282_v44, %v1284_v36 }
 0x33e   :  { %v5389_v32 = vpop.permute.xlu1 %1403  ;;  %v1370_v43 = vadd.f32 %v5317_v33, %v1331_v30  ;;  %v1332_v63 = vadd.f32 %v5314_v53, %v1291_v47  ;;  %v1293_v54 = vadd.f32 %v1285_v13, %v1262_v14  ;;  %v1459_v33 = vmul.f32 %v1456_v28, %v4748_v20 }
 0x33f   :  { %v465_v30 = vstv %s3935_s15  ;;  %s3932_s15 = sld [smem:[#allocation7 + $0x4]] }
 0x340   :  { %2130 = vrot.lane.b32.xlu1 %v5396_v15, %s4148_s7  ;;  %2427 = vrot.lane.b32.xlu0 %v2381_v2, %s4149_s8  ;;  %v1176_v2 = vadd.f32 %v6558_v26, %v1151_v22  ;;  %v1457_v26 = vmul.f32 %v1456_v28, %v6543_v1  ;;  %v1411_v5 = vadd.f32 %v5345_v8, %v1370_v43 }
 0x341   :  { %v5406_v11 = vpop.permute.xlu0 %1582  ;;  %v1371_v50 = vadd.f32 %v5326_v56, %v1332_v63  ;;  %v1334_v37 = vadd.f32 %v5332_v45, %v1293_v54  ;;  %v1283_v1 = vsel %vm258_vm8, %v1281_v12, %v1282_v44  ;;  %v1470_v56 = vrot.slane %v1458_v35, 2 }
 0x342   :  { %v1441_v17 = vpop.permute.xlu1 %1440  ;;  %v1203_v51 = vadd.f32 %v6559_v27, %v1176_v2  ;;  %v1487_v27 = vstv %s3907_s14  ;;  %v1469_v40 = vrot.slane %v1457_v26, 2  ;;  %v1450_v8 = vadd.f32 %v5343_v52, %v1411_v5 }
 0x343   :  { %v1489_v48 = vmul.f32 %v1487_v27, %v6544_v59  ;;  %v1412_v38 = vadd.f32 %v5356_v41, %v1371_v50  ;;  %v1373_v20 = vadd.f32 %v5369_v25, %v1334_v37  ;;  %v1472_v45 = vrot.slane %v1459_v33, 2  ;;  %v6561_v37 = vld [vmem:[#allocation26_spill] sm:$0xff] }
 0x344   :  { %2148 = vrot.lane.b32.xlu0 %v5396_v15, %s4145_s2  ;;  %v1228_v22 = vadd.f32 %v6560_v29, %v1203_v51  ;;  %v1488_v42 = vmul.f32 %v1487_v27, %v4676_v60  ;;  %v1490_v4 = vmul.f32 %v1487_v27, %v4703_v19  ;;  %v1462_v59 = vmul.f32 %v1456_v28, %v4756_v7 }
 0x345   :  { %v5420_v61 = vpop.permute.xlu0 %1549  ;;  %v1451_v36 = vadd.f32 %v1441_v17, %v1412_v38  ;;  %v1460_v29 = vmul.f32 %v1456_v28, %v4654_v16  ;;  %v1461_v52 = vmul.f32 %v1456_v28, %v4672_v10  ;;  %v1471_v41 = vsel %vm359_vm9, %v1469_v40, %v1470_v56 }
 0x346   :  { %v5424_v39 = vpop.permute.xlu1 %1442  ;;  %v1261_v18 = vadd.f32 %v1252_v3, %v1228_v22  ;;  %v1501_v25 = vrot.slane %v1489_v48, 2  ;;  %v1414_v19 = vadd.f32 %v5353_v0, %v1373_v20  ;;  %v1483_v58 = vadd.f32 %v1471_v41, %v1450_v8 }
 0x347   :  { %v1500_v17 = vrot.slane %v1488_v42, 2  ;;  %v1503_v7 = vrot.slane %v1490_v4, 2  ;;  %v1477_v47 = vrot.slane %v1462_v59, 2  ;;  %v1474_v43 = vrot.slane %v1460_v29, 2 }
 0x348   :  { %v1292_v31 = vadd.f32 %v1283_v1, %v1261_v18  ;;  %v467_v28 = vmul.f32 0.00048828125, %v465_v30  ;;  %v1493_v3 = vmul.f32 %v1487_v27, %v4759_v49  ;;  %v1453_v0 = vadd.f32 %v5365_v55, %v1414_v19  ;;  %v6563_v1 = vld [vmem:[#allocation25_spill] sm:$0xff] }
 0x349   :  { %v5431_v24 = vpop.permute.xlu0 %1623  ;;  %v1502_v12 = vsel %vm359_vm9, %v1500_v17, %v1501_v25  ;;  %v1475_v26 = vrot.slane %v1461_v52, 2  ;;  %v1504_v54 = vsel %vm359_vm9, %v1501_v25, %v1503_v7 }
 0x34a   :  { %v1544_v2 = vpop.permute.xlu1 %1543  ;;  %v1333_v57 = vadd.f32 %v5306_v46, %v1292_v31  ;;  %v1473_v46 = vsel %vm359_vm9, %v1470_v56, %v1472_v45  ;;  %v1514_v63 = vadd.f32 %v1502_v12, %v1483_v58  ;;  %v5477_v55 = vsub.f32 %v6563_v1, %v467_v28 }
 0x34b   :  { %v1484_v44 = vadd.f32 %v1473_v46, %v1451_v36  ;;  %v1478_v5 = vsel %vm359_vm9, %v1475_v26, %v1477_v47  ;;  %v1476_v35 = vsel %vm359_vm9, %v1474_v43, %v1475_v26  ;;  %v1508_v40 = vrot.slane %v1493_v3, 2 }
 0x34c   :  { %v1372_v60 = vadd.f32 %v5335_v23, %v1333_v57  ;;  %v1491_v23 = vmul.f32 %v1487_v27, %v4738_v6  ;;  %v1555_v49 = vadd.f32 %v1544_v2, %v1514_v63  ;;  %v5474_v6 = vsub.f32 %v6561_v37, %v467_v28  ;;  %6564 = vst [vmem:[#allocation39_spill] sm:$0xff] %v5477_v55 }
 0x34d   :  { %v5442_v51 = vpop.permute.xlu0 %1588  ;;  %v1515_v33 = vadd.f32 %v1504_v54, %v1484_v44  ;;  %v1486_v31 = vadd.f32 %v1478_v5, %v1453_v0  ;;  %v471_v56 = vmul.f32 %v5477_v55, %v5477_v55  ;;  %v5510_v3 = vstv %s3924_s16  ;;  %s3933_s16 = sld [smem:[#allocation7 + $0x5]] }
 0x34e   :  { %v5446_v53 = vpop.permute.xlu1 %1547  ;;  %v1413_v16 = vadd.f32 %v5389_v32, %v1372_v60  ;;  %v1492_v32 = vmul.f32 %v1487_v27, %v4705_v34  ;;  %6562 = vst [vmem:[#allocation36_spill] sm:$0xff] %v5474_v6  ;;  %v1594_v8 = vadd.f32 %v5406_v11, %v1555_v49  ;;  %v470_v2 = vmul.f32 %v5474_v6, %v5474_v6 }
 0x34f   :  { %v1556_v38 = vadd.f32 %v5384_v21, %v1515_v33  ;;  %v5512_v12 = vstv %s3928_s17  ;;  %v5522_v26 = vstv %s3926_s22  ;;  %v5545_v33 = vsel %vm155_vm7, %v5291_v62, %v5269_v9  ;;  %s4151_s17 = smov [#allocation9]  }
 0x350   :  { %v1452_v18 = vadd.f32 %v5424_v39, %v1413_v16  ;;  %v1505_v39 = vrot.slane %v1491_v23, 2  ;;  %v1506_v27 = vrot.slane %v1492_v32, 2  ;;  %v1635_v11 = vadd.f32 %v5431_v24, %v1594_v8 }
 0x351   :  { %v5456_v22 = vpop.permute.xlu0 %1662  ;;  %v472_v25 = vadd.f32 %v471_v56, %v470_v2  ;;  %v5514_v23 = vstv %s3930_s20  ;;  %s3862_s20 = sshll.u32 %s4151_s17, 4  ;;  %s3863_s20 = int_to_ptr.vmem [resolvable:$true] %s3862_s20 }
 0x352   :  { %v1585_v14 = vpop.permute.xlu1 %1584  ;;  %v1485_v34 = vadd.f32 %v1476_v35, %v1452_v18  ;;  %v1509_v45 = vsel %vm359_vm9, %v1506_v27, %v1508_v40  ;;  %v1507_v42 = vsel %vm359_vm9, %v1505_v39, %v1506_v27  ;;  %v5494_v46 = vadd.f32 %v5456_v22, %v1635_v11  ;;  %p4117_p2 = scmp.lt.s32.totalorder %s3863_s20, %s3863_s20 }
 0x353   :  { %v1517_v57 = vadd.f32 %v1509_v45, %v1486_v31  ;;  %v1595_v59 = vadd.f32 %v1585_v14, %v1556_v38  ;;  %v5591_v11 = vstv %s5525_s1 }
 0x354   :  { %v1516_v36 = vadd.f32 %v1507_v42, %v1485_v34  ;;  %6566 = vst [vmem:[#allocation32_spill] sm:$0xff] %v5494_v46 }
 0x355   :  { %v1630_v10 = vpop.permute.xlu0 %1629  ;;  %v1558_v30 = vadd.f32 %v5420_v61, %v1517_v57 }
 0x356   :  { %v1587_v13 = vpop.permute.xlu1 %1586  ;;  %v1557_v29 = vadd.f32 %v5446_v53, %v1516_v36 }
 0x357   :  { %v1597_v58 = vadd.f32 %v5442_v51, %v1558_v30 }
 0x358   :  { %v1596_v60 = vadd.f32 %v1587_v13, %v1557_v29  ;;  %v5516_v13 = vstv %s3920_s21  ;;  %s4112_s21 = scalar_lea.vmem %s3863_s20, 4096 }
 0x359   :  { %v1669_v50 = vpop.permute.xlu0 %1668  ;;  %v1638_v24 = vadd.f32 %v1630_v10, %v1597_v58  ;;  %p4113_p1 = scmp.ne.s32.totalorder %s3863_s20, %s4112_s21  ;;  %p4118_p3 = scmp.lt.s32.totalorder %s4112_s21, %s4112_s21 }
 0x35a   :  { %v1626_v48 = vpop.permute.xlu1 %1625 }
 0x35b   :  { %v1636_v21 = vadd.f32 %v1626_v48, %v1595_v59  ;;  %v5500_v61 = vadd.f32 %v1669_v50, %v1638_v24  ;;  %p4119_p4 = por %p4118_p3, %p4117_p2 }
 0x35d   :  { %v2123_v20 = vpop.permute.xlu0 %2122  ;;  %6568 = vst [vmem:[#allocation38_spill] sm:$0xff] %v5500_v61  ;;  %p4120_p5 = pnand %p4119_p4, %p4113_p1 }
 0x35e   :  { %v1628_v4 = vpop.permute.xlu1 %1627 }
 0x35f   :  { %v1637_v14 = vadd.f32 %v1628_v4, %v1596_v60 }
 0x361   :  { %v2141_v52 = vpop.permute.xlu0 %2140 }
 0x362   :  { %v1665_v41 = vpop.permute.xlu1 %1664  ;;  %v2175_v47 = vsel %vm166_vm10, %v2123_v20, %v2141_v52 }
 0x363   :  { %v5490_v19 = vadd.f32 %v1665_v41, %v1636_v21 }
 0x364   :  { %473 = vadd.xlane.f32.xlu1 %v472_v25  ;;  %v5601_v25 = vstv %s3915_s23 }
 0x365   :  { %6565 = vst [vmem:[#allocation47_spill] sm:$0xff] %v5490_v19  ;;  %v1680_v17 = vadd.f32 %v5490_v19, %v5494_v46  ;;  %v2159_v7 = vpop.permute.xlu0 %2158 }
 0x366   :  { %v1667_v53 = vpop.permute.xlu1 %1666  ;;  %v5508_v10 = vsel %vm2180_vm11, %v2175_v47, %v2159_v7 }
 0x367   :  { %v5498_v16 = vadd.f32 %v1667_v53, %v1637_v14  ;;  %v5520_v0 = vmul.f32 %v5510_v3, %v5508_v10  ;;  %v5529_v32 = vmul.f32 %v5512_v12, %v5508_v10  ;;  %v5533_v54 = vmul.f32 %v5514_v23, %v5508_v10 }
 0x368   :  { %v5540_v49 = vmul.f32 %v5516_v13, %v5508_v10  ;;  %v5551_v37 = vmul.f32 %v5522_v26, %v5508_v10  ;;  %v5607_v14 = vstv %s3914_s24 }
 0x369   :  { %6567 = vst [vmem:[#allocation28_spill] sm:$0xff] %v5498_v16  ;;  %v1681_v51 = vadd.f32 %v1680_v17, %v5498_v16  ;;  %v5505_v43 = vpop.permute.xlu0 %2144  ;;  %v6455_v1 = vrot.slane %v5520_v0, 1  ;;  %v6460_v31 = vrot.slane %v5529_v32, 2  ;;  %v6452_v34 = vrot.slane %v5533_v54, 2 }
 0x36a   :  { %v2121_v22 = vpop.permute.xlu1 %2120  ;;  %v6459_v38 = vrot.slane %v5540_v49, 1  ;;  %v6458_v45 = vrot.slane %v5551_v37, 2 }
 0x36b   :  { %v1682_v44 = vadd.f32 %v1681_v51, %v5500_v61 }
 0x36d   :  { %1683 = vadd.xlane.f32.xlu0 %v1682_v44  ;;  %v2390_v5 = vpop.permute.xlu0 %2389 }
 0x36e   :  { %v2139_v28 = vpop.permute.xlu1 %2138 }
 0x36f   :  { %v2174_v18 = vsel %vm166_vm10, %v2121_v22, %v2139_v28  ;;  %v5620_v22 = vstv %s3925_s25 }
 0x371   :  { %v2408_v4 = vpop.permute.xlu0 %2407 }
 0x372   :  { %v2157_v63 = vpop.permute.xlu1 %2156 }
 0x373   :  { %v5536_v35 = vsel %vm2180_vm11, %v2174_v18, %v2157_v63  ;;  %v5628_v18 = vstv %s3931_s26  ;;  %v5630_v63 = vstv %s3921_s0 }
 0x374   :  { %v2868_v50 = vmul.f32 %v5512_v12, %v5536_v35  ;;  %v2724_v40 = vmul.f32 %v5510_v3, %v5536_v35  ;;  %v2580_v39 = vmul.f32 %v5516_v13, %v5536_v35  ;;  %v2948_v9 = vmul.f32 %v5514_v23, %v5536_v35 }
 0x375   :  { %2397 = vrot.lane.b32.xlu1 %v5545_v33, %s4148_s7  ;;  %v2804_v27 = vmul.f32 %v5522_v26, %v5536_v35  ;;  %v2476_v52 = vmul.f32 %v5591_v11, %v5536_v35  ;;  %v2424_v30 = vpop.permute.xlu0 %2423  ;;  %v2456_v53 = vmul.f32 %v5607_v14, %v5536_v35  ;;  %s3923_s7 = sld [smem:[#allocation6 + $0x31]] }
 0x376   :  { %v2127_v62 = vpop.permute.xlu1 %2126  ;;  %v2880_v48 = vrot.slane %v2868_v50, 2  ;;  %v2736_v8 = vrot.slane %v2724_v40, 1  ;;  %v2592_v20 = vrot.slane %v2580_v39, 1  ;;  %v2960_v2 = vrot.slane %v2948_v9, 2 }
 0x377   :  { %v2816_v42 = vrot.slane %v2804_v27, 2  ;;  %v2177_v17 = vsel %vm166_vm10, %v2127_v62, %v5505_v43  ;;  %v2442_v43 = vsel %vm166_vm10, %v2390_v5, %v2408_v4  ;;  %v5638_v39 = vstv %s3927_s27 }
 0x378   :  { %v5570_v56 = vsel %vm359_vm9, %v2880_v48, %v6460_v31  ;;  %v5578_v57 = vsel %vm258_vm8, %v2736_v8, %v6455_v1  ;;  %v5583_v36 = vsel %vm258_vm8, %v2592_v20, %v6459_v38  ;;  %v5588_v59 = vsel %vm359_vm9, %v2960_v2, %v6452_v34 }
 0x379   :  { %2415 = vrot.lane.b32.xlu1 %v5545_v33, %s4145_s2  ;;  %6569 = vst [vmem:[#allocation34_spill] sm:$0xff] %v5583_v36  ;;  %6570 = vst [vmem:[#allocation37_spill] sm:$0xff] %v5588_v59  ;;  %v5596_v21 = vsel %vm359_vm9, %v2816_v42, %v6458_v45  ;;  %s3929_s2 = sld [smem:[#allocation6 + $0x34]]  ;;  %v5645_v62 = vstv %s3917_s28  ;;  %v2477_v5 = vmul.f32 %v5591_v11, %v5508_v10  ;;  %v5770_v31 = vstv %s3922_s4 }
 0x37a   :  { %v2388_v29 = vpop.permute.xlu1 %2387  ;;  %6571 = vst [vmem:[#allocation43_spill] sm:$0xff] %v5596_v21  ;;  %v2457_v20 = vmul.f32 %v5607_v14, %v5508_v10 }
 0x37d   :  { %2484 = vrot.lane.b32.xlu1 %v2476_v52, %s4146_s30 }
 0x37e   :  { %v2406_v41 = vpop.permute.xlu1 %2405 }
 0x37f   :  { %v2441_v60 = vsel %vm166_vm10, %v2388_v29, %v2406_v41  ;;  %v5622_v44 = vstv %s3929_s2 }
 0x380   :  { %v5605_v58 = vsel %vm2180_vm11, %v2441_v60, %v2424_v30 }
 0x381   :  { %v2465_v24 = vmul.f32 %v5601_v25, %v5605_v58  ;;  %v2907_v40 = vmul.f32 %v5622_v44, %v5605_v58  ;;  %v2987_v48 = vmul.f32 %v5628_v18, %v5605_v58  ;;  %v2835_v29 = vmul.f32 %v5638_v39, %v5605_v58 }
 0x382   :  { %v2163_v7 = vpop.permute.xlu1 %2162 }
 0x383   :  { %v5616_v51 = vsel %vm2180_vm11, %v2177_v17, %v2163_v7  ;;  %2166 = vrot.lane.b32.xlu0 %v5396_v15, %s4149_s8  ;;  %v5624_v47 = vadd.f32 %v2465_v24, %v2456_v53  ;;  %v2763_v15 = vmul.f32 %v5620_v22, %v5605_v58  ;;  %v2919_v30 = vrot.slane %v2907_v40, 2 }
 0x384   :  { %v2478_v28 = vmul.f32 %v5591_v11, %v5616_v51  ;;  %v2999_v7 = vrot.slane %v2987_v48, 2  ;;  %v2501_v40 = vmul.f32 %v5645_v62, %v5605_v58 }
 0x385   :  { %v2775_v41 = vrot.slane %v2763_v15, 1 }
 0x386   :  { %v2426_v50 = vpop.permute.xlu1 %2425  ;;  %2488 = vrot.lane.b32.xlu1 %v2478_v28, %s4146_s30 }
 0x387   :  { %v5641_v9 = vsel %vm2180_vm11, %v2442_v43, %v2426_v50  ;;  %2433 = vrot.lane.b32.xlu0 %v5545_v33, %s4149_s8  ;;  %v2611_v33 = vmul.f32 %v5630_v63, %v5605_v58 }
 0x388   :  { %v2502_v27 = vmul.f32 %v5645_v62, %v5641_v9  ;;  %v5655_v8 = vmul.f32 %v5620_v22, %v5641_v9  ;;  %v5663_v2 = vmul.f32 %v5622_v44, %v5641_v9  ;;  %v5667_v42 = vmul.f32 %v5628_v18, %v5641_v9 }
 0x389   :  { %v2466_v4 = vmul.f32 %v5601_v25, %v5641_v9  ;;  %v5677_v60 = vmul.f32 %v5630_v63, %v5641_v9  ;;  %v2623_v43 = vrot.slane %v2611_v33, 1  ;;  %v5692_v15 = vmul.f32 %v5638_v39, %v5641_v9 }
 0x38a   :  { %2511 = vrot.lane.b32.xlu1 %v2502_v27, %s4146_s30  ;;  %v6454_v52 = vrot.slane %v5655_v8, 1  ;;  %v6453_v53 = vrot.slane %v5663_v2, 2  ;;  %v6451_v24 = vrot.slane %v5667_v42, 2  ;;  %v2847_v33 = vrot.slane %v2835_v29, 2 }
 0x38b   :  { %2486 = vrot.lane.b32.xlu0 %v2477_v5, %s4146_s30  ;;  %v5682_v17 = vadd.f32 %v2466_v4, %v2457_v20  ;;  %v6457_v50 = vrot.slane %v5677_v60, 1  ;;  %v6456_v20 = vrot.slane %v5692_v15, 2 }
 0x38c   :  { %v5687_v28 = vsel %vm258_vm8, %v2775_v41, %v6454_v52  ;;  %v5699_v5 = vsel %vm359_vm9, %v2919_v30, %v6453_v53  ;;  %v5704_v48 = vsel %vm359_vm9, %v2999_v7, %v6451_v24 }
 0x38d   :  { %6572 = vst [vmem:[#allocation40_spill] sm:$0xff] %v5704_v48  ;;  %v5709_v27 = vsel %vm258_vm8, %v2623_v43, %v6457_v50  ;;  %v5716_v30 = vsel %vm359_vm9, %v2847_v33, %v6456_v20  ;;  %v5730_v20 = vstv %s3918_s29 }
 0x38e   :  { %6573 = vst [vmem:[#allocation46_spill] sm:$0xff] %v5709_v27  ;;  %6574 = vst [vmem:[#allocation41_spill] sm:$0xff] %v5716_v30  ;;  %v2530_v50 = vmul.f32 %v5730_v20, %v5616_v51 }
 0x38f   :  { %2509 = vrot.lane.b32.xlu0 %v2501_v40, %s4146_s30 }
 0x390   :  { %v2147_v4 = vpop.permute.xlu1 %2146  ;;  %v2129_v41 = vpop.permute.xlu0 %2128 }
 0x391   :  { %v2178_v34 = vsel %vm166_vm10, %v2129_v41, %v2147_v4 }
 0x394   :  { %v2412_v7 = vpop.permute.xlu1 %2411  ;;  %v2394_v24 = vpop.permute.xlu0 %2393 }
 0x395   :  { %v2444_v43 = vsel %vm166_vm10, %v2394_v24, %v2412_v7 }
 0x398   :  { %v2430_v53 = vpop.permute.xlu1 %2429  ;;  %v2165_v52 = vpop.permute.xlu0 %2164 }
 0x399   :  { %v5721_v29 = vsel %vm2180_vm11, %v2444_v43, %v2430_v53  ;;  %v5724_v40 = vsel %vm2180_vm11, %v2178_v34, %v2165_v52  ;;  %v2529_v53 = vmul.f32 %v5730_v20, %v5508_v10  ;;  %v2528_v34 = vmul.f32 %v5730_v20, %v5536_v35 }
 0x39a   :  { %v2503_v1 = vmul.f32 %v5645_v62, %v5721_v29  ;;  %v2479_v33 = vmul.f32 %v5591_v11, %v5724_v40  ;;  %v2583_v52 = vmul.f32 %v5516_v13, %v5616_v51  ;;  %v2458_v11 = vmul.f32 %v5607_v14, %v5616_v51 }
 0x39b   :  { %v2467_v24 = vmul.f32 %v5601_v25, %v5721_v29  ;;  %v5750_v4 = vmul.f32 %v5516_v13, %v5724_v40  ;;  %v5756_v7 = vmul.f32 %v5522_v26, %v5724_v40  ;;  %v2531_v19 = vmul.f32 %v5730_v20, %v5724_v40 }
 0x39c   :  { %2513 = vrot.lane.b32.xlu1 %v2503_v1, %s4146_s30  ;;  %2490 = vrot.lane.b32.xlu0 %v2479_v33, %s4146_s30  ;;  %v2807_v1 = vmul.f32 %v5522_v26, %v5616_v51  ;;  %v2597_v45 = vrot.slane %v2583_v52, 1 }
 0x39d   :  { %v5752_v41 = vadd.f32 %v2467_v24, %v2458_v11  ;;  %v5768_v24 = vstv %s3919_s6 }
 0x39e   :  { %v2821_v38 = vrot.slane %v2807_v1, 2 }
 0x3a0   :  { %2538 = vrot.lane.b32.xlu1 %v2529_v53, %s4147_s5  ;;  %2536 = vrot.lane.b32.xlu0 %v2528_v34, %s4147_s5  ;;  %v6463_v53 = vrot.slane %v5750_v4, 1  ;;  %v6464_v34 = vrot.slane %v5756_v7, 2 }
 0x3a2   :  { %v2414_v43 = vpop.permute.xlu1 %2413  ;;  %v2396_v33 = vpop.permute.xlu0 %2395  ;;  %v5766_v11 = vsel %vm258_vm8, %v2597_v45, %v6463_v53  ;;  %v5775_v52 = vsel %vm359_vm9, %v2821_v38, %v6464_v34  ;;  %v2644_v45 = vmul.f32 %v5770_v31, %v5536_v35  ;;  %v2459_v34 = vmul.f32 %v5607_v14, %v5724_v40 }
 0x3a3   :  { %6575 = vst [vmem:[#allocation35_spill] sm:$0xff] %v5775_v52  ;;  %v2445_v1 = vsel %vm166_vm10, %v2396_v33, %v2414_v43  ;;  %v2614_v43 = vmul.f32 %v5630_v63, %v5721_v29  ;;  %v5792_v33 = vmul.f32 %v5770_v31, %v5508_v10  ;;  %v2553_v10 = vmul.f32 %v5768_v24, %v5605_v58 }
 0x3a4   :  { %2540 = vrot.lane.b32.xlu1 %v2530_v50, %s4147_s5  ;;  %v2554_v50 = vmul.f32 %v5768_v24, %v5641_v9  ;;  %v2656_v30 = vrot.slane %v2644_v45, 1  ;;  %v2838_v52 = vmul.f32 %v5638_v39, %v5721_v29 }
 0x3a5   :  { %v2628_v61 = vrot.slane %v2614_v43, 1  ;;  %v2657_v45 = vrot.slane %v5792_v33, 1 }
 0x3a6   :  { %v2125_v6 = vpop.permute.xlu1 %2124  ;;  %v2432_v55 = vpop.permute.xlu0 %2431  ;;  %v2852_v46 = vrot.slane %v2838_v52, 2 }
 0x3a7   :  { %v5783_v53 = vsel %vm2180_vm11, %v2445_v1, %v2432_v55  ;;  %v2658_v33 = vsel %vm258_vm8, %v2656_v30, %v2657_v45 }
 0x3a8   :  { %2563 = vrot.lane.b32.xlu1 %v2554_v50, %s4147_s5  ;;  %v2504_v38 = vmul.f32 %v5645_v62, %v5783_v53  ;;  %v2468_v35 = vmul.f32 %v5601_v25, %v5783_v53  ;;  %v5800_v55 = vmul.f32 %v5630_v63, %v5783_v53  ;;  %v2555_v50 = vmul.f32 %v5768_v24, %v5721_v29 }
 0x3a9   :  { %v5810_v25 = vmul.f32 %v5770_v31, %v5724_v40 }
 0x3aa   :  { %v2161_v1 = vpop.permute.xlu1 %2160  ;;  %2515 = vrot.lane.b32.xlu0 %v2504_v38, %s4146_s30  ;;  %v2143_v62 = vpop.permute.xlu0 %2142  ;;  %v5812_v21 = vadd.f32 %v2468_v35, %v2459_v34  ;;  %v6469_v16 = vrot.slane %v5800_v55, 1  ;;  %v2647_v34 = vmul.f32 %v5770_v31, %v5616_v51 }
 0x3ab   :  { %v2176_v14 = vsel %vm166_vm10, %v2125_v6, %v2143_v62  ;;  %v5823_v6 = vmul.f32 %v5638_v39, %v5783_v53 }
 0x3ac   :  { %v5817_v38 = vsel %vm2180_vm11, %v2176_v14, %v2161_v1  ;;  %2565 = vrot.lane.b32.xlu1 %v2555_v50, %s4147_s5  ;;  %v5829_v1 = vstv %s3923_s7  ;;  %v5838_v14 = vsel %vm258_vm8, %v2628_v61, %v6469_v16  ;;  %v2661_v16 = vrot.slane %v2647_v34, 1 }
 0x3ad   :  { %v2870_v43 = vmul.f32 %v5512_v12, %v5817_v38  ;;  %v2582_v50 = vmul.f32 %v5516_v13, %v5817_v38  ;;  %v2806_v27 = vmul.f32 %v5522_v26, %v5817_v38  ;;  %v2853_v36 = vrot.slane %v5823_v6, 2 }
 0x3ae   :  { %v2410_v35 = vpop.permute.xlu1 %2409  ;;  %2561 = vrot.lane.b32.xlu0 %v2553_v10, %s4147_s5  ;;  %v2392_v62 = vpop.permute.xlu0 %2391  ;;  %v2684_v30 = vmul.f32 %v5829_v1, %v5641_v9  ;;  %v2646_v20 = vmul.f32 %v5770_v31, %v5817_v38 }
 0x3af   :  { %v2883_v48 = vrot.slane %v2870_v43, 2  ;;  %v2595_v59 = vrot.slane %v2582_v50, 1  ;;  %v2443_v61 = vsel %vm166_vm10, %v2392_v62, %v2410_v35  ;;  %v6576_v43 = vrot.slane %v5529_v32, 2 }
 0x3b0   :  { %2666 = vrot.lane.b32.xlu1 %v2658_v33, %s4146_s30  ;;  %v6577_v33 = vrot.slane %v5540_v49, 1  ;;  %v2819_v34 = vrot.slane %v2806_v27, 2  ;;  %v5867_v9 = vsel %vm359_vm9, %v2852_v46, %v2853_v36  ;;  %v2556_v49 = vmul.f32 %v5768_v24, %v5783_v53 }
 0x3b1   :  { %v5857_v50 = vsel %vm359_vm9, %v6576_v43, %v2883_v48  ;;  %v5882_v48 = vmul.f32 %v5829_v1, %v5783_v53  ;;  %v2659_v46 = vrot.slane %v2646_v20, 1  ;;  %v6579_v62 = vrot.slane %v5551_v37, 2 }
 0x3b2   :  { %2542 = vrot.lane.b32.xlu0 %v2531_v19, %s4147_s5  ;;  %v2428_v52 = vpop.permute.xlu0 %2427  ;;  %v5862_v10 = vsel %vm258_vm8, %v6577_v33, %v2595_v59  ;;  %v6578_v19 = vrot.slane %v5810_v25, 1  ;;  %v2696_v24 = vrot.slane %v2684_v30, 1  ;;  %v2686_v43 = vmul.f32 %v5829_v1, %v5721_v29 }
 0x3b3   :  { %v5870_v35 = vsel %vm2180_vm11, %v2443_v61, %v2428_v52  ;;  %v2683_v20 = vmul.f32 %v5829_v1, %v5605_v58  ;;  %v2660_v30 = vsel %vm258_vm8, %v2657_v45, %v2659_v46  ;;  %v6581_v58 = vrot.slane %v5692_v15, 2 }
 0x3b4   :  { %v2663_v32 = vsel %vm258_vm8, %v2661_v16, %v6578_v19  ;;  %v2685_v59 = vmul.f32 %v5829_v1, %v5870_v35  ;;  %v2613_v27 = vmul.f32 %v5630_v63, %v5870_v35  ;;  %v5889_v16 = vsel %vm359_vm9, %v6579_v62, %v2819_v34 }
 0x3b5   :  { %2670 = vrot.lane.b32.xlu1 %v2663_v32, %s4146_s30  ;;  %v2837_v61 = vmul.f32 %v5638_v39, %v5870_v35  ;;  %v2701_v34 = vrot.slane %v5882_v48, 1  ;;  %v2726_v32 = vmul.f32 %v5510_v3, %v5817_v38  ;;  %v2700_v62 = vrot.slane %v2686_v43, 1 }
 0x3b6   :  { %2567 = vrot.lane.b32.xlu0 %v2556_v49, %s4147_s5  ;;  %v2698_v52 = vrot.slane %v2685_v59, 1  ;;  %v2626_v33 = vrot.slane %v2613_v27, 1  ;;  %v6580_v49 = vrot.slane %v5677_v60, 1  ;;  %v5920_v60 = vmul.f32 %v5510_v3, %v5724_v40 }
 0x3b7   :  { %v2850_v19 = vrot.slane %v2837_v61, 2  ;;  %v2695_v61 = vrot.slane %v2683_v20, 1  ;;  %v2727_v45 = vmul.f32 %v5510_v3, %v5616_v51  ;;  %v6582_v46 = vrot.slane %v5520_v0, 1 }
 0x3b8   :  { %v2699_v37 = vsel %vm258_vm8, %v2696_v24, %v2698_v52  ;;  %v5907_v59 = vsel %vm258_vm8, %v6580_v49, %v2626_v33  ;;  %v2702_v52 = vsel %vm258_vm8, %v2700_v62, %v2701_v34  ;;  %v2742_v20 = vrot.slane %v5920_v60, 1 }
 0x3b9   :  { %2707 = vrot.lane.b32.xlu1 %v2699_v37, %s4146_s30  ;;  %v5912_v27 = vsel %vm359_vm9, %v6581_v58, %v2850_v19  ;;  %v2739_v37 = vrot.slane %v2726_v32, 1  ;;  %v2697_v15 = vsel %vm258_vm8, %v2695_v61, %v2696_v24  ;;  %v2765_v33 = vmul.f32 %v5620_v22, %v5870_v35 }
 0x3ba   :  { %2668 = vrot.lane.b32.xlu0 %v2660_v30, %s4146_s30  ;;  %v2741_v19 = vrot.slane %v2727_v45, 1  ;;  %v5939_v30 = vmul.f32 %v5620_v22, %v5783_v53  ;;  %v2766_v0 = vmul.f32 %v5620_v22, %v5721_v29  ;;  %v6583_v49 = vrot.slane %v5655_v8, 1 }
 0x3bb   :  { %v2740_v43 = vsel %vm258_vm8, %v6582_v46, %v2739_v37  ;;  %v2778_v32 = vrot.slane %v2765_v33, 1  ;;  %v5954_v37 = vmul.f32 %v5512_v12, %v5724_v40  ;;  %v2871_v8 = vmul.f32 %v5512_v12, %v5616_v51 }
 0x3bc   :  { %v2743_v24 = vsel %vm258_vm8, %v2741_v19, %v2742_v20  ;;  %v2781_v62 = vrot.slane %v5939_v30, 1  ;;  %v2780_v61 = vrot.slane %v2766_v0, 1  ;;  %v2909_v45 = vmul.f32 %v5622_v44, %v5870_v35 }
 0x3bd   :  { %2709 = vrot.lane.b32.xlu1 %v2702_v52, %s4146_s30  ;;  %v2779_v58 = vsel %vm258_vm8, %v6583_v49, %v2778_v32  ;;  %v2885_v46 = vrot.slane %v2871_v8, 2  ;;  %v5969_v19 = vmul.f32 %v5622_v44, %v5783_v53  ;;  %v6584_v32 = vrot.slane %v5663_v2, 2 }
 0x3be   :  { %2705 = vrot.lane.b32.xlu0 %v2697_v15, %s4146_s30  ;;  %v2782_v52 = vsel %vm258_vm8, %v2780_v61, %v2781_v62  ;;  %v2886_v15 = vrot.slane %v5954_v37, 2  ;;  %v2922_v33 = vrot.slane %v2909_v45, 2  ;;  %v2950_v49 = vmul.f32 %v5514_v23, %v5817_v38 }
 0x3bf   :  { %v5986_v8 = vmul.f32 %v5514_v23, %v5724_v40  ;;  %v2951_v2 = vmul.f32 %v5514_v23, %v5616_v51  ;;  %v6585_v45 = vrot.slane %v5533_v54, 2  ;;  %v6003_v51 = vmul.f32 %v5628_v18, %v5783_v53 }
 0x3c0   :  { %v2923_v0 = vsel %vm359_vm9, %v6584_v32, %v2922_v33  ;;  %v2990_v54 = vmul.f32 %v5628_v18, %v5721_v29  ;;  %v6586_v32 = vrot.slane %v5667_v42, 2 }
 0x3c1   :  { %2748 = vrot.lane.b32.xlu1 %v2740_v43, %s4147_s5  ;;  %v2887_v43 = vsel %vm359_vm9, %v2885_v46, %v2886_v15  ;;  %v6470_v46 = vrot.slane %v5986_v8, 2  ;;  %v2965_v33 = vrot.slane %v2951_v2, 2 }
 0x3c3   :  { %v2967_v40 = vsel %vm359_vm9, %v2965_v33, %v6470_v46 }
 0x3c5   :  { %2750 = vrot.lane.b32.xlu1 %v2743_v24, %s4147_s5  ;;  %v2910_v24 = vmul.f32 %v5622_v44, %v5721_v29  ;;  %v2149_v29 = vpop.permute.xlu0 %2148 }
 0x3c9   :  { %2787 = vrot.lane.b32.xlu1 %v2779_v58, %s4147_s5  ;;  %v2924_v58 = vrot.slane %v2910_v24, 2 }
 0x3cd   :  { %2789 = vrot.lane.b32.xlu1 %v2782_v52, %s4147_s5  ;;  %v2963_v52 = vrot.slane %v2950_v49, 2  ;;  %v2131_v49 = vpop.permute.xlu1 %2130 }
 0x3cf   :  { %v2964_v38 = vsel %vm359_vm9, %v6585_v45, %v2963_v52 }
 0x3d1   :  { %2890 = vrot.lane.b32.xlu1 %v5570_v56, %s4146_s30  ;;  %v2925_v56 = vrot.slane %v5969_v19, 2 }
 0x3d3   :  { %v2926_v61 = vsel %vm359_vm9, %v2924_v58, %v2925_v56  ;;  %v3004_v58 = vrot.slane %v2990_v54, 2  ;;  %v2179_v54 = vsel %vm166_vm10, %v2131_v49, %v2149_v29 }
 0x3d5   :  { %2894 = vrot.lane.b32.xlu1 %v2887_v43, %s4146_s30  ;;  %v2989_v43 = vmul.f32 %v5628_v18, %v5870_v35 }
 0x3d7   :  { %v3002_v24 = vrot.slane %v2989_v43, 2 }
 0x3d9   :  { %2931 = vrot.lane.b32.xlu1 %v2923_v0, %s4146_s30  ;;  %v3003_v35 = vsel %vm359_vm9, %v6586_v32, %v3002_v24  ;;  %v6471_v0 = vrot.slane %v6003_v51, 2 }
 0x3db   :  { %v3006_v53 = vsel %vm359_vm9, %v3004_v58, %v6471_v0 }
 0x3dd   :  { %2933 = vrot.lane.b32.xlu1 %v2926_v61, %s4146_s30 }
 0x3e1   :  { %2972 = vrot.lane.b32.xlu1 %v2964_v38, %s4147_s5 }
 0x3e5   :  { %2974 = vrot.lane.b32.xlu1 %v2967_v40, %s4147_s5 }
 0x3e9   :  { %3011 = vrot.lane.b32.xlu1 %v3003_v35, %s4147_s5 }
 0x3ed   :  { %v474_v61 = vpop.xlane.xlu1 %473  ;;  %3013 = vrot.lane.b32.xlu1 %v3006_v53, %s4147_s5 }
 0x3ee   :  { %v475_v52 = vrot.slane %v474_v61, 4 }
 0x3f0   :  { %v476_v2 = vadd.f32 %v475_v52, %v474_v61 }
 0x3f1   :  { %v2398_v42 = vpop.permute.xlu1 %2397 }
 0x3f2   :  { %v477_v45 = vrot.slane %v476_v2, 2 }
 0x3f4   :  { %v478_v38 = vadd.f32 %v477_v45, %v476_v2 }
 0x3f5   :  { %v2416_v24 = vpop.permute.xlu1 %2415 }
 0x3f6   :  { %v1684_v43 = vpop.xlane.xlu0 %1683  ;;  %v479_v33 = vrot.slane %v478_v38, 1  ;;  %v2446_v2 = vsel %vm166_vm10, %v2398_v42, %v2416_v24  ;;  %v6588_v24 = vrot.slane %v5750_v4, 1 }
 0x3f7   :  { %v1685_v40 = vrot.slane %v1684_v43, 4 }
 0x3f8   :  { %v480_v32 = vadd.f32 %v479_v33, %v478_v38 }
 0x3f9   :  { %v1686_v35 = vadd.f32 %v1685_v40, %v1684_v43  ;;  %v2485_v45 = vpop.permute.xlu1 %2484  ;;  %v6587_v40 = vrot.slane %v5810_v25, 1 }
 0x3fa   :  { %3936 = vpush %v480_v32  ;;  %v2167_v46 = vpop.permute.xlu0 %2166 }
 0x3fb   :  { %v1687_v58 = vrot.slane %v1686_v35, 2  ;;  %v6019_v0 = vsel %vm2180_vm11, %v2179_v54, %v2167_v46 }
 0x3fc   :  { %v2649_v53 = vmul.f32 %v5770_v31, %v6019_v0  ;;  %v2585_v61 = vmul.f32 %v5516_v13, %v6019_v0  ;;  %v2809_v46 = vmul.f32 %v5522_v26, %v6019_v0  ;;  %v2873_v60 = vmul.f32 %v5512_v12, %v6019_v0 }
 0x3fd   :  { %v1688_v52 = vadd.f32 %v1687_v58, %v1686_v35  ;;  %v2489_v54 = vpop.permute.xlu1 %2488 }
 0x3fe   :  { %v2434_v38 = vpop.permute.xlu0 %2433  ;;  %v2664_v43 = vrot.slane %v2649_v53, 1  ;;  %v2600_v33 = vrot.slane %v2585_v61, 1  ;;  %v2824_v26 = vrot.slane %v2809_v46, 2  ;;  %v6589_v53 = vrot.slane %v5756_v7, 2 }
 0x3ff   :  { %v6027_v49 = vsel %vm2180_vm11, %v2446_v2, %v2434_v38  ;;  %v1689_v29 = vrot.slane %v1688_v52, 1 }
 0x400   :  { %v2665_v31 = vsel %vm258_vm8, %v6587_v40, %v2664_v43  ;;  %v2688_v13 = vmul.f32 %v5829_v1, %v6027_v49  ;;  %v6040_v32 = vsel %vm258_vm8, %v6588_v24, %v2600_v33  ;;  %v2616_v35 = vmul.f32 %v5630_v63, %v6027_v49 }
 0x401   :  { %2672 = vrot.lane.b32.xlu0 %v2665_v31, %s4146_s30  ;;  %v1690_v42 = vadd.f32 %v1689_v29, %v1688_v52  ;;  %v2840_v58 = vmul.f32 %v5638_v39, %v6027_v49  ;;  %v6051_v4 = vsel %vm359_vm9, %v6589_v53, %v2824_v26  ;;  %v6590_v52 = vrot.slane %v5800_v55, 1  ;;  %v2512_v38 = vpop.permute.xlu1 %2511 }
 0x402   :  { %v2703_v25 = vrot.slane %v2688_v13, 1  ;;  %v2631_v1 = vrot.slane %v2616_v35, 1  ;;  %v2487_v2 = vpop.permute.xlu0 %2486  ;;  %v2768_v43 = vmul.f32 %v5620_v22, %v6027_v49  ;;  %v2888_v24 = vrot.slane %v2873_v60, 2 }
 0x403   :  { %3938 = vpush %v1690_v42  ;;  %v2855_v61 = vrot.slane %v2840_v58, 2  ;;  %v2497_v33 = vadd.f32 %v2487_v2, %v5682_v17  ;;  %v2496_v17 = vadd.f32 %v2485_v45, %v5624_v47  ;;  %v2912_v45 = vmul.f32 %v5622_v44, %v6027_v49  ;;  %v6593_v44 = vld [vmem:[#allocation37_spill] sm:$0xff] }
 0x404   :  { %v6056_v63 = vsel %vm258_vm8, %v6590_v52, %v2631_v1  ;;  %v2704_v39 = vsel %vm258_vm8, %v2701_v34, %v2703_v25  ;;  %v2783_v6 = vrot.slane %v2768_v43, 1  ;;  %v2889_v47 = vsel %vm359_vm9, %v2886_v15, %v2888_v24  ;;  %v6592_v15 = vld [vmem:[#allocation46_spill] sm:$0xff] }
 0x405   :  { %2746 = vrot.lane.b32.xlu0 %v5578_v57, %s4147_s5  ;;  %v2729_v57 = vmul.f32 %v5510_v3, %v6019_v0  ;;  %v6066_v7 = vsel %vm359_vm9, %v2853_v36, %v2855_v61  ;;  %v2522_v46 = vadd.f32 %v2512_v38, %v2497_v33  ;;  %v6591_v61 = vld [vmem:[#allocation34_spill] sm:$0xff]  ;;  %v2927_v37 = vrot.slane %v2912_v45, 2 }
 0x406   :  { %v2510_v48 = vpop.permute.xlu0 %2509  ;;  %v2784_v22 = vsel %vm258_vm8, %v2781_v62, %v2783_v6  ;;  %v2992_v6 = vmul.f32 %v5628_v18, %v6027_v49  ;;  %v6596_v18 = vrot.slane %v6003_v51, 2  ;;  %v6600_v51 = vld [vmem:[#allocation38_spill] sm:$0xff] }
 0x407   :  { %v2744_v55 = vrot.slane %v2729_v57, 1  ;;  %v2521_v35 = vadd.f32 %v2510_v48, %v2496_v17  ;;  %v2928_v43 = vsel %vm359_vm9, %v2925_v56, %v2927_v37  ;;  %v6595_v56 = vrot.slane %v5986_v8, 2 }
 0x409   :  { %2711 = vrot.lane.b32.xlu0 %v2704_v39, %s4146_s30  ;;  %v2745_v3 = vsel %vm258_vm8, %v2742_v20, %v2744_v55  ;;  %v2498_v20 = vadd.f32 %v2489_v54, %v5752_v41 }
 0x40d   :  { %2785 = vrot.lane.b32.xlu0 %v5687_v28, %s4147_s5 }
 0x40e   :  { %v2514_v34 = vpop.permute.xlu1 %2513  ;;  %v2491_v36 = vpop.permute.xlu0 %2490 }
 0x40f   :  { %v2523_v30 = vadd.f32 %v2514_v34, %v2498_v20  ;;  %v6598_v20 = vld [vmem:[#allocation47_spill] sm:$0xff] }
 0x411   :  { %2752 = vrot.lane.b32.xlu0 %v2745_v3, %s4147_s5 }
 0x412   :  { %v2539_v29 = vpop.permute.xlu1 %2538  ;;  %v2537_v40 = vpop.permute.xlu0 %2536 }
 0x413   :  { %v2549_v31 = vadd.f32 %v2539_v29, %v2522_v46  ;;  %v2548_v41 = vadd.f32 %v2537_v40, %v2521_v35  ;;  %v6597_v40 = vld [vmem:[#allocation32_spill] sm:$0xff] }
 0x415   :  { %2791 = vrot.lane.b32.xlu0 %v2784_v22, %s4147_s5 }
 0x416   :  { %v2541_v28 = vpop.permute.xlu1 %2540 }
 0x417   :  { %v2550_v26 = vadd.f32 %v2541_v28, %v2523_v30 }
 0x419   :  { %2892 = vrot.lane.b32.xlu0 %v5857_v50, %s4146_s30 }
 0x41a   :  { %v2564_v13 = vpop.permute.xlu1 %2563 }
 0x41b   :  { %v2574_v42 = vadd.f32 %v2564_v13, %v2549_v31  ;;  %v6599_v13 = vld [vmem:[#allocation28_spill] sm:$0xff] }
 0x41c   :  { %v2516_v62 = vpop.permute.xlu0 %2515 }
 0x41d   :  { %v2607_v25 = vadd.f32 %v5862_v10, %v2574_v42  ;;  %2929 = vrot.lane.b32.xlu0 %v5699_v5, %s4146_s30  ;;  %v2499_v5 = vadd.f32 %v2491_v36, %v5812_v21  ;;  %v2953_v21 = vmul.f32 %v5514_v23, %v6019_v0  ;;  %v6594_v36 = vld [vmem:[#allocation40_spill] sm:$0xff]  ;;  %v3007_v0 = vrot.slane %v2992_v6, 2 }
 0x41e   :  { %v2566_v12 = vpop.permute.xlu1 %2565 }
 0x41f   :  { %v2575_v54 = vadd.f32 %v2566_v12, %v2550_v26  ;;  %v2638_v58 = vadd.f32 %v5907_v59, %v2607_v25  ;;  %v2524_v39 = vadd.f32 %v2516_v62, %v2499_v5  ;;  %v2968_v3 = vrot.slane %v2953_v21, 2 }
 0x420   :  { %v2562_v50 = vpop.permute.xlu0 %2561  ;;  %v3008_v49 = vsel %vm359_vm9, %v6596_v18, %v3007_v0 }
 0x421   :  { %v2608_v1 = vadd.f32 %v5766_v11, %v2575_v54  ;;  %v2573_v53 = vadd.f32 %v2562_v50, %v2548_v41  ;;  %2896 = vrot.lane.b32.xlu0 %v2889_v47, %s4146_s30  ;;  %v2969_v23 = vsel %vm359_vm9, %v6595_v56, %v2968_v3 }
 0x422   :  { %v6099_v10 = vpop.permute.xlu1 %2666 }
 0x423   :  { %v2606_v52 = vadd.f32 %v6591_v61, %v2573_v53  ;;  %v2639_v59 = vadd.f32 %v5838_v14, %v2608_v1 }
 0x424   :  { %v2543_v2 = vpop.permute.xlu0 %2542 }
 0x425   :  { %v2637_v57 = vadd.f32 %v6592_v15, %v2606_v52  ;;  %2970 = vrot.lane.b32.xlu0 %v6593_v44, %s4147_s5  ;;  %v2551_v38 = vadd.f32 %v2543_v2, %v2524_v39  ;;  %v6601_v52 = vld [vmem:[#allocation35_spill] sm:$0xff] }
 0x427   :  { %v2671_v11 = vpop.permute.xlu1 %2670 }
 0x428   :  { %v2568_v55 = vpop.permute.xlu0 %2567  ;;  %v2680_v30 = vadd.f32 %v2671_v11, %v2639_v59 }
 0x429   :  { %v2576_v48 = vadd.f32 %v2568_v55, %v2551_v38  ;;  %2935 = vrot.lane.b32.xlu0 %v2928_v43, %s4146_s30 }
 0x42b   :  { %v2609_v14 = vadd.f32 %v6040_v32, %v2576_v48  ;;  %v2708_v34 = vpop.permute.xlu1 %2707  ;;  %s6123_s30 = spop %3936 }
 0x42c   :  { %v2669_v33 = vpop.permute.xlu0 %2668 }
 0x42d   :  { %3009 = vrot.lane.b32.xlu0 %v6594_v36, %s4147_s5  ;;  %v2640_v19 = vadd.f32 %v6056_v63, %v2609_v14  ;;  %v2679_v22 = vadd.f32 %v2669_v33, %v2638_v58 }
 0x42f   :  { %v2710_v29 = vpop.permute.xlu1 %2709  ;;  %v2718_v46 = vadd.f32 %v2708_v34, %v2679_v22  ;;  %v6602_v34 = vld [vmem:[#allocation43_spill] sm:$0xff] }
 0x430   :  { %v2719_v25 = vadd.f32 %v2710_v29, %v2680_v30  ;;  %v2706_v37 = vpop.permute.xlu0 %2705  ;;  %v6603_v29 = vld [vmem:[#allocation41_spill] sm:$0xff] }
 0x431   :  { %2976 = vrot.lane.b32.xlu0 %v2969_v23, %s4147_s5 }
 0x433   :  { %v2749_v32 = vpop.permute.xlu1 %2748 }
 0x434   :  { %s3939_s8 = spop %3938  ;;  %v2759_v42 = vadd.f32 %v2749_v32, %v2718_v46 }
 0x435   :  { %v1692_v28 = vstv %s3939_s8  ;;  %3015 = vrot.lane.b32.xlu0 %v3008_v49, %s4147_s5 }
 0x436   :  { %v1694_v63 = vmul.f32 0.00024414063, %v1692_v28 }
 0x437   :  { %v2751_v8 = vpop.permute.xlu1 %2750 }
 0x438   :  { %v6130_v60 = vsub.f32 %v6597_v40, %v1694_v63  ;;  %v6133_v31 = vsub.f32 %v6598_v20, %v1694_v63  ;;  %v6136_v17 = vsub.f32 %v6599_v13, %v1694_v63  ;;  %v6139_v62 = vsub.f32 %v6600_v51, %v1694_v63 }
 0x439   :  { %v2760_v58 = vadd.f32 %v2751_v8, %v2719_v25 }
 0x43a   :  { %v1699_v24 = vmul.f32 %v6130_v60, %v6130_v60  ;;  %v1700_v35 = vmul.f32 %v6133_v31, %v6133_v31  ;;  %v1701_v41 = vmul.f32 %v6136_v17, %v6136_v17  ;;  %v1702_v47 = vmul.f32 %v6139_v62, %v6139_v62 }
 0x43b   :  { %v2788_v26 = vpop.permute.xlu1 %2787 }
 0x43c   :  { %v2798_v12 = vadd.f32 %v2788_v26, %v2759_v42  ;;  %v1703_v54 = vadd.f32 %v1700_v35, %v1699_v24 }
 0x43e   :  { %v2831_v50 = vadd.f32 %v5889_v16, %v2798_v12  ;;  %v1704_v45 = vadd.f32 %v1703_v54, %v1701_v41  ;;  %v2678_v16 = vadd.f32 %v6099_v10, %v2637_v57 }
 0x43f   :  { %v2790_v1 = vpop.permute.xlu1 %2789 }
 0x440   :  { %v2799_v53 = vadd.f32 %v2790_v1, %v2760_v58  ;;  %v1705_v5 = vadd.f32 %v1704_v45, %v1702_v47  ;;  %v2862_v61 = vadd.f32 %v5912_v27, %v2831_v50  ;;  %v2717_v38 = vadd.f32 %v2706_v37, %v2678_v16 }
 0x442   :  { %v2832_v59 = vadd.f32 %v6601_v52, %v2799_v53  ;;  %1706 = vadd.xlane.f32.xlu1 %v1705_v5 }
 0x443   :  { %v2891_v15 = vpop.permute.xlu1 %2890 }
 0x444   :  { %v2863_v2 = vadd.f32 %v5867_v9, %v2832_v59 }
 0x447   :  { %v2895_v55 = vpop.permute.xlu1 %2894 }
 0x448   :  { %v2904_v42 = vadd.f32 %v2895_v55, %v2863_v2 }
 0x44b   :  { %v2932_v3 = vpop.permute.xlu1 %2931 }
 0x44f   :  { %v2934_v33 = vpop.permute.xlu1 %2933 }
 0x450   :  { %v2943_v35 = vadd.f32 %v2934_v33, %v2904_v42  ;;  %v488_v33 = vstv %s6184_s11 }
 0x453   :  { %v2973_v22 = vpop.permute.xlu1 %2972 }
 0x457   :  { %v2975_v28 = vpop.permute.xlu1 %2974 }
 0x458   :  { %v2984_v25 = vadd.f32 %v2975_v28, %v2943_v35 }
 0x45b   :  { %v3012_v40 = vpop.permute.xlu1 %3011 }
 0x473   :  { %v2673_v39 = vpop.permute.xlu0 %2672 }
 0x474   :  { %v2681_v14 = vadd.f32 %v2673_v39, %v2640_v19 }
 0x477   :  { %v2747_v44 = vpop.permute.xlu0 %2746 }
 0x478   :  { %v2758_v43 = vadd.f32 %v2747_v44, %v2717_v38 }
 0x47b   :  { %v2712_v11 = vpop.permute.xlu0 %2711 }
 0x47c   :  { %v2720_v36 = vadd.f32 %v2712_v11, %v2681_v14 }
 0x47f   :  { %v2786_v21 = vpop.permute.xlu0 %2785 }
 0x480   :  { %v2797_v48 = vadd.f32 %v2786_v21, %v2758_v43 }
 0x482   :  { %v2830_v27 = vadd.f32 %v6602_v34, %v2797_v48  ;;  %v482_v48 = vstv %s6123_s30 }
 0x483   :  { %v2753_v6 = vpop.permute.xlu0 %2752  ;;  %v483_v14 = vmul.f32 0.00048828125, %v482_v48 }
 0x484   :  { %v2861_v9 = vadd.f32 %v6603_v29, %v2830_v27  ;;  %v2761_v56 = vadd.f32 %v2753_v6, %v2720_v36  ;;  %v6179_v6 = vstv %s3912_s9  ;;  %v6182_v29 = vstv %s3913_s10 }
 0x485   :  { %v484_v34 = vadd.f32 1e-05, %v483_v14 }
 0x486   :  { %v2902_v46 = vadd.f32 %v2891_v15, %v2861_v9 }
 0x487   :  { %v2792_v23 = vpop.permute.xlu0 %2791 }
 0x488   :  { %v2800_v0 = vadd.f32 %v2792_v23, %v2761_v56 }
 0x48a   :  { %v2833_v10 = vadd.f32 %v6051_v4, %v2800_v0 }
 0x48b   :  { %v2893_v57 = vpop.permute.xlu0 %2892 }
 0x48c   :  { %v2864_v32 = vadd.f32 %v6066_v7, %v2833_v10  ;;  %v2903_v19 = vadd.f32 %v2893_v57, %v2862_v61  ;;  %v3014_v7 = vpop.permute.xlu1 %3013 }
 0x48d   :  { %v6164_v58 = vadd.f32 %v3014_v7, %v2984_v25 }
 0x48e   :  { %v2942_v8 = vadd.f32 %v2932_v3, %v2903_v19 }
 0x48f   :  { %v2930_v18 = vpop.permute.xlu0 %2929  ;;  %v3031_v5 = vsel %vm3027_vm12, %v6164_v58, 0.0 }
 0x490   :  { %v2983_v13 = vadd.f32 %v2973_v22, %v2942_v8  ;;  %v2941_v30 = vadd.f32 %v2930_v18, %v2902_v46 }
 0x492   :  { %v6158_v4 = vadd.f32 %v3012_v40, %v2983_v13 }
 0x493   :  { %v2897_v49 = vpop.permute.xlu0 %2896 }
 0x494   :  { %v2905_v12 = vadd.f32 %v2897_v49, %v2864_v32  ;;  %v3029_v47 = vsel %vm3027_vm12, %v6158_v4, 0.0  ;;  %v491_v32 = vstv %s6189_s12 }
 0x497   :  { %v2971_v63 = vpop.permute.xlu0 %2970 }
 0x498   :  { %v2982_v51 = vadd.f32 %v2971_v63, %v2941_v30 }
 0x49b   :  { %v2936_v20 = vpop.permute.xlu0 %2935 }
 0x49c   :  { %v2944_v50 = vadd.f32 %v2936_v20, %v2905_v12  ;;  %v6605_v12 = vld [vmem:[#allocation48_spill] sm:$0xff] }
 0x49f   :  { %v3010_v24 = vpop.permute.xlu0 %3009 }
 0x4a0   :  { %v6160_v26 = vadd.f32 %v3010_v24, %v2982_v51  ;;  %v4150_v51 = vmov 1966171168  }
 0x4a1   :  { %v3119_v24 = vunpack.c.l.s4 %v4150_v51 }
 0x4a2   :  { %v3028_v41 = vsel %vm3027_vm12, %v6160_v26, 0.0 }
 0x4a3   :  { %v2977_v54 = vpop.permute.xlu0 %2976  ;;  %v3030_v45 = vadd.f32 %v3029_v47, %v3028_v41  ;;  %v3120_v7 = vunpack.c.0.s8 %v3119_v24 }
 0x4a4   :  { %v2985_v1 = vadd.f32 %v2977_v54, %v2944_v50 }
 0x4a5   :  { %v3032_v52 = vadd.f32 %v3031_v5, %v3030_v45  ;;  %v6202_v41 = vsub.s32 %v3120_v7, %v6605_v12  ;;  %v6212_v45 = vsub.s32 0, %v6605_v12 }
 0x4a7   :  { %v3016_v53 = vpop.permute.xlu0 %3015 }
 0x4a8   :  { %v6170_v61 = vadd.f32 %v3016_v53, %v2985_v1 }
 0x4aa   :  { %v3033_v59 = vsel %vm3027_vm12, %v6170_v61, 0.0 }
 0x4ab   :  { %v3034_v2 = vadd.f32 %v3033_v59, %v3032_v52 }
 0x4ad   :  { %3035 = vadd.xlane.f32.xlu0 %v3034_v2 }
 0x4cb   :  { %v1707_v37 = vpop.xlane.xlu1 %1706 }
 0x4cc   :  { %v1708_v39 = vrot.slane %v1707_v37, 4 }
 0x4ce   :  { %v1709_v15 = vadd.f32 %v1708_v39, %v1707_v37 }
 0x4d0   :  { %v1710_v44 = vrot.slane %v1709_v15, 2 }
 0x4d2   :  { %v1711_v16 = vadd.f32 %v1710_v44, %v1709_v15 }
 0x4d4   :  { %v1712_v11 = vrot.slane %v1711_v16, 1 }
 0x4d6   :  { %v1713_v38 = vadd.f32 %v1712_v11, %v1711_v16 }
 0x4d8   :  { %3940 = vpush %v1713_v38 }
 0x509   :  { %s3941_s5 = spop %3940 }
 0x50a   :  { %v1715_v55 = vstv %s3941_s5 }
 0x50b   :  { %v1716_v43 = vmul.f32 0.00024414063, %v1715_v55 }
 0x50d   :  { %v1717_v21 = vadd.f32 1e-05, %v1716_v43 }
 0x50f   :  { %3958 = vrsqrt.f32 %v1717_v21 }
 0x510   :  { %3960 = vrsqrt.f32 %v484_v34 }
 0x51c   :  { %v6175_v27 = vpop.eup %3958 }
 0x51d   :  { %v1722_v3 = vmul.f32 %v6175_v27, %v6139_v62  ;;  %v6187_v56 = vpop.eup %3960  ;;  %v6604_v62 = vld [vmem:[#allocation39_spill] sm:$0xff] }
 0x51e   :  { %v487_v0 = vmul.f32 %v6187_v56, %v6604_v62 }
 0x51f   :  { %v1727_v36 = vmul.f32 %v6179_v6, %v1722_v3 }
 0x520   :  { %v490_v57 = vmul.f32 %v488_v33, %v487_v0 }
 0x521   :  { %v1732_v9 = vadd.f32 %v6182_v29, %v1727_v36 }
 0x522   :  { %v493_v49 = vadd.f32 %v491_v32, %v490_v57 }
 0x523   :  { %v1736_v23 = vsub.f32 0.0, %v1732_v9 }
 0x524   :  { %v495_v63 = vsub.f32 0.0, %v493_v49 }
 0x525   :  { %v1743_v10 = vmul.f32 1.442695, %v1736_v23 }
 0x526   :  { %v498_v40 = vmul.f32 1.442695, %v495_v63 }
 0x527   :  { %3962 = vpow2.f32 %v1743_v10 }
 0x528   :  { %3964 = vpow2.f32 %v498_v40 }
 0x534   :  { %v3963_v13 = vpop.eup %3962 }
 0x535   :  { %v1748_v30 = vadd.f32 1.0, %v3963_v13  ;;  %v3965_v42 = vpop.eup %3964 }
 0x536   :  { %v3036_v22 = vpop.xlane.xlu0 %3035  ;;  %v501_v35 = vadd.f32 1.0, %v3965_v42 }
 0x537   :  { %v3037_v18 = vrot.slane %v3036_v22, 4  ;;  %3966 = vrcp.f32 %v1748_v30 }
 0x538   :  { %3968 = vrcp.f32 %v501_v35 }
 0x539   :  { %v3038_v19 = vadd.f32 %v3037_v18, %v3036_v22 }
 0x53b   :  { %v3039_v28 = vrot.slane %v3038_v19, 2 }
 0x53d   :  { %v3040_v8 = vadd.f32 %v3039_v28, %v3038_v19  ;;  %v3079_v28 = vstv %s3932_s15 }
 0x53f   :  { %v3041_v46 = vrot.slane %v3040_v8, 1 }
 0x541   :  { %v3042_v20 = vadd.f32 %v3041_v46, %v3040_v8  ;;  %v3084_v46 = vstv %s3933_s16 }
 0x543   :  { %3942 = vpush %v3042_v20 }
 0x544   :  { %v6199_v25 = vpop.eup %3966 }
 0x545   :  { %v3264_v54 = vcombine.high %v6199_v25, %v6199_v25  ;;  %v6216_v52 = vpop.eup %3968 }
 0x547   :  { %v6207_v50 = vrot.slane %v3264_v54, %v6202_v41 }
 0x549   :  { %v3280_v47 = vcombine.high %v6207_v50, %v6207_v50 }
 0x54b   :  { %v3308_v1 = vrot.slane %v3280_v47, %v6202_v41 }
 0x54d   :  { %v3432_v53 = vrot.slane %v3308_v1, %v6212_v45  ;;  %v3312_v5 = vcombine.high %v3308_v1, %v3308_v1 }
 0x54f   :  { %v6219_v59 = vadd.f32 %v6216_v52, %v3432_v53  ;;  %v3440_v2 = vrot.slane %v3312_v5, %v6212_v45 }
 0x551   :  { %v6223_v37 = vadd.f32 %v6216_v52, %v3440_v2 }
 0x574   :  { %s3943_s13 = spop %3942 }
 0x575   :  { %v3044_v39 = vstv %s3943_s13 }
 0x576   :  { %v3046_v15 = vmul.f32 0.00390625, %v3044_v39 }
 0x578   :  { %v3047_v44 = vsub.f32 %v6160_v26, %v3046_v15  ;;  %v3048_v16 = vsub.f32 %v6158_v4, %v3046_v15  ;;  %v3049_v11 = vsub.f32 %v6164_v58, %v3046_v15  ;;  %v3050_v38 = vsub.f32 %v6170_v61, %v3046_v15 }
 0x57a   :  { %v3051_v55 = vmul.f32 %v3047_v44, %v3047_v44  ;;  %v3052_v43 = vmul.f32 %v3048_v16, %v3048_v16  ;;  %v3053_v21 = vmul.f32 %v3049_v11, %v3049_v11  ;;  %v3054_v48 = vmul.f32 %v3050_v38, %v3050_v38 }
 0x57c   :  { %v3055_v14 = vsel %vm3027_vm12, %v3051_v55, 0.0  ;;  %v3056_v34 = vsel %vm3027_vm12, %v3052_v43, 0.0  ;;  %v3058_v36 = vsel %vm3027_vm12, %v3053_v21, 0.0  ;;  %v3060_v26 = vsel %vm3027_vm12, %v3054_v48, 0.0 }
 0x57d   :  { %v3057_v3 = vadd.f32 %v3056_v34, %v3055_v14  ;;  %v6234_v43 = vsub.s32 1, %v6605_v12  ;;  %v6237_v21 = vsub.s32 4, %v6605_v12 }
 0x57f   :  { %v3059_v9 = vadd.f32 %v3058_v36, %v3057_v3  ;;  %v6245_v3 = vsub.s32 6, %v6605_v12 }
 0x581   :  { %v3061_v23 = vadd.f32 %v3060_v26, %v3059_v9 }
 0x583   :  { %3062 = vadd.xlane.f32.xlu0 %v3061_v23  ;;  %v6250_v23 = vsub.s32 3, %v6605_v12 }
 0x60c   :  { %v3063_v4 = vpop.xlane.xlu0 %3062 }
 0x60d   :  { %v3064_v58 = vrot.slane %v3063_v4, 4 }
 0x60f   :  { %v3065_v62 = vadd.f32 %v3064_v58, %v3063_v4  ;;  %v6253_v58 = vsub.s32 5, %v6605_v12 }
 0x611   :  { %v3066_v61 = vrot.slane %v3065_v62, 2 }
 0x613   :  { %v3067_v0 = vadd.f32 %v3066_v61, %v3065_v62 }
 0x615   :  { %v3068_v10 = vrot.slane %v3067_v0, 1 }
 0x617   :  { %v3069_v57 = vadd.f32 %v3068_v10, %v3067_v0 }
 0x619   :  { %3944 = vpush %v3069_v57 }
 0x64a   :  { %s3945_s14 = spop %3944 }
 0x64b   :  { %v3071_v22 = vstv %s3945_s14 }
 0x64c   :  { %v3072_v18 = vmul.f32 0.00390625, %v3071_v22 }
 0x64e   :  { %v3073_v49 = vadd.f32 1e-05, %v3072_v18  ;;  %v6260_v18 = vsub.s32 7, %v6605_v12 }
 0x650   :  { %3970 = vrsqrt.f32 %v3073_v49 }
 0x65d   :  { %v3971_v19 = vpop.eup %3970 }
 0x65e   :  { %v3075_v63 = vmul.f32 %v3971_v19, %v3047_v44  ;;  %v3076_v8 = vmul.f32 %v3971_v19, %v3048_v16  ;;  %v3077_v35 = vmul.f32 %v3971_v19, %v3049_v11  ;;  %v3078_v2 = vmul.f32 %v3971_v19, %v3050_v38 }
 0x65f   :  { %v6242_v38 = vsub.s32 2, %v6605_v12 }
 0x660   :  { %v3080_v40 = vmul.f32 %v3079_v28, %v3075_v63  ;;  %v3081_v20 = vmul.f32 %v3079_v28, %v3076_v8  ;;  %v3082_v54 = vmul.f32 %v3079_v28, %v3077_v35  ;;  %v3083_v44 = vmul.f32 %v3079_v28, %v3078_v2 }
 0x662   :  { %v3085_v13 = vadd.f32 %v3084_v46, %v3080_v40  ;;  %v3086_v30 = vadd.f32 %v3084_v46, %v3081_v20  ;;  %v3087_v47 = vadd.f32 %v3084_v46, %v3082_v54  ;;  %v3088_v55 = vadd.f32 %v3084_v46, %v3083_v44 }
 0x664   :  { %v3089_v42 = vsub.f32 0.0, %v3085_v13  ;;  %v3090_v51 = vsub.f32 0.0, %v3086_v30  ;;  %v3091_v53 = vsub.f32 0.0, %v3087_v47  ;;  %v3092_v48 = vsub.f32 0.0, %v3088_v55 }
 0x666   :  { %v3093_v24 = vmul.f32 1.442695, %v3089_v42  ;;  %v3095_v7 = vmul.f32 1.442695, %v3090_v51  ;;  %v3097_v39 = vmul.f32 1.442695, %v3091_v53 }
 0x667   :  { %v3099_v36 = vmul.f32 1.442695, %v3092_v48 }
 0x668   :  { %3972 = vpow2.f32 %v3093_v24 }
 0x669   :  { %3974 = vpow2.f32 %v3095_v7 }
 0x675   :  { %v3973_v1 = vpop.eup %3972 }
 0x676   :  { %v3101_v5 = vadd.f32 1.0, %v3973_v1  ;;  %v3975_v15 = vpop.eup %3974  ;;  %v1719_v1 = vmul.f32 %v6175_v27, %v6130_v60 }
 0x677   :  { %v3102_v16 = vadd.f32 1.0, %v3975_v15 }
 0x678   :  { %3976 = vrcp.f32 %v3101_v5  ;;  %v1724_v2 = vmul.f32 %v6179_v6, %v1719_v1 }
 0x679   :  { %3978 = vpow2.f32 %v3097_v39 }
 0x67a   :  { %3980 = vrcp.f32 %v3102_v16  ;;  %v1729_v44 = vadd.f32 %v6182_v29, %v1724_v2 }
 0x67b   :  { %3982 = vpow2.f32 %v3099_v36 }
 0x67c   :  { %v1733_v55 = vsub.f32 0.0, %v1729_v44 }
 0x685   :  { %v3977_v11 = vpop.eup %3976 }
 0x686   :  { %v3515_v14 = vrot.slane %v3977_v11, %v6234_v43  ;;  %v3508_v34 = vrot.slane %v3977_v11, %v6212_v45  ;;  %v3536_v9 = vrot.slane %v3977_v11, %v6237_v21  ;;  %v3522_v26 = vrot.slane %v3977_v11, %v6242_v38  ;;  %v3979_v4 = vpop.eup %3978 }
 0x687   :  { %v3103_v62 = vadd.f32 1.0, %v3979_v4  ;;  %v3550_v61 = vrot.slane %v3977_v11, %v6245_v3  ;;  %v3529_v0 = vrot.slane %v3977_v11, %v6250_v23  ;;  %v3981_v10 = vpop.eup %3980  ;;  %v3543_v22 = vrot.slane %v3977_v11, %v6253_v58 }
 0x688   :  { %3517 = vbcast.lane.b32.xlu0 %v3515_v14, 256  ;;  %3510 = vbcast.lane.b32.xlu1 %v3508_v34, 256  ;;  %v3564_v57 = vrot.slane %v3981_v10, %v6212_v45  ;;  %v3578_v49 = vrot.slane %v3981_v10, %v6242_v38  ;;  %v3557_v19 = vrot.slane %v3977_v11, %v6260_v18  ;;  %v3983_v8 = vpop.eup %3982  ;;  %v1737_v34 = vmul.f32 1.442695, %v1733_v55 }
 0x689   :  { %3984 = vrcp.f32 %v3103_v62  ;;  %v3592_v28 = vrot.slane %v3981_v10, %v6237_v21  ;;  %v3571_v63 = vrot.slane %v3981_v10, %v6234_v43  ;;  %v3104_v46 = vadd.f32 1.0, %v3983_v8 }
 0x68a   :  { %v3606_v40 = vrot.slane %v3981_v10, %v6245_v3  ;;  %v3585_v12 = vrot.slane %v3981_v10, %v6250_v23  ;;  %v3599_v30 = vrot.slane %v3981_v10, %v6253_v58  ;;  %v3613_v51 = vrot.slane %v3981_v10, %v6260_v18 }
 0x68b   :  { %3986 = vrcp.f32 %v3104_v46  ;;  %v1720_v14 = vmul.f32 %v6175_v27, %v6133_v31  ;;  %v1721_v4 = vmul.f32 %v6175_v27, %v6136_v17 }
 0x68c   :  { %3538 = vbcast.lane.b32.xlu0 %v3536_v9, 256  ;;  %3524 = vbcast.lane.b32.xlu1 %v3522_v26, 256  ;;  %3988 = vpow2.f32 %v1737_v34 }
 0x68d   :  { %v1725_v36 = vmul.f32 %v6179_v6, %v1720_v14  ;;  %v4036_v14 = vld [vmem:[#allocation2 + $0x8] sm:$0xff] }
 0x68f   :  { %v1730_v26 = vadd.f32 %v6182_v29, %v1725_v36 }
 0x690   :  { %3552 = vbcast.lane.b32.xlu0 %v3550_v61, 256  ;;  %3531 = vbcast.lane.b32.xlu1 %v3529_v0, 256  ;;  %v1726_v61 = vmul.f32 %v6179_v6, %v1721_v4 }
 0x691   :  { %v1734_v31 = vsub.f32 0.0, %v1730_v26 }
 0x693   :  { %v1739_v62 = vmul.f32 1.442695, %v1734_v31 }
 0x694   :  { %3566 = vbcast.lane.b32.xlu0 %v3564_v57, 256  ;;  %3545 = vbcast.lane.b32.xlu1 %v3543_v22, 256  ;;  %v1731_v57 = vadd.f32 %v6182_v29, %v1726_v61 }
 0x695   :  { %3990 = vpow2.f32 %v1739_v62 }
 0x696   :  { %v3985_v20 = vpop.eup %3984 }
 0x697   :  { %v3620_v13 = vrot.slane %v3985_v20, %v6212_v45  ;;  %v3634_v42 = vrot.slane %v3985_v20, %v6242_v38  ;;  %v3648_v24 = vrot.slane %v3985_v20, %v6237_v21  ;;  %v3627_v35 = vrot.slane %v3985_v20, %v6234_v43 }
 0x698   :  { %3580 = vbcast.lane.b32.xlu0 %v3578_v49, 256  ;;  %3559 = vbcast.lane.b32.xlu1 %v3557_v19, 256  ;;  %v3662_v7 = vrot.slane %v3985_v20, %v6245_v3  ;;  %v3641_v54 = vrot.slane %v3985_v20, %v6250_v23  ;;  %v3987_v47 = vpop.eup %3986  ;;  %v3655_v5 = vrot.slane %v3985_v20, %v6253_v58 }
 0x699   :  { %v3676_v53 = vrot.slane %v3987_v47, %v6212_v45  ;;  %v3690_v39 = vrot.slane %v3987_v47, %v6242_v38  ;;  %v3669_v15 = vrot.slane %v3985_v20, %v6260_v18  ;;  %v3704_v16 = vrot.slane %v3987_v47, %v6237_v21  ;;  %v6606_v21 = vld [vmem:[#allocation36_spill] sm:$0xff] }
 0x69a   :  { %v3683_v60 = vrot.slane %v3987_v47, %v6234_v43  ;;  %v3718_v11 = vrot.slane %v3987_v47, %v6245_v3  ;;  %v3697_v48 = vrot.slane %v3987_v47, %v6250_v23  ;;  %v3711_v38 = vrot.slane %v3987_v47, %v6253_v58 }
 0x69b   :  { %v486_v43 = vmul.f32 %v6187_v56, %v6606_v21  ;;  %v3725_v9 = vrot.slane %v3987_v47, %v6260_v18  ;;  %v3989_v56 = vpop.eup %3988 }
 0x69c   :  { %3594 = vbcast.lane.b32.xlu0 %v3592_v28, 256  ;;  %3573 = vbcast.lane.b32.xlu1 %v3571_v63, 256  ;;  %v1745_v10 = vadd.f32 1.0, %v3989_v56 }
 0x69d   :  { %v489_v3 = vmul.f32 %v488_v33, %v486_v43  ;;  %v1735_v33 = vsub.f32 0.0, %v1731_v57  ;;  %v4038_v57 = vld [vmem:[#allocation2 + $0x20] sm:$0xff] }
 0x69f   :  { %v492_v23 = vadd.f32 %v491_v32, %v489_v3  ;;  %v1741_v22 = vmul.f32 1.442695, %v1735_v33 }
 0x6a0   :  { %3608 = vbcast.lane.b32.xlu0 %v3606_v40, 256  ;;  %3587 = vbcast.lane.b32.xlu1 %v3585_v12, 256 }
 0x6a1   :  { %v494_v58 = vsub.f32 0.0, %v492_v23 }
 0x6a2   :  { %v3991_v18 = vpop.eup %3990 }
 0x6a3   :  { %v496_v0 = vmul.f32 1.442695, %v494_v58  ;;  %v1746_v49 = vadd.f32 1.0, %v3991_v18 }
 0x6a4   :  { %3622 = vbcast.lane.b32.xlu0 %v3620_v13, 256  ;;  %3601 = vbcast.lane.b32.xlu1 %v3599_v30, 256 }
 0x6a5   :  { %3992 = vpow2.f32 %v496_v0 }
 0x6a6   :  { %3994 = vrcp.f32 %v1745_v10 }
 0x6a7   :  { %3996 = vpow2.f32 %v1741_v22  ;;  %v4039_v22 = vld [vmem:[#allocation2 + $0x10] sm:$0xff] }
 0x6a8   :  { %3636 = vbcast.lane.b32.xlu0 %v3634_v42, 256  ;;  %3615 = vbcast.lane.b32.xlu1 %v3613_v51, 256  ;;  %3998 = vrcp.f32 %v1746_v49 }
 0x6ac   :  { %3650 = vbcast.lane.b32.xlu0 %v3648_v24, 256  ;;  %3629 = vbcast.lane.b32.xlu1 %v3627_v35, 256 }
 0x6b0   :  { %3664 = vbcast.lane.b32.xlu0 %v3662_v7, 256  ;;  %3643 = vbcast.lane.b32.xlu1 %v3641_v54, 256 }
 0x6b2   :  { %v3993_v32 = vpop.eup %3992 }
 0x6b3   :  { %v3995_v19 = vpop.eup %3994  ;;  %v500_v17 = vadd.f32 1.0, %v3993_v32 }
 0x6b4   :  { %3678 = vbcast.lane.b32.xlu0 %v3676_v53, 256  ;;  %3657 = vbcast.lane.b32.xlu1 %v3655_v5, 256  ;;  %v3124_v27 = vrot.slane %v3995_v19, %v6202_v41  ;;  %v3117_v6 = vcombine.high %v3995_v19, %v3995_v19  ;;  %v3997_v63 = vpop.eup %3996 }
 0x6b5   :  { %4000 = vrcp.f32 %v500_v17  ;;  %v1747_v40 = vadd.f32 1.0, %v3997_v63  ;;  %v3999_v13 = vpop.eup %3998 }
 0x6b6   :  { %v3132_v28 = vcombine.high %v3124_v27, %v3124_v27  ;;  %v3140_v8 = vrot.slane %v3124_v27, %v6202_v41  ;;  %v3131_v29 = vrot.slane %v3117_v6, %v6202_v41  ;;  %v3173_v7 = vrot.slane %v3999_v13, %v6202_v41 }
 0x6b7   :  { %4002 = vrcp.f32 %v1747_v40 }
 0x6b8   :  { %3692 = vbcast.lane.b32.xlu0 %v3690_v39, 256  ;;  %3671 = vbcast.lane.b32.xlu1 %v3669_v15, 256  ;;  %v3154_v46 = vrot.slane %v3132_v28, %v6202_v41  ;;  %v3147_v12 = vrot.slane %v3131_v29, %v6202_v41  ;;  %v3162_v20 = vcombine.high %v3140_v8, %v3140_v8 }
 0x6b9   :  { %v3316_v42 = vrot.slane %v3140_v8, %v6212_v45  ;;  %v3133_v54 = vcombine.high %v3131_v29, %v3131_v29  ;;  %v3166_v15 = vcombine.high %v3999_v13, %v3999_v13  ;;  %v3181_v23 = vcombine.high %v3173_v7, %v3173_v7 }
 0x6ba   :  { %v3320_v30 = vrot.slane %v3154_v46, %v6212_v45  ;;  %v3332_v24 = vrot.slane %v3147_v12, %v6212_v45  ;;  %v3324_v35 = vrot.slane %v3162_v20, %v6212_v45  ;;  %v3163_v53 = vcombine.high %v3147_v12, %v3147_v12  ;;  %v4040_v20 = vld [vmem:[#allocation2 + $0x30] sm:$0xff] }
 0x6bb   :  { %v3164_v5 = vcombine.high %v3154_v46, %v3154_v46  ;;  %v6325_v26 = vrot.slane %v3166_v15, %v6202_v41  ;;  %v3203_v12 = vrot.slane %v3181_v23, %v6202_v41 }
 0x6bc   :  { %3706 = vbcast.lane.b32.xlu0 %v3704_v16, 256  ;;  %3685 = vbcast.lane.b32.xlu1 %v3683_v60, 256  ;;  %v3340_v43 = vrot.slane %v3163_v53, %v6212_v45 }
 0x6bd   :  { %v3328_v36 = vrot.slane %v3164_v5, %v6212_v45  ;;  %v3196_v27 = vrot.slane %v6325_v26, %v6202_v41 }
 0x6c0   :  { %3720 = vbcast.lane.b32.xlu0 %v3718_v11, 256  ;;  %3699 = vbcast.lane.b32.xlu1 %v3697_v48, 256  ;;  %v3189_v11 = vrot.slane %v3173_v7, %v6202_v41  ;;  %v3161_v48 = vrot.slane %v3133_v54, %v6202_v41 }
 0x6c2   :  { %v6311_v51 = vpop.eup %4000  ;;  %v3348_v56 = vrot.slane %v3189_v11, %v6212_v45  ;;  %v3336_v61 = vrot.slane %v3161_v48, %v6212_v45  ;;  %v3211_v0 = vcombine.high %v3189_v11, %v3189_v11  ;;  %v3165_v10 = vcombine.high %v3161_v48, %v3161_v48  ;;  %v4043_v48 = vld [vmem:[#allocation2 + $0x28] sm:$0xff] }
 0x6c3   :  { %v3474_v47 = vadd.f32 %v6311_v51, %v3320_v30  ;;  %v3473_v1 = vadd.f32 %v6311_v51, %v3316_v42  ;;  %v3477_v60 = vadd.f32 %v6311_v51, %v3332_v24  ;;  %v3475_v55 = vadd.f32 %v6311_v51, %v3324_v35  ;;  %v4041_v30 = vld [vmem:[#allocation2 + $0x18] sm:$0xff] }
 0x6c4   :  { %3713 = vbcast.lane.b32.xlu1 %v3711_v38, 256  ;;  %v4037_v38 = vld [vmem:[#allocation2] sm:$0xff]  ;;  %v3479_v32 = vadd.f32 %v6311_v51, %v3340_v43  ;;  %v3476_v49 = vadd.f32 %v6311_v51, %v3328_v36  ;;  %v4003_v6 = vpop.eup %4002  ;;  %v3481_v46 = vadd.f32 %v6311_v51, %v3348_v56  ;;  %v3356_v40 = vrot.slane %v3211_v0, %v6212_v45  ;;  %v4045_v0 = vld [vmem:[#allocation2 + $0x38] sm:$0xff] }
 0x6c5   :  { %v3478_v24 = vadd.f32 %v6311_v51, %v3336_v61  ;;  %v3344_v35 = vrot.slane %v3165_v10, %v6212_v45  ;;  %v4044_v61 = vld [vmem:[#allocation2 + $0x50] sm:$0xff] }
 0x6c6   :  { %v3483_v15 = vadd.f32 %v6311_v51, %v3356_v40 }
 0x6c8   :  { %3727 = vbcast.lane.b32.xlu1 %v3725_v9, 256 }
 0x6fa   :  { %v3518_v2 = vpop.permute.xlu0 %3517  ;;  %v3511_v39 = vpop.permute.xlu1 %3510 }
 0x6fb   :  { %v3730_v44 = vadd.f32 %v3518_v2, %v3474_v47  ;;  %v3729_v16 = vadd.f32 %v3511_v39, %v3473_v1  ;;  %v3212_v47 = vcombine.high %v3196_v27, %v3196_v27  ;;  %v6339_v1 = vrot.slane %v4003_v6, %v6202_v41 }
 0x6fd   :  { %v3762_v34 = vmul.f32 %v4036_v14, %v3730_v44  ;;  %v3761_v21 = vmul.f32 %v4037_v38, %v3729_v16  ;;  %v3364_v44 = vrot.slane %v3196_v27, %v6212_v45  ;;  %v3352_v16 = vrot.slane %v3203_v12, %v6212_v45 }
 0x6fe   :  { %v3539_v9 = vpop.permute.xlu0 %3538  ;;  %v3525_v3 = vpop.permute.xlu1 %3524  ;;  %v3182_v38 = vcombine.high %v6325_v26, %v6325_v26  ;;  %v3372_v36 = vrot.slane %v3212_v47, %v6212_v45  ;;  %v3238_v56 = vrot.slane %v6339_v1, %v6202_v41 }
 0x6ff   :  { %v3794_v31 = vmul.f32 0.33333334, %v3762_v34  ;;  %v3793_v4 = vmul.f32 0.33333334, %v3761_v21  ;;  %v3733_v58 = vadd.f32 %v3539_v9, %v3477_v60  ;;  %v3731_v62 = vadd.f32 %v3525_v3, %v3475_v55  ;;  %v4042_v55 = vld [vmem:[#allocation2 + $0x40] sm:$0xff] }
 0x700   :  { %v3213_v60 = vcombine.high %v3203_v12, %v3203_v12  ;;  %v3480_v34 = vadd.f32 %v6311_v51, %v3344_v35  ;;  %v3215_v9 = vcombine.high %v4003_v6, %v4003_v6  ;;  %v4047_v12 = vld [vmem:[#allocation2 + $0x48] sm:$0xff] }
 0x701   :  { %3826 = vst [vmem:[#allocation9 + $0x8] sm:$0xff] %v3794_v31  ;;  %3825 = vst [vmem:[#allocation9] sm:$0xff] %v3793_v4  ;;  %v3765_v33 = vmul.f32 %v4038_v57, %v3733_v58  ;;  %v3763_v18 = vmul.f32 %v4039_v22, %v3731_v62  ;;  %v3485_v58 = vadd.f32 %v6311_v51, %v3364_v44  ;;  %v4049_v44 = vld [vmem:[#allocation2 + $0x58] sm:$0xff] }
 0x702   :  { %v3553_v19 = vpop.permute.xlu0 %3552  ;;  %v3532_v17 = vpop.permute.xlu1 %3531  ;;  %v3360_v62 = vrot.slane %v3213_v60, %v6212_v45  ;;  %v3482_v57 = vadd.f32 %v6311_v51, %v3352_v16 }
 0x703   :  { %v3797_v28 = vmul.f32 0.33333334, %v3765_v33  ;;  %v3795_v63 = vmul.f32 0.33333334, %v3763_v18  ;;  %v3735_v8 = vadd.f32 %v3553_v19, %v3479_v32  ;;  %v3732_v29 = vadd.f32 %v3532_v17, %v3476_v49 }
 0x704   :  { %v3210_v33 = vrot.slane %v3182_v38, %v6202_v41  ;;  %v3487_v32 = vadd.f32 %v6311_v51, %v3372_v36  ;;  %v6356_v49 = vrot.slane %v3215_v9, %v6202_v41 }
 0x705   :  { %3829 = vst [vmem:[#allocation9 + $0x20] sm:$0xff] %v3797_v28  ;;  %3827 = vst [vmem:[#allocation9 + $0x10] sm:$0xff] %v3795_v63  ;;  %v3767_v13 = vmul.f32 %v4040_v20, %v3735_v8  ;;  %v3764_v42 = vmul.f32 %v4041_v30, %v3732_v29  ;;  %v3484_v28 = vadd.f32 %v6311_v51, %v3360_v62  ;;  %v4051_v62 = vld [vmem:[#allocation2 + $0x68] sm:$0xff] }
 0x706   :  { %v3567_v7 = vpop.permute.xlu0 %3566  ;;  %v3546_v54 = vpop.permute.xlu1 %3545  ;;  %v3380_v63 = vrot.slane %v3238_v56, %v6212_v45  ;;  %v3260_v8 = vcombine.high %v3238_v56, %v3238_v56  ;;  %v3230_v29 = vcombine.high %v6339_v1, %v6339_v1  ;;  %v3214_v30 = vcombine.high %v3210_v33, %v3210_v33 }
 0x707   :  { %v3799_v53 = vmul.f32 0.33333334, %v3767_v13  ;;  %v3796_v5 = vmul.f32 0.33333334, %v3764_v42  ;;  %v3737_v2 = vadd.f32 %v3567_v7, %v3481_v46  ;;  %v3734_v39 = vadd.f32 %v3546_v54, %v3478_v24  ;;  %v4046_v46 = vld [vmem:[#allocation2 + $0x60] sm:$0xff] }
 0x708   :  { %v3368_v13 = vrot.slane %v3210_v33, %v6212_v45  ;;  %v3245_v1 = vrot.slane %v6356_v49, %v6202_v41 }
 0x709   :  { %3831 = vst [vmem:[#allocation9 + $0x30] sm:$0xff] %v3799_v53  ;;  %3828 = vst [vmem:[#allocation9 + $0x18] sm:$0xff] %v3796_v5  ;;  %v3769_v11 = vmul.f32 %v4042_v55, %v3737_v2  ;;  %v3766_v14 = vmul.f32 %v4043_v48, %v3734_v39  ;;  %v3489_v53 = vadd.f32 %v6216_v52, %v3380_v63  ;;  %v4048_v39 = vld [vmem:[#allocation2 + $0x70] sm:$0xff] }
 0x70a   :  { %v3581_v21 = vpop.permute.xlu0 %3580  ;;  %v3560_v43 = vpop.permute.xlu1 %3559  ;;  %v3388_v5 = vrot.slane %v3260_v8, %v6212_v45  ;;  %v3252_v2 = vrot.slane %v3230_v29, %v6202_v41  ;;  %v3486_v60 = vadd.f32 %v6311_v51, %v3368_v13  ;;  %v3376_v55 = vrot.slane %v3214_v30, %v6212_v45 }
 0x70b   :  { %v3801_v3 = vmul.f32 0.33333334, %v3769_v11  ;;  %v3798_v23 = vmul.f32 0.33333334, %v3766_v14  ;;  %v3739_v31 = vadd.f32 %v3581_v21, %v3483_v15  ;;  %v3736_v4 = vadd.f32 %v3560_v43, %v3480_v34 }
 0x70c   :  { %v6372_v14 = vrot.slane %v6199_v25, %v6202_v41  ;;  %v3231_v34 = vcombine.high %v6356_v49, %v6356_v49  ;;  %v3396_v9 = vrot.slane %v3245_v1, %v6212_v45  ;;  %v3491_v56 = vadd.f32 %v6216_v52, %v3388_v5 }
 0x70d   :  { %3833 = vst [vmem:[#allocation9 + $0x40] sm:$0xff] %v3801_v3  ;;  %3830 = vst [vmem:[#allocation9 + $0x28] sm:$0xff] %v3798_v23  ;;  %v3771_v26 = vmul.f32 %v4044_v61, %v3739_v31  ;;  %v3768_v10 = vmul.f32 %v4045_v0, %v3736_v4  ;;  %v3384_v3 = vrot.slane %v3252_v2, %v6212_v45  ;;  %v4050_v4 = vld [vmem:[#allocation2 + $0x80] sm:$0xff] }
 0x70e   :  { %v3595_v22 = vpop.permute.xlu0 %3594  ;;  %v3574_v18 = vpop.permute.xlu1 %3573  ;;  %v3261_v23 = vcombine.high %v3245_v1, %v3245_v1  ;;  %v3262_v31 = vcombine.high %v3252_v2, %v3252_v2  ;;  %v3488_v61 = vadd.f32 %v6311_v51, %v3376_v55  ;;  %v4053_v51 = vld [vmem:[#allocation2 + $0x78] sm:$0xff] }
 0x70f   :  { %v3803_v19 = vmul.f32 0.33333334, %v3771_v26  ;;  %v3800_v17 = vmul.f32 0.33333334, %v3768_v10  ;;  %v3741_v27 = vadd.f32 %v3595_v22, %v3485_v58  ;;  %v3738_v6 = vadd.f32 %v3574_v18, %v3482_v57 }
 0x710   :  { %v3287_v10 = vrot.slane %v6372_v14, %v6202_v41  ;;  %v3404_v49 = vrot.slane %v3261_v23, %v6212_v45  ;;  %v3392_v63 = vrot.slane %v3262_v31, %v6212_v45 }
 0x711   :  { %3835 = vst [vmem:[#allocation9 + $0x50] sm:$0xff] %v3803_v19  ;;  %3832 = vst [vmem:[#allocation9 + $0x38] sm:$0xff] %v3800_v17  ;;  %v3773_v40 = vmul.f32 %v4046_v46, %v3741_v27  ;;  %v3770_v20 = vmul.f32 %v4047_v12, %v3738_v6  ;;  %v3259_v19 = vrot.slane %v3231_v34, %v6202_v41  ;;  %v4052_v17 = vld [vmem:[#allocation2 + $0x90] sm:$0xff] }
 0x712   :  { %v3609_v42 = vpop.permute.xlu0 %3608  ;;  %v3588_v24 = vpop.permute.xlu1 %3587  ;;  %v3412_v46 = vrot.slane %v3287_v10, %v6212_v45  ;;  %v3495_v30 = vadd.f32 %v6216_v52, %v3404_v49  ;;  %v3492_v5 = vadd.f32 %v6216_v52, %v3392_v63  ;;  %v4056_v34 = vld [vmem:[#allocation2 + $0xb0] sm:$0xff]  ;;  %v4061_v63 = vld [vmem:[#allocation2 + $0xb8] sm:$0xff] }
 0x713   :  { %v3805_v35 = vmul.f32 0.33333334, %v3773_v40  ;;  %v3802_v7 = vmul.f32 0.33333334, %v3770_v20  ;;  %v3743_v54 = vadd.f32 %v3609_v42, %v3487_v32  ;;  %v3740_v47 = vadd.f32 %v3588_v24, %v3484_v28 }
 0x714   :  { %v3493_v32 = vadd.f32 %v6216_v52, %v3396_v9  ;;  %v3490_v28 = vadd.f32 %v6216_v52, %v3384_v3  ;;  %v3309_v42 = vcombine.high %v3287_v10, %v3287_v10  ;;  %v3263_v24 = vcombine.high %v3259_v19, %v3259_v19 }
 0x715   :  { %3837 = vst [vmem:[#allocation9 + $0x60] sm:$0xff] %v3805_v35  ;;  %3834 = vst [vmem:[#allocation9 + $0x48] sm:$0xff] %v3802_v7  ;;  %v3775_v15 = vmul.f32 %v4048_v39, %v3743_v54  ;;  %v3772_v16 = vmul.f32 %v4049_v44, %v3740_v47  ;;  %v3279_v35 = vcombine.high %v6372_v14, %v6372_v14  ;;  %v4054_v7 = vld [vmem:[#allocation2 + $0xa0] sm:$0xff]  ;;  %v4055_v47 = vld [vmem:[#allocation2 + $0x88] sm:$0xff] }
 0x716   :  { %v3623_v11 = vpop.permute.xlu0 %3622  ;;  %v3602_v48 = vpop.permute.xlu1 %3601  ;;  %v3400_v1 = vrot.slane %v3259_v19, %v6212_v45  ;;  %v3497_v55 = vadd.f32 %v6216_v52, %v3412_v46  ;;  %v3294_v9 = vrot.slane %v6207_v50, %v6202_v41 }
 0x717   :  { %v3807_v38 = vmul.f32 0.33333334, %v3775_v15  ;;  %v3804_v21 = vmul.f32 0.33333334, %v3772_v16  ;;  %v3745_v43 = vadd.f32 %v3623_v11, %v3489_v53  ;;  %v3742_v36 = vadd.f32 %v3602_v48, %v3486_v60 }
 0x718   :  { %v3420_v11 = vrot.slane %v3309_v42, %v6212_v45  ;;  %v3408_v48 = vrot.slane %v3263_v24, %v6212_v45  ;;  %v3301_v14 = vrot.slane %v3279_v35, %v6202_v41  ;;  %v3428_v41 = vrot.slane %v3294_v9, %v6212_v45  ;;  %v4062_v24 = vld [vmem:[#allocation2 + $0xe0] sm:$0xff] }
 0x719   :  { %3839 = vst [vmem:[#allocation9 + $0x70] sm:$0xff] %v3807_v38  ;;  %3836 = vst [vmem:[#allocation9 + $0x58] sm:$0xff] %v3804_v21  ;;  %v3777_v58 = vmul.f32 %v4050_v4, %v3745_v43  ;;  %v3774_v25 = vmul.f32 %v4051_v62, %v3742_v36  ;;  %v4057_v21 = vld [vmem:[#allocation2 + $0x98] sm:$0xff]  ;;  %v3494_v36 = vadd.f32 %v6216_v52, %v3400_v1 }
 0x71a   :  { %v3637_v26 = vpop.permute.xlu0 %3636  ;;  %v3616_v0 = vpop.permute.xlu1 %3615  ;;  %v3310_v50 = vcombine.high %v3294_v9, %v3294_v9  ;;  %v4067_v9 = vld [vmem:[#allocation2 + $0xf8] sm:$0xff] }
 0x71b   :  { %v3809_v57 = vmul.f32 0.33333334, %v3777_v58  ;;  %v3806_v33 = vmul.f32 0.33333334, %v3774_v25  ;;  %v3747_v22 = vadd.f32 %v3637_v26, %v3491_v56  ;;  %v3744_v18 = vadd.f32 %v3616_v0, %v3488_v61  ;;  %v4058_v0 = vld [vmem:[#allocation2 + $0xc0] sm:$0xff] }
 0x71c   :  { %v3499_v25 = vadd.f32 %v6216_v52, %v3420_v11  ;;  %v3496_v56 = vadd.f32 %v6216_v52, %v3408_v48  ;;  %v3416_v61 = vrot.slane %v3301_v14, %v6212_v45  ;;  %v3311_v26 = vcombine.high %v3301_v14, %v3301_v14 }
 0x71d   :  { %3841 = vst [vmem:[#allocation9 + $0x80] sm:$0xff] %v3809_v57  ;;  %3838 = vst [vmem:[#allocation9 + $0x68] sm:$0xff] %v3806_v33  ;;  %v3779_v27 = vmul.f32 %v4052_v17, %v3747_v22  ;;  %v3776_v6 = vmul.f32 %v4053_v51, %v3744_v18  ;;  %v4059_v57 = vld [vmem:[#allocation2 + $0xa8] sm:$0xff]  ;;  %v3436_v46 = vrot.slane %v3310_v50, %v6212_v45 }
 0x71e   :  { %v3651_v8 = vpop.permute.xlu0 %3650  ;;  %v3630_v29 = vpop.permute.xlu1 %3629  ;;  %v3424_v51 = vrot.slane %v3311_v26, %v6212_v45 }
 0x71f   :  { %v3811_v40 = vmul.f32 0.33333334, %v3779_v27  ;;  %v3808_v12 = vmul.f32 0.33333334, %v3776_v6  ;;  %v3749_v20 = vadd.f32 %v3651_v8, %v3493_v32  ;;  %v3746_v13 = vadd.f32 %v3630_v29, %v3490_v28  ;;  %v4060_v6 = vld [vmem:[#allocation2 + $0xd0] sm:$0xff] }
 0x720   :  { %v3498_v27 = vadd.f32 %v6216_v52, %v3416_v61  ;;  %v3501_v29 = vadd.f32 %v6216_v52, %v3428_v41 }
 0x721   :  { %3843 = vst [vmem:[#allocation9 + $0x90] sm:$0xff] %v3811_v40  ;;  %3840 = vst [vmem:[#allocation9 + $0x78] sm:$0xff] %v3808_v12  ;;  %v3781_v54 = vmul.f32 %v4054_v7, %v3749_v20  ;;  %v3778_v53 = vmul.f32 %v4055_v47, %v3746_v13  ;;  %v4063_v7 = vld [vmem:[#allocation2 + $0xc8] sm:$0xff]  ;;  %v3503_v47 = vadd.f32 %v6216_v52, %v3436_v46 }
 0x722   :  { %v3665_v2 = vpop.permute.xlu0 %3664  ;;  %v3644_v39 = vpop.permute.xlu1 %3643 }
 0x723   :  { %v3813_v15 = vmul.f32 0.33333334, %v3781_v54  ;;  %v3810_v44 = vmul.f32 0.33333334, %v3778_v53  ;;  %v3751_v16 = vadd.f32 %v3665_v2, %v3495_v30  ;;  %v3748_v60 = vadd.f32 %v3644_v39, %v3492_v5 }
 0x724   :  { %v3500_v53 = vadd.f32 %v6216_v52, %v3424_v51  ;;  %v4066_v52 = vld [vmem:[#allocation2 + $0xe8] sm:$0xff] }
 0x725   :  { %3845 = vst [vmem:[#allocation9 + $0xa0] sm:$0xff] %v3813_v15  ;;  %3842 = vst [vmem:[#allocation9 + $0x88] sm:$0xff] %v3810_v44  ;;  %v3783_v38 = vmul.f32 %v4056_v34, %v3751_v16  ;;  %v3780_v43 = vmul.f32 %v4057_v21, %v3748_v60  ;;  %v4064_v44 = vld [vmem:[#allocation2 + $0xf0] sm:$0xff]  ;;  %v4065_v60 = vld [vmem:[#allocation2 + $0xd8] sm:$0xff] }
 0x726   :  { %v3679_v3 = vpop.permute.xlu0 %3678  ;;  %v3658_v23 = vpop.permute.xlu1 %3657 }
 0x727   :  { %v3815_v31 = vmul.f32 0.33333334, %v3783_v38  ;;  %v3812_v4 = vmul.f32 0.33333334, %v3780_v43  ;;  %v3753_v58 = vadd.f32 %v3679_v3, %v3497_v55  ;;  %v3750_v62 = vadd.f32 %v3658_v23, %v3494_v36 }
 0x729   :  { %3847 = vst [vmem:[#allocation9 + $0xb0] sm:$0xff] %v3815_v31  ;;  %3844 = vst [vmem:[#allocation9 + $0x98] sm:$0xff] %v3812_v4  ;;  %v3785_v10 = vmul.f32 %v4058_v0, %v3753_v58  ;;  %v3782_v33 = vmul.f32 %v4059_v57, %v3750_v62 }
 0x72a   :  { %v3693_v22 = vpop.permute.xlu0 %3692  ;;  %v3672_v18 = vpop.permute.xlu1 %3671 }
 0x72b   :  { %v3817_v32 = vmul.f32 0.33333334, %v3785_v10  ;;  %v3814_v49 = vmul.f32 0.33333334, %v3782_v33  ;;  %v3755_v19 = vadd.f32 %v3693_v22, %v3499_v25  ;;  %v3752_v17 = vadd.f32 %v3672_v18, %v3496_v56 }
 0x72d   :  { %3849 = vst [vmem:[#allocation9 + $0xc0] sm:$0xff] %v3817_v32  ;;  %3846 = vst [vmem:[#allocation9 + $0xa8] sm:$0xff] %v3814_v49  ;;  %v3787_v28 = vmul.f32 %v4060_v6, %v3755_v19  ;;  %v3784_v8 = vmul.f32 %v4061_v63, %v3752_v17 }
 0x72e   :  { %v3707_v40 = vpop.permute.xlu0 %3706  ;;  %v3686_v12 = vpop.permute.xlu1 %3685 }
 0x72f   :  { %v3819_v20 = vmul.f32 0.33333334, %v3787_v28  ;;  %v3816_v13 = vmul.f32 0.33333334, %v3784_v8  ;;  %v3757_v30 = vadd.f32 %v3707_v40, %v3501_v29  ;;  %v3754_v42 = vadd.f32 %v3686_v12, %v3498_v27 }
 0x731   :  { %3851 = vst [vmem:[#allocation9 + $0xd0] sm:$0xff] %v3819_v20  ;;  %3848 = vst [vmem:[#allocation9 + $0xb8] sm:$0xff] %v3816_v13  ;;  %v3789_v35 = vmul.f32 %v4062_v24, %v3757_v30  ;;  %v3786_v54 = vmul.f32 %v4063_v7, %v3754_v42 }
 0x732   :  { %v3721_v5 = vpop.permute.xlu0 %3720  ;;  %v3700_v1 = vpop.permute.xlu1 %3699 }
 0x733   :  { %v3821_v2 = vmul.f32 0.33333334, %v3789_v35  ;;  %v3818_v45 = vmul.f32 0.33333334, %v3786_v54  ;;  %v3759_v39 = vadd.f32 %v3721_v5, %v3503_v47  ;;  %v3756_v15 = vadd.f32 %v3700_v1, %v3500_v53 }
 0x735   :  { %3853 = vst [vmem:[#allocation9 + $0xe0] sm:$0xff] %v3821_v2  ;;  %3850 = vst [vmem:[#allocation9 + $0xc8] sm:$0xff] %v3818_v45  ;;  %v3791_v16 = vmul.f32 %v4064_v44, %v3759_v39  ;;  %v3788_v55 = vmul.f32 %v4065_v60, %v3756_v15 }
 0x736   :  { %v3714_v11 = vpop.permute.xlu1 %3713 }
 0x737   :  { %v3823_v48 = vmul.f32 0.33333334, %v3791_v16  ;;  %v3820_v14 = vmul.f32 0.33333334, %v3788_v55  ;;  %v3758_v34 = vadd.f32 %v3714_v11, %v6219_v59 }
 0x739   :  { %3855 = vst [vmem:[#allocation9 + $0xf0] sm:$0xff] %v3823_v48  ;;  %3852 = vst [vmem:[#allocation9 + $0xd8] sm:$0xff] %v3820_v14  ;;  %v3790_v38 = vmul.f32 %v4066_v52, %v3758_v34 }
 0x73a   :  { %v3728_v21 = vpop.permute.xlu1 %3727 }
 0x73b   :  { %v3822_v43 = vmul.f32 0.33333334, %v3790_v38  ;;  %v3760_v36 = vadd.f32 %v3728_v21, %v6223_v37 }
 0x73d   :  { %3854 = vst [vmem:[#allocation9 + $0xe8] sm:$0xff] %v3822_v43  ;;  %v3792_v3 = vmul.f32 %v4067_v9, %v3760_v36 }
 0x73f   :  { %v3824_v23 = vmul.f32 0.33333334, %v3792_v3 }
 0x741   :  { %3856 = vst [vmem:[#allocation9 + $0xf8] sm:$0xff] %v3824_v23 }
 0x742   :  { %4123 = shalt.err (!%p4120_p5)
}
 0x743   :  { %3868 = dma.vmem_to_hbm [thread:$0]  %s3863_s20, 4096, %s6421_s3, [#allocation4], %s4141_s18, %s4141_s18, %s4142_s19  }
 0x744   :  { %4138 = dma.done.wait [#allocation4], 4096  }
 0x745   :  { %4139 = vsyncadd [#allocation4], 4294963200 }
 0x746   :  { %3872 = vsyncpa [#allocation3], 1 }
 0x747   :  { %3873 = vsyncpa [#allocation4], 1 }
 0x748   :  { %3874 = vsyncpa [#allocation5], 1 }
 0x749   :  { %3875 = vsyncpa [#allocation8], 1 }

</bundles_post_ra>
